<compile_context>
chip_gen: v7x
topology: tpu7x:2x2x1
jax: 0.10.0
libtpu: 0.0.40
codegen_flags: <defaults>
</compile_context>

<pallas_src>
import functools
import numpy as np
import jax
import jax.numpy as jnp
from jax import lax
from jax.experimental import pallas as pl
from jax.experimental.pallas import tpu as pltpu


def _round_up(x, m):
    return (x + m - 1) // m * m


def _bigru_kernel(x_ref,
                  wih_f_ref, bx_f_ref, whh_f_ref, bhn_f_ref,
                  wih_b_ref, bx_b_ref, whh_b_ref, bhn_b_ref,
                  wlin_f_ref, wlin_b_ref, blin_ref,
                  out_ref,
                  gx_f_sc, gx_b_sc, hf_sc, hb_sc,
                  *, T, B, H):
    """Bidirectional GRU + fused Linear head (all shapes pre-padded to (8,128) tiles).

    x_ref     : (T*B, I)   bf16   (cast in the wrapper)
    wih_*_ref : (I, 3H)    bf16   gate order r | z | n (PyTorch)
    bx_*_ref  : (1, 3H)    f32    b_ih (+ b_hh for r,z gates) folded
    whh_*_ref : (H, 3H)    bf16
    bhn_*_ref : (1, H)     f32    hidden-side bias of the n gate (stays inside r*(...))
    wlin_*_ref: (H, O)     bf16   fwd / bwd halves of the Linear weight
    blin_ref  : (1, O)     f32
    out_ref   : (T*B, O)   f32    lane-dense output slab, accumulated in place
    """
    f32 = jnp.float32
    bf16 = jnp.bfloat16

    # ---- 1) Hoisted input projections: two big MXU matmuls with M = T*B. ----
    xb = x_ref[...]                                   # already bf16
    gx_f_sc[...] = (jnp.dot(xb, wih_f_ref[...], preferred_element_type=f32)
                    + bx_f_ref[...])
    gx_b_sc[...] = (jnp.dot(xb, wih_b_ref[...], preferred_element_type=f32)
                    + bx_b_ref[...])

    # ---- 2) Init output with the linear bias; the recurrence accumulates into it. ----
    out_ref[...] = jnp.broadcast_to(blin_ref[...], out_ref.shape).astype(out_ref.dtype)

    hf_sc[...] = jnp.zeros_like(hf_sc)
    hb_sc[...] = jnp.zeros_like(hb_sc)

    # Hoist loop-invariant ref reads out of the loop body.
    whh_f = whh_f_ref[...]
    whh_b = whh_b_ref[...]
    bhn_f = bhn_f_ref[...]
    bhn_b = bhn_b_ref[...]
    wlin_f = wlin_f_ref[...]
    wlin_b = wlin_b_ref[...]

    def gru_cell(gx, h, whh, bhn):
        # gx already holds x@W_ih + b_ih (+ b_hh for the r,z gates).
        gh = jnp.dot(h.astype(bf16), whh, preferred_element_type=f32)
        r = jax.nn.sigmoid(gx[:, 0:H] + gh[:, 0:H])
        z = jax.nn.sigmoid(gx[:, H:2 * H] + gh[:, H:2 * H])
        n = jnp.tanh(gx[:, 2 * H:3 * H] + r * (gh[:, 2 * H:3 * H] + bhn))
        return (1.0 - z) * n + z * h

    def step(t):
        # fwd step t and bwd step T-1-t, interleaved so the two independent chains
        # hide each other's MXU/EUP latency.
        row_f = pl.multiple_of(t * B, B)
        row_b = pl.multiple_of((T - 1 - t) * B, B)
        hf_new = gru_cell(gx_f_sc[pl.ds(row_f, B), :], hf_sc[...], whh_f, bhn_f)
        hb_new = gru_cell(gx_b_sc[pl.ds(row_b, B), :], hb_sc[...], whh_b, bhn_b)
        hf_sc[...] = hf_new
        hb_sc[...] = hb_new
        # Fused linear head: out rows get one fwd and one bwd additive contribution.
        out_ref[pl.ds(row_f, B), :] = (
            out_ref[pl.ds(row_f, B), :]
            + jnp.dot(hf_new.astype(bf16), wlin_f, preferred_element_type=f32))
        out_ref[pl.ds(row_b, B), :] = (
            out_ref[pl.ds(row_b, B), :]
            + jnp.dot(hb_new.astype(bf16), wlin_b, preferred_element_type=f32))

    UNROLL = 4                                   # 4 fwd + 4 bwd cells per iteration

    def body(p, carry):
        base = p * UNROLL
        for u in range(UNROLL):                  # statically unrolled
            step(base + u)
        return carry

    n_full = T // UNROLL
    if n_full > 0:
        lax.fori_loop(0, n_full, body, 0)
    for t in range(n_full * UNROLL, T):          # static tail (T is a Python int)
        step(t)


def _pad_gru_dir(wih, whh, bih, bhh, I_pad, H_pad):
    """Transpose + per-gate pad PyTorch-layout GRU params to MXU/lane-aligned layout."""
    threeH, I = wih.shape
    H = threeH // 3
    wih_p = jnp.zeros((I_pad, 3 * H_pad), jnp.float32)
    whh_p = jnp.zeros((H_pad, 3 * H_pad), jnp.float32)
    bx_p = jnp.zeros((3 * H_pad,), jnp.float32)
    bhn_p = jnp.zeros((H_pad,), jnp.float32)
    # Fold the hidden-side biases of the r,z gates into the input-side bias; the n gate's
    # hidden bias must stay inside the r * (...) term (PyTorch GRU semantics).
    bx = jnp.concatenate([bih[0:2 * H] + bhh[0:2 * H], bih[2 * H:3 * H]])
    for k in range(3):
        wih_p = wih_p.at[:I, k * H_pad:k * H_pad + H].set(wih[k * H:(k + 1) * H, :].T)
        whh_p = whh_p.at[:H, k * H_pad:k * H_pad + H].set(whh[k * H:(k + 1) * H, :].T)
        bx_p = bx_p.at[k * H_pad:k * H_pad + H].set(bx[k * H:(k + 1) * H])
    bhn_p = bhn_p.at[:H].set(bhh[2 * H:3 * H])
    return wih_p, whh_p, bx_p, bhn_p


def bidirectional_gru_forward(x, params):
    """x: (T, B, I) f32 -> (T, B, O) f32.  BidirectionalGRU.forward (nn.GRU + Linear)."""
    T, B, I = x.shape
    H = params['whh_f'].shape[1]
    O = params['blin'].shape[0]

    B_pad = _round_up(max(B, 8), 8)
    I_pad = _round_up(I, 128)
    H_pad = _round_up(H, 128)
    O_pad = _round_up(O, 128)
    TB = T * B_pad

    bf16 = jnp.bfloat16

    # Pad input to sublane/lane-aligned tiles, flatten, and cast to bf16 in the wrapper
    # (halves HBM->VMEM bytes; no in-kernel cast transient).
    x_p = jnp.zeros((T, B_pad, I_pad), bf16).at[:, :B, :I].set(x.astype(bf16))
    x2d = x_p.reshape(TB, I_pad)

    wih_f, whh_f, bx_f, bhn_f = _pad_gru_dir(params['wih_f'], params['whh_f'],
                                             params['bih_f'], params['bhh_f'],
                                             I_pad, H_pad)
    wih_b, whh_b, bx_b, bhn_b = _pad_gru_dir(params['wih_b'], params['whh_b'],
                                             params['bih_b'], params['bhh_b'],
                                             I_pad, H_pad)

    # Linear head (O, 2H): split into fwd/bwd halves, transpose and pad.
    wlin = params['wlin']
    wlin_f = jnp.zeros((H_pad, O_pad), jnp.float32).at[:H, :O].set(wlin[:, 0:H].T)
    wlin_b = jnp.zeros((H_pad, O_pad), jnp.float32).at[:H, :O].set(wlin[:, H:2 * H].T)
    blin_p = jnp.zeros((O_pad,), jnp.float32).at[:O].set(params['blin']).reshape(1, O_pad)

    kernel = functools.partial(_bigru_kernel, T=T, B=B_pad, H=H_pad)
    vmem_spec = pl.BlockSpec(memory_space=pltpu.MemorySpace.VMEM)

    # ---- VMEM accounting: every resident buffer + the projection transient. ----
    f32b, bf16b = 4, 2
    buf_bytes = (
        TB * I_pad * bf16b                     # x (bf16, cast in wrapper)
        + 2 * I_pad * 3 * H_pad * bf16b        # W_ih fwd/bwd
        + 2 * 3 * H_pad * f32b                 # folded input-side biases
        + 2 * H_pad * 3 * H_pad * bf16b        # W_hh fwd/bwd
        + 2 * H_pad * f32b                     # n-gate hidden biases
        + 2 * H_pad * O_pad * bf16b            # linear-head halves
        + O_pad * f32b                         # linear bias
        + TB * O_pad * f32b                    # output slab (accumulated in place)
        + 2 * TB * 3 * H_pad * f32b            # hoisted gate scratch fwd/bwd
        + 2 * B_pad * H_pad * f32b             # h carries
        + TB * 3 * H_pad * f32b                # transient: one projection result
    )
    # Generation-aware cap (v7x has only 64 MiB / TensorCore; v5e/v6e have 128 MiB).
    try:
        vmem_cap = int(pltpu.get_tpu_info().vmem_capacity_bytes)
    except Exception:
        vmem_cap = 64 << 20                    # conservative fallback
    cap = max(int(vmem_cap * 0.8), 32 << 20)
    vmem_limit = min(max(int(buf_bytes * 1.3) + (4 << 20), 32 << 20), cap)

    out2d = pl.pallas_call(
        kernel,
        out_shape=jax.ShapeDtypeStruct((TB, O_pad), jnp.float32),
        in_specs=[vmem_spec] * 12,
        out_specs=vmem_spec,
        scratch_shapes=[
            pltpu.VMEM((TB, 3 * H_pad), jnp.float32),   # hoisted fwd input gates
            pltpu.VMEM((TB, 3 * H_pad), jnp.float32),   # hoisted bwd input gates
            pltpu.VMEM((B_pad, H_pad), jnp.float32),    # fwd h carry
            pltpu.VMEM((B_pad, H_pad), jnp.float32),    # bwd h carry
        ],
        compiler_params=pltpu.CompilerParams(vmem_limit_bytes=vmem_limit),
    )(x2d,
      wih_f.astype(bf16), bx_f.reshape(1, 3 * H_pad),
      whh_f.astype(bf16), bhn_f.reshape(1, H_pad),
      wih_b.astype(bf16), bx_b.reshape(1, 3 * H_pad),
      whh_b.astype(bf16), bhn_b.reshape(1, H_pad),
      wlin_f.astype(bf16), wlin_b.astype(bf16), blin_p)

    return out2d.reshape(T, B_pad, O_pad)[:, :B, :O]


# ---------------- pure-JAX reference (PyTorch nn.GRU + Linear semantics) ----------------
def _gru_dir_ref(x, wih, whh, bih, bhh, reverse, mm_dtype):
    H = whh.shape[1]
    B = x.shape[1]
    wih_t = wih.T.astype(mm_dtype)
    whh_t = whh.T.astype(mm_dtype)

    def step(h, x_t):
        gx = jnp.dot(x_t.astype(mm_dtype), wih_t, preferred_element_type=jnp.float32) + bih
        gh = jnp.dot(h.astype(mm_dtype), whh_t, preferred_element_type=jnp.float32) + bhh
        r = jax.nn.sigmoid(gx[:, 0:H] + gh[:, 0:H])
        z = jax.nn.sigmoid(gx[:, H:2 * H] + gh[:, H:2 * H])
        n = jnp.tanh(gx[:, 2 * H:3 * H] + r * gh[:, 2 * H:3 * H])
        h_new = (1.0 - z) * n + z * h
        return h_new, h_new

    xs = x[::-1] if reverse else x
    h0 = jnp.zeros((B, H), jnp.float32)
    _, hs = lax.scan(step, h0, xs)
    return hs[::-1] if reverse else hs


def reference_forward(x, params, mm_dtype=jnp.bfloat16):
    hs_f = _gru_dir_ref(x, params['wih_f'], params['whh_f'],
                        params['bih_f'], params['bhh_f'], False, mm_dtype)
    hs_b = _gru_dir_ref(x, params['wih_b'], params['whh_b'],
                        params['bih_b'], params['bhh_b'], True, mm_dtype)
    rec = jnp.concatenate([hs_f, hs_b], axis=-1)
    T, B, D = rec.shape
    out = (jnp.dot(rec.reshape(T * B, D).astype(mm_dtype),
                   params['wlin'].T.astype(mm_dtype),
                   preferred_element_type=jnp.float32)
           + params['blin'])
    return out.reshape(T, B, -1)


def init_params(key, input_size, hidden_size, output_size):
    """Deterministic PyTorch-style init; PyTorch layouts (weight_ih (3H,I), etc.)."""
    H, I, O = hidden_size, input_size, output_size
    k = 1.0 / np.sqrt(H)
    kl = 1.0 / np.sqrt(2 * H)
    keys = jax.random.split(key, 10)

    def u(kk, shape, bound):
        return jax.random.uniform(kk, shape, jnp.float32, -bound, bound)

    return dict(
        wih_f=u(keys[0], (3 * H, I), k), whh_f=u(keys[1], (3 * H, H), k),
        bih_f=u(keys[2], (3 * H,), k), bhh_f=u(keys[3], (3 * H,), k),
        wih_b=u(keys[4], (3 * H, I), k), whh_b=u(keys[5], (3 * H, H), k),
        bih_b=u(keys[6], (3 * H,), k), bhh_b=u(keys[7], (3 * H,), k),
        wlin=u(keys[8], (O, 2 * H), kl), blin=u(keys[9], (O,), kl),
    )


if __name__ == "__main__":
    key = jax.random.PRNGKey(0)
    fwd = jax.jit(bidirectional_gru_forward)

    # Case 1: (8,128)-aligned small shapes (no padding needed).
    T, B, I, H, O = 16, 8, 128, 128, 128
    kx, kp, key = jax.random.split(key, 3)
    x = jax.random.normal(kx, (T, B, I), jnp.float32)
    params = init_params(kp, I, H, O)
    out = jax.block_until_ready(fwd(x, params))
    ref = reference_forward(x, params)
    np.testing.assert_allclose(np.asarray(out), np.asarray(ref), rtol=3e-3, atol=3e-3)
    assert out.shape == (T, B, O)

    # Case 2: unaligned toy shapes (exercises the padding path).
    T, B, I, H, O = 8, 2, 16, 32, 16
    kx, kp = jax.random.split(key)
    x = jax.random.normal(kx, (T, B, I), jnp.float32)
    params = init_params(kp, I, H, O)
    out = jax.block_until_ready(fwd(x, params))
    ref = reference_forward(x, params)
    np.testing.assert_allclose(np.asarray(out), np.asarray(ref), rtol=3e-3, atol=3e-3)
    assert out.shape == (T, B, O)

    print("KERNEL_OK")
</pallas_src>

<mosaic_0001>
module attributes {stable_mosaic.version = 11 : i64} {
  func.func @_bigru_kernel(%arg0: memref<128x128xbf16, #tpu.memory_space<vmem>>, %arg1: memref<128x384xbf16, #tpu.memory_space<vmem>>, %arg2: memref<1x384xf32, #tpu.memory_space<vmem>>, %arg3: memref<128x384xbf16, #tpu.memory_space<vmem>>, %arg4: memref<1x128xf32, #tpu.memory_space<vmem>>, %arg5: memref<128x384xbf16, #tpu.memory_space<vmem>>, %arg6: memref<1x384xf32, #tpu.memory_space<vmem>>, %arg7: memref<128x384xbf16, #tpu.memory_space<vmem>>, %arg8: memref<1x128xf32, #tpu.memory_space<vmem>>, %arg9: memref<128x128xbf16, #tpu.memory_space<vmem>>, %arg10: memref<128x128xbf16, #tpu.memory_space<vmem>>, %arg11: memref<1x128xf32, #tpu.memory_space<vmem>>, %arg12: memref<128x128xf32, #tpu.memory_space<vmem>>, %arg13: memref<128x384xf32, #tpu.memory_space<vmem>>, %arg14: memref<128x384xf32, #tpu.memory_space<vmem>>, %arg15: memref<8x128xf32, #tpu.memory_space<vmem>>, %arg16: memref<8x128xf32, #tpu.memory_space<vmem>>) attributes {dimension_semantics = [], scalar_prefetch = 0 : i64, scratch_operands = 4 : i64, tpu.core_type = #tpu.core_type<tc>} {
    %c0 = arith.constant 0 : index
    %c0_0 = arith.constant 0 : index
    %0 = vector.load %arg0[%c0, %c0_0] : memref<128x128xbf16, #tpu.memory_space<vmem>>, vector<128x128xbf16>
    %c0_1 = arith.constant 0 : index
    %c0_2 = arith.constant 0 : index
    %1 = vector.load %arg1[%c0_1, %c0_2] : memref<128x384xbf16, #tpu.memory_space<vmem>>, vector<128x384xbf16>
    %cst = arith.constant dense<0.000000e+00> : vector<128x384xf32>
    %2 = tpu.matmul %0, %1, %cst {dimension_numbers = #tpu.dot_dimension_numbers<[1], [0], [0], [1], [0, 0, 1, 1], [], []>} : vector<128x128xbf16>, vector<128x384xbf16>, vector<128x384xf32> -> vector<128x384xf32>
    %c0_3 = arith.constant 0 : index
    %c0_4 = arith.constant 0 : index
    %3 = vector.load %arg2[%c0_3, %c0_4] : memref<1x384xf32, #tpu.memory_space<vmem>>, vector<1x384xf32>
    %4 = vector.broadcast %3 : vector<1x384xf32> to vector<128x384xf32>
    %5 = arith.addf %2, %4 : vector<128x384xf32>
    %c0_5 = arith.constant 0 : index
    %c0_6 = arith.constant 0 : index
    %6 = vector.load %arg13[%c0_5, %c0_6] : memref<128x384xf32, #tpu.memory_space<vmem>>, vector<128x384xf32>
    tpu.vector_store %arg13[%c0_5, %c0_6], %5 {strides = array<i32>} : memref<128x384xf32, #tpu.memory_space<vmem>>, vector<128x384xf32>,
    %c0_7 = arith.constant 0 : index
    %c0_8 = arith.constant 0 : index
    %7 = vector.load %arg5[%c0_7, %c0_8] : memref<128x384xbf16, #tpu.memory_space<vmem>>, vector<128x384xbf16>
    %cst_9 = arith.constant dense<0.000000e+00> : vector<128x384xf32>
    %8 = tpu.matmul %0, %7, %cst_9 {dimension_numbers = #tpu.dot_dimension_numbers<[1], [0], [0], [1], [0, 0, 1, 1], [], []>} : vector<128x128xbf16>, vector<128x384xbf16>, vector<128x384xf32> -> vector<128x384xf32>
    %c0_10 = arith.constant 0 : index
    %c0_11 = arith.constant 0 : index
    %9 = vector.load %arg6[%c0_10, %c0_11] : memref<1x384xf32, #tpu.memory_space<vmem>>, vector<1x384xf32>
    %10 = vector.broadcast %9 : vector<1x384xf32> to vector<128x384xf32>
    %11 = arith.addf %8, %10 : vector<128x384xf32>
    %c0_12 = arith.constant 0 : index
    %c0_13 = arith.constant 0 : index
    %12 = vector.load %arg14[%c0_12, %c0_13] : memref<128x384xf32, #tpu.memory_space<vmem>>, vector<128x384xf32>
    tpu.vector_store %arg14[%c0_12, %c0_13], %11 {strides = array<i32>} : memref<128x384xf32, #tpu.memory_space<vmem>>, vector<128x384xf32>,
    %c0_14 = arith.constant 0 : index
    %c0_15 = arith.constant 0 : index
    %13 = vector.load %arg11[%c0_14, %c0_15] : memref<1x128xf32, #tpu.memory_space<vmem>>, vector<1x128xf32>
    %14 = vector.shape_cast %13 : vector<1x128xf32> to vector<1x128xf32>
    %15 = vector.broadcast %14 : vector<1x128xf32> to vector<128x128xf32>
    %c0_16 = arith.constant 0 : index
    %c0_17 = arith.constant 0 : index
    %16 = vector.load %arg12[%c0_16, %c0_17] : memref<128x128xf32, #tpu.memory_space<vmem>>, vector<128x128xf32>
    tpu.vector_store %arg12[%c0_16, %c0_17], %15 {strides = array<i32>} : memref<128x128xf32, #tpu.memory_space<vmem>>, vector<128x128xf32>,
    %cst_18 = arith.constant 0.000000e+00 : f32
    %17 = vector.broadcast %cst_18 : f32 to vector<8x128xf32>
    %c0_19 = arith.constant 0 : index
    %c0_20 = arith.constant 0 : index
    %18 = vector.load %arg15[%c0_19, %c0_20] : memref<8x128xf32, #tpu.memory_space<vmem>>, vector<8x128xf32>
    tpu.vector_store %arg15[%c0_19, %c0_20], %17 {strides = array<i32>} : memref<8x128xf32, #tpu.memory_space<vmem>>, vector<8x128xf32>,
    %cst_21 = arith.constant 0.000000e+00 : f32
    %19 = vector.broadcast %cst_21 : f32 to vector<8x128xf32>
    %c0_22 = arith.constant 0 : index
    %c0_23 = arith.constant 0 : index
    %20 = vector.load %arg16[%c0_22, %c0_23] : memref<8x128xf32, #tpu.memory_space<vmem>>, vector<8x128xf32>
    tpu.vector_store %arg16[%c0_22, %c0_23], %19 {strides = array<i32>} : memref<8x128xf32, #tpu.memory_space<vmem>>, vector<8x128xf32>,
    %c0_24 = arith.constant 0 : index
    %c0_25 = arith.constant 0 : index
    %21 = vector.load %arg3[%c0_24, %c0_25] : memref<128x384xbf16, #tpu.memory_space<vmem>>, vector<128x384xbf16>
    %c0_26 = arith.constant 0 : index
    %c0_27 = arith.constant 0 : index
    %22 = vector.load %arg7[%c0_26, %c0_27] : memref<128x384xbf16, #tpu.memory_space<vmem>>, vector<128x384xbf16>
    %c0_28 = arith.constant 0 : index
    %c0_29 = arith.constant 0 : index
    %23 = vector.load %arg4[%c0_28, %c0_29] : memref<1x128xf32, #tpu.memory_space<vmem>>, vector<1x128xf32>
    %c0_30 = arith.constant 0 : index
    %c0_31 = arith.constant 0 : index
    %24 = vector.load %arg8[%c0_30, %c0_31] : memref<1x128xf32, #tpu.memory_space<vmem>>, vector<1x128xf32>
    %c0_32 = arith.constant 0 : index
    %c0_33 = arith.constant 0 : index
    %25 = vector.load %arg9[%c0_32, %c0_33] : memref<128x128xbf16, #tpu.memory_space<vmem>>, vector<128x128xbf16>
    %c0_34 = arith.constant 0 : index
    %c0_35 = arith.constant 0 : index
    %26 = vector.load %arg10[%c0_34, %c0_35] : memref<128x128xbf16, #tpu.memory_space<vmem>>, vector<128x128xbf16>
    %c0_i32 = arith.constant 0 : i32
    %c4_i32 = arith.constant 4 : i32
    %27 = arith.addi %c0_i32, %c4_i32 : i32
    %c1_i32 = arith.constant 1 : i32
    scf.for %arg17 = %c0_i32 to %27 step %c1_i32  : i32 {
      %c4_i32_37 = arith.constant 4 : i32
      %28 = arith.muli %arg17, %c4_i32_37 : i32
      %c0_i32_38 = arith.constant 0 : i32
      %29 = arith.addi %28, %c0_i32_38 : i32
      %c8_i32 = arith.constant 8 : i32
      %30 = arith.muli %29, %c8_i32 : i32
      %31 = tpu.assume_multiple %30, 8 : i32
      %c15_i32 = arith.constant 15 : i32
      %32 = arith.subi %c15_i32, %29 : i32
      %c8_i32_39 = arith.constant 8 : i32
      %33 = arith.muli %32, %c8_i32_39 : i32
      %34 = tpu.assume_multiple %33, 8 : i32
      %35 = arith.index_cast %31 : i32 to index
      %c0_40 = arith.constant 0 : index
      %36 = vector.load %arg13[%35, %c0_40] : memref<128x384xf32, #tpu.memory_space<vmem>>, vector<8x384xf32>
      %c0_41 = arith.constant 0 : index
      %c0_42 = arith.constant 0 : index
      %37 = vector.load %arg15[%c0_41, %c0_42] : memref<8x128xf32, #tpu.memory_space<vmem>>, vector<8x128xf32>
      %38 = arith.truncf %37 : vector<8x128xf32> to vector<8x128xbf16>
      %cst_43 = arith.constant dense<0.000000e+00> : vector<8x384xf32>
      %39 = tpu.matmul %38, %21, %cst_43 {dimension_numbers = #tpu.dot_dimension_numbers<[1], [0], [0], [1], [0, 0, 1, 1], [], []>} : vector<8x128xbf16>, vector<128x384xbf16>, vector<8x384xf32> -> vector<8x384xf32>
      %40 = vector.extract_strided_slice %36 {offsets = [0, 0], sizes = [8, 128], strides = [1, 1]} : vector<8x384xf32> to vector<8x128xf32>
      %41 = vector.extract_strided_slice %39 {offsets = [0, 0], sizes = [8, 128], strides = [1, 1]} : vector<8x384xf32> to vector<8x128xf32>
      %42 = arith.addf %40, %41 : vector<8x128xf32>
      %43 = arith.negf %42 : vector<8x128xf32>
      %44 = math.exp %43 : vector<8x128xf32>
      %cst_44 = arith.constant 1.000000e+00 : f32
      %45 = vector.broadcast %cst_44 : f32 to vector<8x128xf32>
      %46 = arith.addf %45, %44 : vector<8x128xf32>
      %47 = arith.divf %45, %46 : vector<8x128xf32>
      %48 = vector.extract_strided_slice %36 {offsets = [0, 128], sizes = [8, 128], strides = [1, 1]} : vector<8x384xf32> to vector<8x128xf32>
      %49 = vector.extract_strided_slice %39 {offsets = [0, 128], sizes = [8, 128], strides = [1, 1]} : vector<8x384xf32> to vector<8x128xf32>
      %50 = arith.addf %48, %49 : vector<8x128xf32>
      %51 = arith.negf %50 : vector<8x128xf32>
      %52 = math.exp %51 : vector<8x128xf32>
      %cst_45 = arith.constant 1.000000e+00 : f32
      %53 = vector.broadcast %cst_45 : f32 to vector<8x128xf32>
      %54 = arith.addf %53, %52 : vector<8x128xf32>
      %55 = arith.divf %53, %54 : vector<8x128xf32>
      %56 = vector.extract_strided_slice %36 {offsets = [0, 256], sizes = [8, 128], strides = [1, 1]} : vector<8x384xf32> to vector<8x128xf32>
      %57 = vector.extract_strided_slice %39 {offsets = [0, 256], sizes = [8, 128], strides = [1, 1]} : vector<8x384xf32> to vector<8x128xf32>
      %58 = vector.broadcast %23 : vector<1x128xf32> to vector<8x128xf32>
      %59 = arith.addf %57, %58 : vector<8x128xf32>
      %60 = arith.mulf %47, %59 : vector<8x128xf32>
      %61 = arith.addf %56, %60 : vector<8x128xf32>
      %62 = math.tanh %61 : vector<8x128xf32>
      %cst_46 = arith.constant 1.000000e+00 : f32
      %63 = vector.broadcast %cst_46 : f32 to vector<8x128xf32>
      %64 = arith.subf %63, %55 : vector<8x128xf32>
      %65 = arith.mulf %64, %62 : vector<8x128xf32>
      %66 = arith.mulf %55, %37 : vector<8x128xf32>
      %67 = arith.addf %65, %66 : vector<8x128xf32>
      %68 = arith.index_cast %34 : i32 to index
      %c0_47 = arith.constant 0 : index
      %69 = vector.load %arg14[%68, %c0_47] : memref<128x384xf32, #tpu.memory_space<vmem>>, vector<8x384xf32>
      %c0_48 = arith.constant 0 : index
      %c0_49 = arith.constant 0 : index
      %70 = vector.load %arg16[%c0_48, %c0_49] : memref<8x128xf32, #tpu.memory_space<vmem>>, vector<8x128xf32>
      %71 = arith.truncf %70 : vector<8x128xf32> to vector<8x128xbf16>
      %cst_50 = arith.constant dense<0.000000e+00> : vector<8x384xf32>
      %72 = tpu.matmul %71, %22, %cst_50 {dimension_numbers = #tpu.dot_dimension_numbers<[1], [0], [0], [1], [0, 0, 1, 1], [], []>} : vector<8x128xbf16>, vector<128x384xbf16>, vector<8x384xf32> -> vector<8x384xf32>
      %73 = vector.extract_strided_slice %69 {offsets = [0, 0], sizes = [8, 128], strides = [1, 1]} : vector<8x384xf32> to vector<8x128xf32>
      %74 = vector.extract_strided_slice %72 {offsets = [0, 0], sizes = [8, 128], strides = [1, 1]} : vector<8x384xf32> to vector<8x128xf32>
      %75 = arith.addf %73, %74 : vector<8x128xf32>
      %76 = arith.negf %75 : vector<8x128xf32>
      %77 = math.exp %76 : vector<8x128xf32>
      %cst_51 = arith.constant 1.000000e+00 : f32
      %78 = vector.broadcast %cst_51 : f32 to vector<8x128xf32>
      %79 = arith.addf %78, %77 : vector<8x128xf32>
      %80 = arith.divf %78, %79 : vector<8x128xf32>
      %81 = vector.extract_strided_slice %69 {offsets = [0, 128], sizes = [8, 128], strides = [1, 1]} : vector<8x384xf32> to vector<8x128xf32>
      %82 = vector.extract_strided_slice %72 {offsets = [0, 128], sizes = [8, 128], strides = [1, 1]} : vector<8x384xf32> to vector<8x128xf32>
      %83 = arith.addf %81, %82 : vector<8x128xf32>
      %84 = arith.negf %83 : vector<8x128xf32>
      %85 = math.exp %84 : vector<8x128xf32>
      %cst_52 = arith.constant 1.000000e+00 : f32
      %86 = vector.broadcast %cst_52 : f32 to vector<8x128xf32>
      %87 = arith.addf %86, %85 : vector<8x128xf32>
      %88 = arith.divf %86, %87 : vector<8x128xf32>
      %89 = vector.extract_strided_slice %69 {offsets = [0, 256], sizes = [8, 128], strides = [1, 1]} : vector<8x384xf32> to vector<8x128xf32>
      %90 = vector.extract_strided_slice %72 {offsets = [0, 256], sizes = [8, 128], strides = [1, 1]} : vector<8x384xf32> to vector<8x128xf32>
      %91 = vector.broadcast %24 : vector<1x128xf32> to vector<8x128xf32>
      %92 = arith.addf %90, %91 : vector<8x128xf32>
      %93 = arith.mulf %80, %92 : vector<8x128xf32>
      %94 = arith.addf %89, %93 : vector<8x128xf32>
      %95 = math.tanh %94 : vector<8x128xf32>
      %cst_53 = arith.constant 1.000000e+00 : f32
      %96 = vector.broadcast %cst_53 : f32 to vector<8x128xf32>
      %97 = arith.subf %96, %88 : vector<8x128xf32>
      %98 = arith.mulf %97, %95 : vector<8x128xf32>
      %99 = arith.mulf %88, %70 : vector<8x128xf32>
      %100 = arith.addf %98, %99 : vector<8x128xf32>
      %c0_54 = arith.constant 0 : index
      %c0_55 = arith.constant 0 : index
      %101 = vector.load %arg15[%c0_54, %c0_55] : memref<8x128xf32, #tpu.memory_space<vmem>>, vector<8x128xf32>
      tpu.vector_store %arg15[%c0_54, %c0_55], %67 {strides = array<i32>} : memref<8x128xf32, #tpu.memory_space<vmem>>, vector<8x128xf32>,
      %c0_56 = arith.constant 0 : index
      %c0_57 = arith.constant 0 : index
      %102 = vector.load %arg16[%c0_56, %c0_57] : memref<8x128xf32, #tpu.memory_space<vmem>>, vector<8x128xf32>
      tpu.vector_store %arg16[%c0_56, %c0_57], %100 {strides = array<i32>} : memref<8x128xf32, #tpu.memory_space<vmem>>, vector<8x128xf32>,
      %103 = arith.index_cast %31 : i32 to index
      %c0_58 = arith.constant 0 : index
      %104 = vector.load %arg12[%103, %c0_58] : memref<128x128xf32, #tpu.memory_space<vmem>>, vector<8x128xf32>
      %105 = arith.truncf %67 : vector<8x128xf32> to vector<8x128xbf16>
      %cst_59 = arith.constant dense<0.000000e+00> : vector<8x128xf32>
      %106 = tpu.matmul %105, %25, %cst_59 {dimension_numbers = #tpu.dot_dimension_numbers<[1], [0], [0], [1], [0, 0, 1, 1], [], []>} : vector<8x128xbf16>, vector<128x128xbf16>, vector<8x128xf32> -> vector<8x128xf32>
      %107 = arith.addf %104, %106 : vector<8x128xf32>
      %108 = arith.index_cast %31 : i32 to index
      %c0_60 = arith.constant 0 : index
      %109 = vector.load %arg12[%108, %c0_60] : memref<128x128xf32, #tpu.memory_space<vmem>>, vector<8x128xf32>
      tpu.vector_store %arg12[%108, %c0_60], %107 {strides = array<i32>} : memref<128x128xf32, #tpu.memory_space<vmem>>, vector<8x128xf32>,
      %110 = arith.index_cast %34 : i32 to index
      %c0_61 = arith.constant 0 : index
      %111 = vector.load %arg12[%110, %c0_61] : memref<128x128xf32, #tpu.memory_space<vmem>>, vector<8x128xf32>
      %112 = arith.truncf %100 : vector<8x128xf32> to vector<8x128xbf16>
      %cst_62 = arith.constant dense<0.000000e+00> : vector<8x128xf32>
      %113 = tpu.matmul %112, %26, %cst_62 {dimension_numbers = #tpu.dot_dimension_numbers<[1], [0], [0], [1], [0, 0, 1, 1], [], []>} : vector<8x128xbf16>, vector<128x128xbf16>, vector<8x128xf32> -> vector<8x128xf32>
      %114 = arith.addf %111, %113 : vector<8x128xf32>
      %115 = arith.index_cast %34 : i32 to index
      %c0_63 = arith.constant 0 : index
      %116 = vector.load %arg12[%115, %c0_63] : memref<128x128xf32, #tpu.memory_space<vmem>>, vector<8x128xf32>
      tpu.vector_store %arg12[%115, %c0_63], %114 {strides = array<i32>} : memref<128x128xf32, #tpu.memory_space<vmem>>, vector<8x128xf32>,
      %c1_i32_64 = arith.constant 1 : i32
      %117 = arith.addi %28, %c1_i32_64 : i32
      %c8_i32_65 = arith.constant 8 : i32
      %118 = arith.muli %117, %c8_i32_65 : i32
      %119 = tpu.assume_multiple %118, 8 : i32
      %c15_i32_66 = arith.constant 15 : i32
      %120 = arith.subi %c15_i32_66, %117 : i32
      %c8_i32_67 = arith.constant 8 : i32
      %121 = arith.muli %120, %c8_i32_67 : i32
      %122 = tpu.assume_multiple %121, 8 : i32
      %123 = arith.index_cast %119 : i32 to index
      %c0_68 = arith.constant 0 : index
      %124 = vector.load %arg13[%123, %c0_68] : memref<128x384xf32, #tpu.memory_space<vmem>>, vector<8x384xf32>
      %c0_69 = arith.constant 0 : index
      %c0_70 = arith.constant 0 : index
      %125 = vector.load %arg15[%c0_69, %c0_70] : memref<8x128xf32, #tpu.memory_space<vmem>>, vector<8x128xf32>
      %126 = arith.truncf %125 : vector<8x128xf32> to vector<8x128xbf16>
      %cst_71 = arith.constant dense<0.000000e+00> : vector<8x384xf32>
      %127 = tpu.matmul %126, %21, %cst_71 {dimension_numbers = #tpu.dot_dimension_numbers<[1], [0], [0], [1], [0, 0, 1, 1], [], []>} : vector<8x128xbf16>, vector<128x384xbf16>, vector<8x384xf32> -> vector<8x384xf32>
      %128 = vector.extract_strided_slice %124 {offsets = [0, 0], sizes = [8, 128], strides = [1, 1]} : vector<8x384xf32> to vector<8x128xf32>
      %129 = vector.extract_strided_slice %127 {offsets = [0, 0], sizes = [8, 128], strides = [1, 1]} : vector<8x384xf32> to vector<8x128xf32>
      %130 = arith.addf %128, %129 : vector<8x128xf32>
      %131 = arith.negf %130 : vector<8x128xf32>
      %132 = math.exp %131 : vector<8x128xf32>
      %cst_72 = arith.constant 1.000000e+00 : f32
      %133 = vector.broadcast %cst_72 : f32 to vector<8x128xf32>
      %134 = arith.addf %133, %132 : vector<8x128xf32>
      %135 = arith.divf %133, %134 : vector<8x128xf32>
      %136 = vector.extract_strided_slice %124 {offsets = [0, 128], sizes = [8, 128], strides = [1, 1]} : vector<8x384xf32> to vector<8x128xf32>
      %137 = vector.extract_strided_slice %127 {offsets = [0, 128], sizes = [8, 128], strides = [1, 1]} : vector<8x384xf32> to vector<8x128xf32>
      %138 = arith.addf %136, %137 : vector<8x128xf32>
      %139 = arith.negf %138 : vector<8x128xf32>
      %140 = math.exp %139 : vector<8x128xf32>
      %cst_73 = arith.constant 1.000000e+00 : f32
      %141 = vector.broadcast %cst_73 : f32 to vector<8x128xf32>
      %142 = arith.addf %141, %140 : vector<8x128xf32>
      %143 = arith.divf %141, %142 : vector<8x128xf32>
      %144 = vector.extract_strided_slice %124 {offsets = [0, 256], sizes = [8, 128], strides = [1, 1]} : vector<8x384xf32> to vector<8x128xf32>
      %145 = vector.extract_strided_slice %127 {offsets = [0, 256], sizes = [8, 128], strides = [1, 1]} : vector<8x384xf32> to vector<8x128xf32>
      %146 = vector.broadcast %23 : vector<1x128xf32> to vector<8x128xf32>
      %147 = arith.addf %145, %146 : vector<8x128xf32>
      %148 = arith.mulf %135, %147 : vector<8x128xf32>
      %149 = arith.addf %144, %148 : vector<8x128xf32>
      %150 = math.tanh %149 : vector<8x128xf32>
      %cst_74 = arith.constant 1.000000e+00 : f32
      %151 = vector.broadcast %cst_74 : f32 to vector<8x128xf32>
      %152 = arith.subf %151, %143 : vector<8x128xf32>
      %153 = arith.mulf %152, %150 : vector<8x128xf32>
      %154 = arith.mulf %143, %125 : vector<8x128xf32>
      %155 = arith.addf %153, %154 : vector<8x128xf32>
      %156 = arith.index_cast %122 : i32 to index
      %c0_75 = arith.constant 0 : index
      %157 = vector.load %arg14[%156, %c0_75] : memref<128x384xf32, #tpu.memory_space<vmem>>, vector<8x384xf32>
      %c0_76 = arith.constant 0 : index
      %c0_77 = arith.constant 0 : index
      %158 = vector.load %arg16[%c0_76, %c0_77] : memref<8x128xf32, #tpu.memory_space<vmem>>, vector<8x128xf32>
      %159 = arith.truncf %158 : vector<8x128xf32> to vector<8x128xbf16>
      %cst_78 = arith.constant dense<0.000000e+00> : vector<8x384xf32>
      %160 = tpu.matmul %159, %22, %cst_78 {dimension_numbers = #tpu.dot_dimension_numbers<[1], [0], [0], [1], [0, 0, 1, 1], [], []>} : vector<8x128xbf16>, vector<128x384xbf16>, vector<8x384xf32> -> vector<8x384xf32>
      %161 = vector.extract_strided_slice %157 {offsets = [0, 0], sizes = [8, 128], strides = [1, 1]} : vector<8x384xf32> to vector<8x128xf32>
      %162 = vector.extract_strided_slice %160 {offsets = [0, 0], sizes = [8, 128], strides = [1, 1]} : vector<8x384xf32> to vector<8x128xf32>
      %163 = arith.addf %161, %162 : vector<8x128xf32>
      %164 = arith.negf %163 : vector<8x128xf32>
      %165 = math.exp %164 : vector<8x128xf32>
      %cst_79 = arith.constant 1.000000e+00 : f32
      %166 = vector.broadcast %cst_79 : f32 to vector<8x128xf32>
      %167 = arith.addf %166, %165 : vector<8x128xf32>
      %168 = arith.divf %166, %167 : vector<8x128xf32>
      %169 = vector.extract_strided_slice %157 {offsets = [0, 128], sizes = [8, 128], strides = [1, 1]} : vector<8x384xf32> to vector<8x128xf32>
      %170 = vector.extract_strided_slice %160 {offsets = [0, 128], sizes = [8, 128], strides = [1, 1]} : vector<8x384xf32> to vector<8x128xf32>
      %171 = arith.addf %169, %170 : vector<8x128xf32>
      %172 = arith.negf %171 : vector<8x128xf32>
      %173 = math.exp %172 : vector<8x128xf32>
      %cst_80 = arith.constant 1.000000e+00 : f32
      %174 = vector.broadcast %cst_80 : f32 to vector<8x128xf32>
      %175 = arith.addf %174, %173 : vector<8x128xf32>
      %176 = arith.divf %174, %175 : vector<8x128xf32>
      %177 = vector.extract_strided_slice %157 {offsets = [0, 256], sizes = [8, 128], strides = [1, 1]} : vector<8x384xf32> to vector<8x128xf32>
      %178 = vector.extract_strided_slice %160 {offsets = [0, 256], sizes = [8, 128], strides = [1, 1]} : vector<8x384xf32> to vector<8x128xf32>
      %179 = vector.broadcast %24 : vector<1x128xf32> to vector<8x128xf32>
      %180 = arith.addf %178, %179 : vector<8x128xf32>
      %181 = arith.mulf %168, %180 : vector<8x128xf32>
      %182 = arith.addf %177, %181 : vector<8x128xf32>
      %183 = math.tanh %182 : vector<8x128xf32>
      %cst_81 = arith.constant 1.000000e+00 : f32
      %184 = vector.broadcast %cst_81 : f32 to vector<8x128xf32>
      %185 = arith.subf %184, %176 : vector<8x128xf32>
      %186 = arith.mulf %185, %183 : vector<8x128xf32>
      %187 = arith.mulf %176, %158 : vector<8x128xf32>
      %188 = arith.addf %186, %187 : vector<8x128xf32>
      %c0_82 = arith.constant 0 : index
      %c0_83 = arith.constant 0 : index
      %189 = vector.load %arg15[%c0_82, %c0_83] : memref<8x128xf32, #tpu.memory_space<vmem>>, vector<8x128xf32>
      tpu.vector_store %arg15[%c0_82, %c0_83], %155 {strides = array<i32>} : memref<8x128xf32, #tpu.memory_space<vmem>>, vector<8x128xf32>,
      %c0_84 = arith.constant 0 : index
      %c0_85 = arith.constant 0 : index
      %190 = vector.load %arg16[%c0_84, %c0_85] : memref<8x128xf32, #tpu.memory_space<vmem>>, vector<8x128xf32>
      tpu.vector_store %arg16[%c0_84, %c0_85], %188 {strides = array<i32>} : memref<8x128xf32, #tpu.memory_space<vmem>>, vector<8x128xf32>,
      %191 = arith.index_cast %119 : i32 to index
      %c0_86 = arith.constant 0 : index
      %192 = vector.load %arg12[%191, %c0_86] : memref<128x128xf32, #tpu.memory_space<vmem>>, vector<8x128xf32>
      %193 = arith.truncf %155 : vector<8x128xf32> to vector<8x128xbf16>
      %cst_87 = arith.constant dense<0.000000e+00> : vector<8x128xf32>
      %194 = tpu.matmul %193, %25, %cst_87 {dimension_numbers = #tpu.dot_dimension_numbers<[1], [0], [0], [1], [0, 0, 1, 1], [], []>} : vector<8x128xbf16>, vector<128x128xbf16>, vector<8x128xf32> -> vector<8x128xf32>
      %195 = arith.addf %192, %194 : vector<8x128xf32>
      %196 = arith.index_cast %119 : i32 to index
      %c0_88 = arith.constant 0 : index
      %197 = vector.load %arg12[%196, %c0_88] : memref<128x128xf32, #tpu.memory_space<vmem>>, vector<8x128xf32>
      tpu.vector_store %arg12[%196, %c0_88], %195 {strides = array<i32>} : memref<128x128xf32, #tpu.memory_space<vmem>>, vector<8x128xf32>,
      %198 = arith.index_cast %122 : i32 to index
      %c0_89 = arith.constant 0 : index
      %199 = vector.load %arg12[%198, %c0_89] : memref<128x128xf32, #tpu.memory_space<vmem>>, vector<8x128xf32>
      %200 = arith.truncf %188 : vector<8x128xf32> to vector<8x128xbf16>
      %cst_90 = arith.constant dense<0.000000e+00> : vector<8x128xf32>
      %201 = tpu.matmul %200, %26, %cst_90 {dimension_numbers = #tpu.dot_dimension_numbers<[1], [0], [0], [1], [0, 0, 1, 1], [], []>} : vector<8x128xbf16>, vector<128x128xbf16>, vector<8x128xf32> -> vector<8x128xf32>
      %202 = arith.addf %199, %201 : vector<8x128xf32>
      %203 = arith.index_cast %122 : i32 to index
      %c0_91 = arith.constant 0 : index
      %204 = vector.load %arg12[%203, %c0_91] : memref<128x128xf32, #tpu.memory_space<vmem>>, vector<8x128xf32>
      tpu.vector_store %arg12[%203, %c0_91], %202 {strides = array<i32>} : memref<128x128xf32, #tpu.memory_space<vmem>>, vector<8x128xf32>,
      %c2_i32 = arith.constant 2 : i32
      %205 = arith.addi %28, %c2_i32 : i32
      %c8_i32_92 = arith.constant 8 : i32
      %206 = arith.muli %205, %c8_i32_92 : i32
      %207 = tpu.assume_multiple %206, 8 : i32
      %c15_i32_93 = arith.constant 15 : i32
      %208 = arith.subi %c15_i32_93, %205 : i32
      %c8_i32_94 = arith.constant 8 : i32
      %209 = arith.muli %208, %c8_i32_94 : i32
      %210 = tpu.assume_multiple %209, 8 : i32
      %211 = arith.index_cast %207 : i32 to index
      %c0_95 = arith.constant 0 : index
      %212 = vector.load %arg13[%211, %c0_95] : memref<128x384xf32, #tpu.memory_space<vmem>>, vector<8x384xf32>
      %c0_96 = arith.constant 0 : index
      %c0_97 = arith.constant 0 : index
      %213 = vector.load %arg15[%c0_96, %c0_97] : memref<8x128xf32, #tpu.memory_space<vmem>>, vector<8x128xf32>
      %214 = arith.truncf %213 : vector<8x128xf32> to vector<8x128xbf16>
      %cst_98 = arith.constant dense<0.000000e+00> : vector<8x384xf32>
      %215 = tpu.matmul %214, %21, %cst_98 {dimension_numbers = #tpu.dot_dimension_numbers<[1], [0], [0], [1], [0, 0, 1, 1], [], []>} : vector<8x128xbf16>, vector<128x384xbf16>, vector<8x384xf32> -> vector<8x384xf32>
      %216 = vector.extract_strided_slice %212 {offsets = [0, 0], sizes = [8, 128], strides = [1, 1]} : vector<8x384xf32> to vector<8x128xf32>
      %217 = vector.extract_strided_slice %215 {offsets = [0, 0], sizes = [8, 128], strides = [1, 1]} : vector<8x384xf32> to vector<8x128xf32>
      %218 = arith.addf %216, %217 : vector<8x128xf32>
      %219 = arith.negf %218 : vector<8x128xf32>
      %220 = math.exp %219 : vector<8x128xf32>
      %cst_99 = arith.constant 1.000000e+00 : f32
      %221 = vector.broadcast %cst_99 : f32 to vector<8x128xf32>
      %222 = arith.addf %221, %220 : vector<8x128xf32>
      %223 = arith.divf %221, %222 : vector<8x128xf32>
      %224 = vector.extract_strided_slice %212 {offsets = [0, 128], sizes = [8, 128], strides = [1, 1]} : vector<8x384xf32> to vector<8x128xf32>
      %225 = vector.extract_strided_slice %215 {offsets = [0, 128], sizes = [8, 128], strides = [1, 1]} : vector<8x384xf32> to vector<8x128xf32>
      %226 = arith.addf %224, %225 : vector<8x128xf32>
      %227 = arith.negf %226 : vector<8x128xf32>
      %228 = math.exp %227 : vector<8x128xf32>
      %cst_100 = arith.constant 1.000000e+00 : f32
      %229 = vector.broadcast %cst_100 : f32 to vector<8x128xf32>
      %230 = arith.addf %229, %228 : vector<8x128xf32>
      %231 = arith.divf %229, %230 : vector<8x128xf32>
      %232 = vector.extract_strided_slice %212 {offsets = [0, 256], sizes = [8, 128], strides = [1, 1]} : vector<8x384xf32> to vector<8x128xf32>
      %233 = vector.extract_strided_slice %215 {offsets = [0, 256], sizes = [8, 128], strides = [1, 1]} : vector<8x384xf32> to vector<8x128xf32>
      %234 = vector.broadcast %23 : vector<1x128xf32> to vector<8x128xf32>
      %235 = arith.addf %233, %234 : vector<8x128xf32>
      %236 = arith.mulf %223, %235 : vector<8x128xf32>
      %237 = arith.addf %232, %236 : vector<8x128xf32>
      %238 = math.tanh %237 : vector<8x128xf32>
      %cst_101 = arith.constant 1.000000e+00 : f32
      %239 = vector.broadcast %cst_101 : f32 to vector<8x128xf32>
      %240 = arith.subf %239, %231 : vector<8x128xf32>
      %241 = arith.mulf %240, %238 : vector<8x128xf32>
      %242 = arith.mulf %231, %213 : vector<8x128xf32>
      %243 = arith.addf %241, %242 : vector<8x128xf32>
      %244 = arith.index_cast %210 : i32 to index
      %c0_102 = arith.constant 0 : index
      %245 = vector.load %arg14[%244, %c0_102] : memref<128x384xf32, #tpu.memory_space<vmem>>, vector<8x384xf32>
      %c0_103 = arith.constant 0 : index
      %c0_104 = arith.constant 0 : index
      %246 = vector.load %arg16[%c0_103, %c0_104] : memref<8x128xf32, #tpu.memory_space<vmem>>, vector<8x128xf32>
      %247 = arith.truncf %246 : vector<8x128xf32> to vector<8x128xbf16>
      %cst_105 = arith.constant dense<0.000000e+00> : vector<8x384xf32>
      %248 = tpu.matmul %247, %22, %cst_105 {dimension_numbers = #tpu.dot_dimension_numbers<[1], [0], [0], [1], [0, 0, 1, 1], [], []>} : vector<8x128xbf16>, vector<128x384xbf16>, vector<8x384xf32> -> vector<8x384xf32>
      %249 = vector.extract_strided_slice %245 {offsets = [0, 0], sizes = [8, 128], strides = [1, 1]} : vector<8x384xf32> to vector<8x128xf32>
      %250 = vector.extract_strided_slice %248 {offsets = [0, 0], sizes = [8, 128], strides = [1, 1]} : vector<8x384xf32> to vector<8x128xf32>
      %251 = arith.addf %249, %250 : vector<8x128xf32>
      %252 = arith.negf %251 : vector<8x128xf32>
      %253 = math.exp %252 : vector<8x128xf32>
      %cst_106 = arith.constant 1.000000e+00 : f32
      %254 = vector.broadcast %cst_106 : f32 to vector<8x128xf32>
      %255 = arith.addf %254, %253 : vector<8x128xf32>
      %256 = arith.divf %254, %255 : vector<8x128xf32>
      %257 = vector.extract_strided_slice %245 {offsets = [0, 128], sizes = [8, 128], strides = [1, 1]} : vector<8x384xf32> to vector<8x128xf32>
      %258 = vector.extract_strided_slice %248 {offsets = [0, 128], sizes = [8, 128], strides = [1, 1]} : vector<8x384xf32> to vector<8x128xf32>
      %259 = arith.addf %257, %258 : vector<8x128xf32>
      %260 = arith.negf %259 : vector<8x128xf32>
      %261 = math.exp %260 : vector<8x128xf32>
      %cst_107 = arith.constant 1.000000e+00 : f32
      %262 = vector.broadcast %cst_107 : f32 to vector<8x128xf32>
      %263 = arith.addf %262, %261 : vector<8x128xf32>
      %264 = arith.divf %262, %263 : vector<8x128xf32>
      %265 = vector.extract_strided_slice %245 {offsets = [0, 256], sizes = [8, 128], strides = [1, 1]} : vector<8x384xf32> to vector<8x128xf32>
      %266 = vector.extract_strided_slice %248 {offsets = [0, 256], sizes = [8, 128], strides = [1, 1]} : vector<8x384xf32> to vector<8x128xf32>
      %267 = vector.broadcast %24 : vector<1x128xf32> to vector<8x128xf32>
      %268 = arith.addf %266, %267 : vector<8x128xf32>
      %269 = arith.mulf %256, %268 : vector<8x128xf32>
      %270 = arith.addf %265, %269 : vector<8x128xf32>
      %271 = math.tanh %270 : vector<8x128xf32>
      %cst_108 = arith.constant 1.000000e+00 : f32
      %272 = vector.broadcast %cst_108 : f32 to vector<8x128xf32>
      %273 = arith.subf %272, %264 : vector<8x128xf32>
      %274 = arith.mulf %273, %271 : vector<8x128xf32>
      %275 = arith.mulf %264, %246 : vector<8x128xf32>
      %276 = arith.addf %274, %275 : vector<8x128xf32>
      %c0_109 = arith.constant 0 : index
      %c0_110 = arith.constant 0 : index
      %277 = vector.load %arg15[%c0_109, %c0_110] : memref<8x128xf32, #tpu.memory_space<vmem>>, vector<8x128xf32>
      tpu.vector_store %arg15[%c0_109, %c0_110], %243 {strides = array<i32>} : memref<8x128xf32, #tpu.memory_space<vmem>>, vector<8x128xf32>,
      %c0_111 = arith.constant 0 : index
      %c0_112 = arith.constant 0 : index
      %278 = vector.load %arg16[%c0_111, %c0_112] : memref<8x128xf32, #tpu.memory_space<vmem>>, vector<8x128xf32>
      tpu.vector_store %arg16[%c0_111, %c0_112], %276 {strides = array<i32>} : memref<8x128xf32, #tpu.memory_space<vmem>>, vector<8x128xf32>,
      %279 = arith.index_cast %207 : i32 to index
      %c0_113 = arith.constant 0 : index
      %280 = vector.load %arg12[%279, %c0_113] : memref<128x128xf32, #tpu.memory_space<vmem>>, vector<8x128xf32>
      %281 = arith.truncf %243 : vector<8x128xf32> to vector<8x128xbf16>
      %cst_114 = arith.constant dense<0.000000e+00> : vector<8x128xf32>
      %282 = tpu.matmul %281, %25, %cst_114 {dimension_numbers = #tpu.dot_dimension_numbers<[1], [0], [0], [1], [0, 0, 1, 1], [], []>} : vector<8x128xbf16>, vector<128x128xbf16>, vector<8x128xf32> -> vector<8x128xf32>
      %283 = arith.addf %280, %282 : vector<8x128xf32>
      %284 = arith.index_cast %207 : i32 to index
      %c0_115 = arith.constant 0 : index
      %285 = vector.load %arg12[%284, %c0_115] : memref<128x128xf32, #tpu.memory_space<vmem>>, vector<8x128xf32>
      tpu.vector_store %arg12[%284, %c0_115], %283 {strides = array<i32>} : memref<128x128xf32, #tpu.memory_space<vmem>>, vector<8x128xf32>,
      %286 = arith.index_cast %210 : i32 to index
      %c0_116 = arith.constant 0 : index
      %287 = vector.load %arg12[%286, %c0_116] : memref<128x128xf32, #tpu.memory_space<vmem>>, vector<8x128xf32>
      %288 = arith.truncf %276 : vector<8x128xf32> to vector<8x128xbf16>
      %cst_117 = arith.constant dense<0.000000e+00> : vector<8x128xf32>
      %289 = tpu.matmul %288, %26, %cst_117 {dimension_numbers = #tpu.dot_dimension_numbers<[1], [0], [0], [1], [0, 0, 1, 1], [], []>} : vector<8x128xbf16>, vector<128x128xbf16>, vector<8x128xf32> -> vector<8x128xf32>
      %290 = arith.addf %287, %289 : vector<8x128xf32>
      %291 = arith.index_cast %210 : i32 to index
      %c0_118 = arith.constant 0 : index
      %292 = vector.load %arg12[%291, %c0_118] : memref<128x128xf32, #tpu.memory_space<vmem>>, vector<8x128xf32>
      tpu.vector_store %arg12[%291, %c0_118], %290 {strides = array<i32>} : memref<128x128xf32, #tpu.memory_space<vmem>>, vector<8x128xf32>,
      %c3_i32 = arith.constant 3 : i32
      %293 = arith.addi %28, %c3_i32 : i32
      %c8_i32_119 = arith.constant 8 : i32
      %294 = arith.muli %293, %c8_i32_119 : i32
      %295 = tpu.assume_multiple %294, 8 : i32
      %c15_i32_120 = arith.constant 15 : i32
      %296 = arith.subi %c15_i32_120, %293 : i32
      %c8_i32_121 = arith.constant 8 : i32
      %297 = arith.muli %296, %c8_i32_121 : i32
      %298 = tpu.assume_multiple %297, 8 : i32
      %299 = arith.index_cast %295 : i32 to index
      %c0_122 = arith.constant 0 : index
      %300 = vector.load %arg13[%299, %c0_122] : memref<128x384xf32, #tpu.memory_space<vmem>>, vector<8x384xf32>
      %c0_123 = arith.constant 0 : index
      %c0_124 = arith.constant 0 : index
      %301 = vector.load %arg15[%c0_123, %c0_124] : memref<8x128xf32, #tpu.memory_space<vmem>>, vector<8x128xf32>
      %302 = arith.truncf %301 : vector<8x128xf32> to vector<8x128xbf16>
      %cst_125 = arith.constant dense<0.000000e+00> : vector<8x384xf32>
      %303 = tpu.matmul %302, %21, %cst_125 {dimension_numbers = #tpu.dot_dimension_numbers<[1], [0], [0], [1], [0, 0, 1, 1], [], []>} : vector<8x128xbf16>, vector<128x384xbf16>, vector<8x384xf32> -> vector<8x384xf32>
      %304 = vector.extract_strided_slice %300 {offsets = [0, 0], sizes = [8, 128], strides = [1, 1]} : vector<8x384xf32> to vector<8x128xf32>
      %305 = vector.extract_strided_slice %303 {offsets = [0, 0], sizes = [8, 128], strides = [1, 1]} : vector<8x384xf32> to vector<8x128xf32>
      %306 = arith.addf %304, %305 : vector<8x128xf32>
      %307 = arith.negf %306 : vector<8x128xf32>
      %308 = math.exp %307 : vector<8x128xf32>
      %cst_126 = arith.constant 1.000000e+00 : f32
      %309 = vector.broadcast %cst_126 : f32 to vector<8x128xf32>
      %310 = arith.addf %309, %308 : vector<8x128xf32>
      %311 = arith.divf %309, %310 : vector<8x128xf32>
      %312 = vector.extract_strided_slice %300 {offsets = [0, 128], sizes = [8, 128], strides = [1, 1]} : vector<8x384xf32> to vector<8x128xf32>
      %313 = vector.extract_strided_slice %303 {offsets = [0, 128], sizes = [8, 128], strides = [1, 1]} : vector<8x384xf32> to vector<8x128xf32>
      %314 = arith.addf %312, %313 : vector<8x128xf32>
      %315 = arith.negf %314 : vector<8x128xf32>
      %316 = math.exp %315 : vector<8x128xf32>
      %cst_127 = arith.constant 1.000000e+00 : f32
      %317 = vector.broadcast %cst_127 : f32 to vector<8x128xf32>
      %318 = arith.addf %317, %316 : vector<8x128xf32>
      %319 = arith.divf %317, %318 : vector<8x128xf32>
      %320 = vector.extract_strided_slice %300 {offsets = [0, 256], sizes = [8, 128], strides = [1, 1]} : vector<8x384xf32> to vector<8x128xf32>
      %321 = vector.extract_strided_slice %303 {offsets = [0, 256], sizes = [8, 128], strides = [1, 1]} : vector<8x384xf32> to vector<8x128xf32>
      %322 = vector.broadcast %23 : vector<1x128xf32> to vector<8x128xf32>
      %323 = arith.addf %321, %322 : vector<8x128xf32>
      %324 = arith.mulf %311, %323 : vector<8x128xf32>
      %325 = arith.addf %320, %324 : vector<8x128xf32>
      %326 = math.tanh %325 : vector<8x128xf32>
      %cst_128 = arith.constant 1.000000e+00 : f32
      %327 = vector.broadcast %cst_128 : f32 to vector<8x128xf32>
      %328 = arith.subf %327, %319 : vector<8x128xf32>
      %329 = arith.mulf %328, %326 : vector<8x128xf32>
      %330 = arith.mulf %319, %301 : vector<8x128xf32>
      %331 = arith.addf %329, %330 : vector<8x128xf32>
      %332 = arith.index_cast %298 : i32 to index
      %c0_129 = arith.constant 0 : index
      %333 = vector.load %arg14[%332, %c0_129] : memref<128x384xf32, #tpu.memory_space<vmem>>, vector<8x384xf32>
      %c0_130 = arith.constant 0 : index
      %c0_131 = arith.constant 0 : index
      %334 = vector.load %arg16[%c0_130, %c0_131] : memref<8x128xf32, #tpu.memory_space<vmem>>, vector<8x128xf32>
      %335 = arith.truncf %334 : vector<8x128xf32> to vector<8x128xbf16>
      %cst_132 = arith.constant dense<0.000000e+00> : vector<8x384xf32>
      %336 = tpu.matmul %335, %22, %cst_132 {dimension_numbers = #tpu.dot_dimension_numbers<[1], [0], [0], [1], [0, 0, 1, 1], [], []>} : vector<8x128xbf16>, vector<128x384xbf16>, vector<8x384xf32> -> vector<8x384xf32>
      %337 = vector.extract_strided_slice %333 {offsets = [0, 0], sizes = [8, 128], strides = [1, 1]} : vector<8x384xf32> to vector<8x128xf32>
      %338 = vector.extract_strided_slice %336 {offsets = [0, 0], sizes = [8, 128], strides = [1, 1]} : vector<8x384xf32> to vector<8x128xf32>
      %339 = arith.addf %337, %338 : vector<8x128xf32>
      %340 = arith.negf %339 : vector<8x128xf32>
      %341 = math.exp %340 : vector<8x128xf32>
      %cst_133 = arith.constant 1.000000e+00 : f32
      %342 = vector.broadcast %cst_133 : f32 to vector<8x128xf32>
      %343 = arith.addf %342, %341 : vector<8x128xf32>
      %344 = arith.divf %342, %343 : vector<8x128xf32>
      %345 = vector.extract_strided_slice %333 {offsets = [0, 128], sizes = [8, 128], strides = [1, 1]} : vector<8x384xf32> to vector<8x128xf32>
      %346 = vector.extract_strided_slice %336 {offsets = [0, 128], sizes = [8, 128], strides = [1, 1]} : vector<8x384xf32> to vector<8x128xf32>
      %347 = arith.addf %345, %346 : vector<8x128xf32>
      %348 = arith.negf %347 : vector<8x128xf32>
      %349 = math.exp %348 : vector<8x128xf32>
      %cst_134 = arith.constant 1.000000e+00 : f32
      %350 = vector.broadcast %cst_134 : f32 to vector<8x128xf32>
      %351 = arith.addf %350, %349 : vector<8x128xf32>
      %352 = arith.divf %350, %351 : vector<8x128xf32>
      %353 = vector.extract_strided_slice %333 {offsets = [0, 256], sizes = [8, 128], strides = [1, 1]} : vector<8x384xf32> to vector<8x128xf32>
      %354 = vector.extract_strided_slice %336 {offsets = [0, 256], sizes = [8, 128], strides = [1, 1]} : vector<8x384xf32> to vector<8x128xf32>
      %355 = vector.broadcast %24 : vector<1x128xf32> to vector<8x128xf32>
      %356 = arith.addf %354, %355 : vector<8x128xf32>
      %357 = arith.mulf %344, %356 : vector<8x128xf32>
      %358 = arith.addf %353, %357 : vector<8x128xf32>
      %359 = math.tanh %358 : vector<8x128xf32>
      %cst_135 = arith.constant 1.000000e+00 : f32
      %360 = vector.broadcast %cst_135 : f32 to vector<8x128xf32>
      %361 = arith.subf %360, %352 : vector<8x128xf32>
      %362 = arith.mulf %361, %359 : vector<8x128xf32>
      %363 = arith.mulf %352, %334 : vector<8x128xf32>
      %364 = arith.addf %362, %363 : vector<8x128xf32>
      %c0_136 = arith.constant 0 : index
      %c0_137 = arith.constant 0 : index
      %365 = vector.load %arg15[%c0_136, %c0_137] : memref<8x128xf32, #tpu.memory_space<vmem>>, vector<8x128xf32>
      tpu.vector_store %arg15[%c0_136, %c0_137], %331 {strides = array<i32>} : memref<8x128xf32, #tpu.memory_space<vmem>>, vector<8x128xf32>,
      %c0_138 = arith.constant 0 : index
      %c0_139 = arith.constant 0 : index
      %366 = vector.load %arg16[%c0_138, %c0_139] : memref<8x128xf32, #tpu.memory_space<vmem>>, vector<8x128xf32>
      tpu.vector_store %arg16[%c0_138, %c0_139], %364 {strides = array<i32>} : memref<8x128xf32, #tpu.memory_space<vmem>>, vector<8x128xf32>,
      %367 = arith.index_cast %295 : i32 to index
      %c0_140 = arith.constant 0 : index
      %368 = vector.load %arg12[%367, %c0_140] : memref<128x128xf32, #tpu.memory_space<vmem>>, vector<8x128xf32>
      %369 = arith.truncf %331 : vector<8x128xf32> to vector<8x128xbf16>
      %cst_141 = arith.constant dense<0.000000e+00> : vector<8x128xf32>
      %370 = tpu.matmul %369, %25, %cst_141 {dimension_numbers = #tpu.dot_dimension_numbers<[1], [0], [0], [1], [0, 0, 1, 1], [], []>} : vector<8x128xbf16>, vector<128x128xbf16>, vector<8x128xf32> -> vector<8x128xf32>
      %371 = arith.addf %368, %370 : vector<8x128xf32>
      %372 = arith.index_cast %295 : i32 to index
      %c0_142 = arith.constant 0 : index
      %373 = vector.load %arg12[%372, %c0_142] : memref<128x128xf32, #tpu.memory_space<vmem>>, vector<8x128xf32>
      tpu.vector_store %arg12[%372, %c0_142], %371 {strides = array<i32>} : memref<128x128xf32, #tpu.memory_space<vmem>>, vector<8x128xf32>,
      %374 = arith.index_cast %298 : i32 to index
      %c0_143 = arith.constant 0 : index
      %375 = vector.load %arg12[%374, %c0_143] : memref<128x128xf32, #tpu.memory_space<vmem>>, vector<8x128xf32>
      %376 = arith.truncf %364 : vector<8x128xf32> to vector<8x128xbf16>
      %cst_144 = arith.constant dense<0.000000e+00> : vector<8x128xf32>
      %377 = tpu.matmul %376, %26, %cst_144 {dimension_numbers = #tpu.dot_dimension_numbers<[1], [0], [0], [1], [0, 0, 1, 1], [], []>} : vector<8x128xbf16>, vector<128x128xbf16>, vector<8x128xf32> -> vector<8x128xf32>
      %378 = arith.addf %375, %377 : vector<8x128xf32>
      %379 = arith.index_cast %298 : i32 to index
      %c0_145 = arith.constant 0 : index
      %380 = vector.load %arg12[%379, %c0_145] : memref<128x128xf32, #tpu.memory_space<vmem>>, vector<8x128xf32>
      tpu.vector_store %arg12[%379, %c0_145], %378 {strides = array<i32>} : memref<128x128xf32, #tpu.memory_space<vmem>>, vector<8x128xf32>,
    }
    %c4_i32_36 = arith.constant 4 : i32
    return
  }
}

</mosaic_0001>

<bundles_post_ra>
// kernel: bidirectional_gru_forward.1
= control target key start
LH: loop header
LB: loop body
LE: loop exit
PB: predicated region body
PF: predicated region fallthrough
CT: control target
= control target key end

     0   :  { %17 = vsyncpa [#allocation7], 0  ;;  %v3765_v1 = vmov 0   ;;  %v3766_v58 = vmov 0.0   ;;  %s5535_s0 = inlined_call_operand.vmem [shape: bf16[128,128], index: 0, kind: input, shape index: {}]   ;;  %s5536_s1 = inlined_call_operand.vmem [shape: bf16[128,384], index: 1, kind: input, shape index: {}]   ;;  %s5537_s2 = inlined_call_operand.vmem [shape: f32[1,384], index: 2, kind: input, shape index: {}]   ;;  %s5538_s3 = inlined_call_operand.vmem [shape: bf16[128,384], index: 3, kind: input, shape index: {}]   ;;  %s5539_s4 = inlined_call_operand.vmem [shape: f32[1,128], index: 4, kind: input, shape index: {}]   ;;  %s5540_s5 = inlined_call_operand.vmem [shape: bf16[128,384], index: 5, kind: input, shape index: {}]   ;;  %s5541_s6 = inlined_call_operand.vmem [shape: f32[1,384], index: 6, kind: input, shape index: {}]   ;;  %s5542_s7 = inlined_call_operand.vmem [shape: bf16[128,384], index: 7, kind: input, shape index: {}]   ;;  %s5543_s8 = inlined_call_operand.vmem [shape: f32[1,128], index: 8, kind: input, shape index: {}]   ;;  %s5544_s9 = inlined_call_operand.vmem [shape: bf16[128,128], index: 9, kind: input, shape index: {}]   ;;  %s5545_s10 = inlined_call_operand.vmem [shape: bf16[128,128], index: 10, kind: input, shape index: {}]   ;;  %s5546_s11 = inlined_call_operand.vmem [shape: f32[1,128], index: 11, kind: input, shape index: {}]   ;;  %s5547_s12 = inlined_call_operand.hbm [shape: f32[128,128], index: 12, kind: output, shape index: {}]  }
   0x1   :  { %v3581_v0 = vld [vmem:[%s5536_s1 + $0x4] ss:$12 sps:$4 sm:$0xff]   ;;  %316 = vmatprep.mubr.bf16.mxu0 %v3765_v1  ;;  %v3583_v2 = vld [vmem:[%s5536_s1 + $0x8] ss:$12 sps:$4 sm:$0xff]   ;;  %v3584_v3 = vld [vmem:[%s5536_s1] ss:$12 sps:$4 sm:$0xff]  }
   0x2   :  { %284 = vmatprep.subr.bf16.mxu0 %v3581_v0  ;;  %v3585_v4 = vld [vmem:[%s5536_s1 + $0x1c] ss:$12 sps:$4 sm:$0xff]   ;;  %3181 = vmatprep.subr.bf16.mxu1 %v3583_v2  ;;  %v3587_v5 = vld [vmem:[%s5536_s1 + $0x20] ss:$12 sps:$4 sm:$0xff]   ;;  %v3588_v6 = vld [vmem:[%s5536_s1 + $0x18] ss:$12 sps:$4 sm:$0xff]  }
   0x3   :  { %285 = vmatpush1.bf16.msra.mxu0 %v3584_v3  ;;  %3182 = vmatpush3.bf16.msra.mxu1 %v3583_v2  ;;  %v3589_v7 = vld [vmem:[%s5536_s1 + $0x34] ss:$12 sps:$4 sm:$0xff]   ;;  %v3591_v8 = vld [vmem:[%s5536_s1 + $0x38] ss:$12 sps:$4 sm:$0xff]   ;;  %v3592_v9 = vld [vmem:[%s5536_s1 + $0x30] ss:$12 sps:$4 sm:$0xff]  }
   0x4   :  { %286 = vmatprep.subr.bf16.mxu0 %v3585_v4  ;;  %3183 = vmatprep.subr.bf16.mxu1 %v3587_v5  ;;  %v3593_v10 = vld [vmem:[%s5536_s1 + $0x4c] ss:$12 sps:$4 sm:$0xff]   ;;  %v3595_v11 = vld [vmem:[%s5536_s1 + $0x50] ss:$12 sps:$4 sm:$0xff]   ;;  %v3596_v12 = vld [vmem:[%s5536_s1 + $0x48] ss:$12 sps:$4 sm:$0xff]  }
   0x5   :  { %v3597_v13 = vld [vmem:[%s5536_s1 + $0x64] ss:$12 sps:$4 sm:$0xff]   ;;  %v3599_v14 = vld [vmem:[%s5536_s1 + $0x68] ss:$12 sps:$4 sm:$0xff]   ;;  %v3600_v15 = vld [vmem:[%s5536_s1 + $0x60] ss:$12 sps:$4 sm:$0xff]  }
   0x6   :  { %v3601_v16 = vld [vmem:[%s5536_s1 + $0x7c] ss:$12 sps:$4 sm:$0xff]   ;;  %v3603_v17 = vld [vmem:[%s5536_s1 + $0x80] ss:$12 sps:$4 sm:$0xff]   ;;  %v3604_v19 = vld [vmem:[%s5536_s1 + $0x78] ss:$12 sps:$4 sm:$0xff]  }
   0x7   :  { %287 = vmatpush1.bf16.msra.mxu0 %v3588_v6  ;;  %3184 = vmatpush3.bf16.msra.mxu1 %v3587_v5  ;;  %v3893_v18 = vld [vmem:[%s5535_s0] sm:$0xff]   ;;  %v3608_v22 = vld [vmem:[%s5536_s1 + $0x90] ss:$12 sps:$4 sm:$0xff]   ;;  %v3609_v23 = vld [vmem:[%s5536_s1 + $0xac] ss:$12 sps:$4 sm:$0xff]   ;;  %1000 = vst [vmem:[#allocation4] sm:$0xff] %v3766_v58 }
   0x8   :  { %288 = vmatprep.subr.bf16.mxu0 %v3589_v7  ;;  %3185 = vmatprep.subr.bf16.mxu1 %v3591_v8  ;;  %v3605_v20 = vld [vmem:[%s5536_s1 + $0x94] ss:$12 sps:$4 sm:$0xff]   ;;  %v3607_v21 = vld [vmem:[%s5536_s1 + $0x98] ss:$12 sps:$4 sm:$0xff]   ;;  %v3611_v24 = vld [vmem:[%s5536_s1 + $0xb0] ss:$12 sps:$4 sm:$0xff]  }
   0x9   :  { %3197 = vmatprep.mubr.bf16.mxu1 %v3893_v18  ;;  %v3612_v25 = vld [vmem:[%s5536_s1 + $0xa8] ss:$12 sps:$4 sm:$0xff]   ;;  %v3617_v27 = vld [vmem:[%s5540_s5 + $0x4] ss:$12 sps:$4 sm:$0xff]   ;;  %v3615_v29 = vld [vmem:[%s5540_s5] ss:$12 sps:$4 sm:$0xff]  }
   0xa   :  { %v3618_v26 = vld [vmem:[%s5540_s5 + $0x8] ss:$12 sps:$4 sm:$0xff]   ;;  %v3627_v32 = vld [vmem:[%s5540_s5 + $0x20] ss:$12 sps:$4 sm:$0xff]   ;;  %v3619_v33 = vld [vmem:[%s5540_s5 + $0x18] ss:$12 sps:$4 sm:$0xff]  }
   0xb   :  { %289 = vmatpush1.bf16.msra.mxu0 %v3592_v9  ;;  %3186 = vmatpush3.bf16.msra.mxu1 %v3591_v8  ;;  %v3926_v28 = vld [vmem:[%s5535_s0 + $0x8] sm:$0xff]   ;;  %v3937_v31 = vld [vmem:[%s5535_s0 + $0x10] sm:$0xff]   ;;  %v3636_v34 = vld [vmem:[%s5540_s5 + $0x38] ss:$12 sps:$4 sm:$0xff]   ;;  %1001 = vst [vmem:[#allocation5] sm:$0xff] %v3766_v58 }
   0xc   :  { %290 = vmatprep.subr.bf16.mxu0 %v3593_v10  ;;  %3187 = vmatprep.subr.bf16.mxu1 %v3595_v11  ;;  %v3621_v30 = vld [vmem:[%s5540_s5 + $0x1c] ss:$12 sps:$4 sm:$0xff]   ;;  %v3626_v35 = vld [vmem:[%s5540_s5 + $0x34] ss:$12 sps:$4 sm:$0xff]   ;;  %v3630_v39 = vld [vmem:[%s5540_s5 + $0x4c] ss:$12 sps:$4 sm:$0xff]  }
   0xd   :  { %v3958_v36 = vld [vmem:[%s5535_s0 + $0x18] sm:$0xff]   ;;  %v3966_v38 = vld [vmem:[%s5535_s0 + $0x20] sm:$0xff]   ;;  %v3628_v41 = vld [vmem:[%s5540_s5 + $0x48] ss:$12 sps:$4 sm:$0xff]  }
   0xe   :  { %v3624_v37 = vld [vmem:[%s5540_s5 + $0x30] ss:$12 sps:$4 sm:$0xff]   ;;  %v3649_v43 = vld [vmem:[%s5540_s5 + $0x68] ss:$12 sps:$4 sm:$0xff]   ;;  %v3633_v45 = vld [vmem:[%s5540_s5 + $0x60] ss:$12 sps:$4 sm:$0xff]  }
   0xf   :  { %291 = vmatpush1.bf16.msra.mxu0 %v3596_v12  ;;  %3188 = vmatpush3.bf16.msra.mxu1 %v3595_v11  ;;  %v3645_v40 = vld [vmem:[%s5540_s5 + $0x50] ss:$12 sps:$4 sm:$0xff]   ;;  %v3632_v44 = vld [vmem:[%s5535_s0 + $0x28] sm:$0xff]   ;;  %v3637_v49 = vld [vmem:[%s5540_s5 + $0x78] ss:$12 sps:$4 sm:$0xff]  }
  0x10   :  { %292 = vmatprep.subr.bf16.mxu0 %v3597_v13  ;;  %3189 = vmatprep.subr.bf16.mxu1 %v3599_v14  ;;  %v3635_v42 = vld [vmem:[%s5540_s5 + $0x64] ss:$12 sps:$4 sm:$0xff]   ;;  %v3639_v47 = vld [vmem:[%s5540_s5 + $0x7c] ss:$12 sps:$4 sm:$0xff]   ;;  %v3650_v48 = vld [vmem:[%s5540_s5 + $0x80] ss:$12 sps:$4 sm:$0xff]  }
  0x11   :  { %v3640_v46 = vld [vmem:[%s5535_s0 + $0x30] sm:$0xff]   ;;  %v3651_v51 = vld [vmem:[%s5540_s5 + $0x98] ss:$12 sps:$4 sm:$0xff]   ;;  %v2873_v57 = vld [vmem:[%s5546_s11] ss:$0 sm:$0xff] }
  0x12   :  { %v3644_v50 = vld [vmem:[%s5540_s5 + $0x94] ss:$12 sps:$4 sm:$0xff]   ;;  %v3641_v52 = vld [vmem:[%s5535_s0 + $0x38] sm:$0xff]   ;;  %984 = vst [vmem:[#allocation6] sm:$0xff] %v2873_v57  ;;  %985 = vst [vmem:[#allocation6 + $0x8] sm:$0xff] %v2873_v57 }
  0x13   :  { %293 = vmatpush1.bf16.msra.mxu0 %v3600_v15  ;;  %3190 = vmatpush3.bf16.msra.mxu1 %v3599_v14  ;;  %v3642_v53 = vld [vmem:[%s5540_s5 + $0x90] ss:$12 sps:$4 sm:$0xff]   ;;  %v3648_v54 = vld [vmem:[%s5540_s5 + $0xac] ss:$12 sps:$4 sm:$0xff]   ;;  %v3646_v56 = vld [vmem:[%s5540_s5 + $0xa8] ss:$12 sps:$4 sm:$0xff]  }
  0x14   :  { %294 = vmatprep.subr.bf16.mxu0 %v3601_v16  ;;  %3191 = vmatprep.subr.bf16.mxu1 %v3603_v17  ;;  %v3652_v55 = vld [vmem:[%s5540_s5 + $0xb0] ss:$12 sps:$4 sm:$0xff]   ;;  %986 = vst [vmem:[#allocation6 + $0x10] sm:$0xff] %v2873_v57  ;;  %987 = vst [vmem:[#allocation6 + $0x18] sm:$0xff] %v2873_v57  ;;  %v4058_v59 = vld [vmem:[%s5538_s3] sm:$0xff] }
  0x15   :  { %988 = vst [vmem:[#allocation6 + $0x20] sm:$0xff] %v2873_v57  ;;  %989 = vst [vmem:[#allocation6 + $0x28] sm:$0xff] %v2873_v57  ;;  %v4063_v60 = vld [vmem:[%s5538_s3 + $0x8] sm:$0xf]  ;;  %v4068_v61 = vld [vmem:[%s5538_s3 + $0xc] sm:$0xff] }
  0x16   :  { %990 = vst [vmem:[#allocation6 + $0x30] sm:$0xff] %v2873_v57  ;;  %991 = vst [vmem:[#allocation6 + $0x38] sm:$0xff] %v2873_v57  ;;  %v4073_v62 = vld [vmem:[%s5538_s3 + $0x14] sm:$0xf]  ;;  %v4078_v63 = vld [vmem:[%s5538_s3 + $0x18] sm:$0xff] }
  0x17   :  { %295 = vmatpush1.bf16.msra.mxu0 %v3604_v19  ;;  %3192 = vmatpush3.bf16.msra.mxu1 %v3603_v17  ;;  %992 = vst [vmem:[#allocation6 + $0x40] sm:$0xff] %v2873_v57  ;;  %993 = vst [vmem:[#allocation6 + $0x48] sm:$0xff] %v2873_v57  ;;  %v4083_v0 = vld [vmem:[%s5538_s3 + $0x20] sm:$0xf]  ;;  %v4093_v2 = vld [vmem:[%s5538_s3 + $0x2c] sm:$0xf] }
  0x18   :  { %296 = vmatprep.subr.bf16.mxu0 %v3605_v20  ;;  %3193 = vmatprep.subr.bf16.mxu1 %v3607_v21  ;;  %994 = vst [vmem:[#allocation6 + $0x50] sm:$0xff] %v2873_v57  ;;  %995 = vst [vmem:[#allocation6 + $0x58] sm:$0xff] %v2873_v57  ;;  %v4098_v3 = vld [vmem:[%s5538_s3 + $0x30] sm:$0xff]  ;;  %v4103_v4 = vld [vmem:[%s5538_s3 + $0x38] sm:$0xf] }
  0x19   :  { %996 = vst [vmem:[#allocation6 + $0x60] sm:$0xff] %v2873_v57  ;;  %997 = vst [vmem:[#allocation6 + $0x68] sm:$0xff] %v2873_v57  ;;  %v4108_v5 = vld [vmem:[%s5538_s3 + $0x3c] sm:$0xff]  ;;  %v4113_v6 = vld [vmem:[%s5538_s3 + $0x44] sm:$0xf] }
  0x1a   :  { %998 = vst [vmem:[#allocation6 + $0x70] sm:$0xff] %v2873_v57  ;;  %999 = vst [vmem:[#allocation6 + $0x78] sm:$0xff] %v2873_v57  ;;  %v4118_v7 = vld [vmem:[%s5538_s3 + $0x48] sm:$0xff]  ;;  %v4123_v8 = vld [vmem:[%s5538_s3 + $0x50] sm:$0xf] }
  0x1b   :  { %297 = vmatpush1.bf16.msra.mxu0 %v3608_v22  ;;  %3194 = vmatpush3.bf16.msra.mxu1 %v3607_v21  ;;  %5647 = vst [vmem:[#allocation9_spill] sm:$0xff] %v4058_v59  ;;  %5648 = vst [vmem:[#allocation10_spill] sm:$0xff] %v4063_v60  ;;  %v4128_v9 = vld [vmem:[%s5538_s3 + $0x54] sm:$0xff]  ;;  %v4133_v10 = vld [vmem:[%s5538_s3 + $0x5c] sm:$0xf] }
  0x1c   :  { %298 = vmatprep.subr.bf16.mxu0 %v3609_v23  ;;  %3195 = vmatprep.subr.bf16.mxu1 %v3611_v24  ;;  %5649 = vst [vmem:[#allocation11_spill] sm:$0xff] %v4068_v61  ;;  %5650 = vst [vmem:[#allocation12_spill] sm:$0xff] %v4073_v62  ;;  %v4138_v11 = vld [vmem:[%s5538_s3 + $0x60] sm:$0xff]  ;;  %v4143_v12 = vld [vmem:[%s5538_s3 + $0x68] sm:$0xf] }
  0x1d   :  { %5651 = vst [vmem:[#allocation13_spill] sm:$0xff] %v4078_v63  ;;  %5652 = vst [vmem:[#allocation14_spill] sm:$0xff] %v4083_v0  ;;  %v4148_v13 = vld [vmem:[%s5538_s3 + $0x6c] sm:$0xff]  ;;  %v4153_v14 = vld [vmem:[%s5538_s3 + $0x74] sm:$0xf] }
  0x1e   :  { %5654 = vst [vmem:[#allocation16_spill] sm:$0xff] %v4093_v2  ;;  %5655 = vst [vmem:[#allocation17_spill] sm:$0xff] %v4098_v3  ;;  %v4158_v15 = vld [vmem:[%s5538_s3 + $0x78] sm:$0xff]  ;;  %v4163_v16 = vld [vmem:[%s5538_s3 + $0x80] sm:$0xf] }
  0x1f   :  { %299 = vmatpush1.bf16.msra.mxu0 %v3612_v25  ;;  %3196 = vmatpush3.bf16.msra.mxu1 %v3611_v24  ;;  %5656 = vst [vmem:[#allocation18_spill] sm:$0xff] %v4103_v4  ;;  %5657 = vst [vmem:[#allocation19_spill] sm:$0xff] %v4108_v5  ;;  %v4168_v17 = vld [vmem:[%s5538_s3 + $0x84] sm:$0xff]  ;;  %v4178_v19 = vld [vmem:[%s5538_s3 + $0x90] sm:$0xff] }
  0x20   :  { %3213 = vmatprep.subr.bf16.mxu0 %v3618_v26  ;;  %719 = vmatprep.subr.bf16.mxu1 %v3617_v27  ;;  %5658 = vst [vmem:[#allocation20_spill] sm:$0xff] %v4113_v6  ;;  %5659 = vst [vmem:[#allocation21_spill] sm:$0xff] %v4118_v7  ;;  %v4183_v20 = vld [vmem:[%s5538_s3 + $0x98] sm:$0xf]  ;;  %v4188_v21 = vld [vmem:[%s5538_s3 + $0x9c] sm:$0xff] }
  0x21   :  { %5660 = vst [vmem:[#allocation22_spill] sm:$0xff] %v4123_v8  ;;  %5661 = vst [vmem:[#allocation23_spill] sm:$0xff] %v4128_v9  ;;  %v4193_v22 = vld [vmem:[%s5538_s3 + $0xa4] sm:$0xf]  ;;  %v4198_v23 = vld [vmem:[%s5538_s3 + $0xa8] sm:$0xff] }
  0x22   :  { %317 = vmatmul.mubr.bf16.vlgmr.msra.gmra.mrb[0].mxu0 %v3893_v18  ;;  %3198 = vmatmul.mubr.bf16.vlgmr.msra.gmra.mrb[0].mxu1 %v3926_v28  ;;  %5662 = vst [vmem:[#allocation24_spill] sm:$0xff] %v4133_v10  ;;  %5663 = vst [vmem:[#allocation25_spill] sm:$0xff] %v4138_v11  ;;  %v4203_v24 = vld [vmem:[%s5538_s3 + $0xb0] sm:$0xf]  ;;  %v4208_v25 = vld [vmem:[%s5538_s3 + $0xb4] sm:$0xff] }
  0x23   :  { %3214 = vmatpush3.bf16.msra.mxu0 %v3618_v26  ;;  %720 = vmatpush1.bf16.msra.mxu1 %v3615_v29  ;;  %5664 = vst [vmem:[#allocation26_spill] sm:$0xff] %v4143_v12  ;;  %5665 = vst [vmem:[#allocation27_spill] sm:$0xff] %v4148_v13  ;;  %v4213_v26 = vld [vmem:[%s5538_s3 + $0xbc] sm:$0xf]  ;;  %v4218_v27 = vld [vmem:[%s5542_s7] sm:$0xff] }
  0x24   :  { %326 = vmatprep.mubr.bf16.mxu0 %v3765_v1  ;;  %721 = vmatprep.subr.bf16.mxu1 %v3621_v30  ;;  %5666 = vst [vmem:[#allocation28_spill] sm:$0xff] %v4153_v14  ;;  %5667 = vst [vmem:[#allocation29_spill] sm:$0xff] %v4158_v15  ;;  %v4223_v29 = vld [vmem:[%s5542_s7 + $0x8] sm:$0xf]  ;;  %v4228_v30 = vld [vmem:[%s5542_s7 + $0xc] sm:$0xff] }
  0x25   :  { %3201 = vmatprep.mubr.bf16.mxu1 %v3937_v31  ;;  %3215 = vmatprep.subr.bf16.mxu0 %v3627_v32  ;;  %5668 = vst [vmem:[#allocation30_spill] sm:$0xff] %v4163_v16  ;;  %5669 = vst [vmem:[#allocation31_spill] sm:$0xff] %v4168_v17  ;;  %v4356_v57 = vld [vmem:[%s5542_s7 + $0xa4] sm:$0xf]  ;;  %v4378_v58 = vld [vmem:[%s5542_s7 + $0xbc] sm:$0xf] }
  0x26   :  { %5671 = vst [vmem:[#allocation33_spill] sm:$0xff] %v4178_v19  ;;  %5672 = vst [vmem:[#allocation34_spill] sm:$0xff] %v4183_v20 }
  0x27   :  { %3216 = vmatpush3.bf16.msra.mxu0 %v3627_v32  ;;  %722 = vmatpush1.bf16.msra.mxu1 %v3619_v33  ;;  %5673 = vst [vmem:[#allocation35_spill] sm:$0xff] %v4188_v21  ;;  %5674 = vst [vmem:[#allocation36_spill] sm:$0xff] %v4193_v22  ;;  %v4238_v32 = vld [vmem:[%s5542_s7 + $0x18] sm:$0xff]  ;;  %v4243_v33 = vld [vmem:[%s5542_s7 + $0x20] sm:$0xf] }
  0x28   :  { %3217 = vmatprep.subr.bf16.mxu0 %v3636_v34  ;;  %723 = vmatprep.subr.bf16.mxu1 %v3626_v35  ;;  %5675 = vst [vmem:[#allocation37_spill] sm:$0xff] %v4198_v23  ;;  %5676 = vst [vmem:[#allocation38_spill] sm:$0xff] %v4203_v24  ;;  %v4253_v35 = vld [vmem:[%s5542_s7 + $0x2c] sm:$0xf] }
  0x29   :  { %5677 = vst [vmem:[#allocation39_spill] sm:$0xff] %v4208_v25  ;;  %5678 = vst [vmem:[#allocation40_spill] sm:$0xff] %v4213_v26 }
  0x2a   :  { %327 = vmatmul.mubr.bf16.gmra.mrb[4].mxu0 %v3926_v28  ;;  %3202 = vmatmul.mubr.bf16.gmra.mrb[4].mxu1 %v3958_v36  ;;  %5679 = vst [vmem:[#allocation41_spill] sm:$0xff] %v4218_v27  ;;  %5680 = vst [vmem:[#allocation42_spill] sm:$0xff] %v4223_v29 }
  0x2b   :  { %336 = vmatprep.mubr.bf16.mxu0 %v3765_v1  ;;  %724 = vmatpush1.bf16.msra.mxu1 %v3624_v37  ;;  %5681 = vst [vmem:[#allocation43_spill] sm:$0xff] %v4228_v30  ;;  %5683 = vst [vmem:[#allocation45_spill] sm:$0xff] %v4238_v32  ;;  %v4263_v37 = vld [vmem:[%s5542_s7 + $0x38] sm:$0xf] }
  0x2c   :  { %3205 = vmatprep.mubr.bf16.mxu1 %v3966_v38  ;;  %725 = vmatprep.subr.bf16.mxu1 %v3630_v39  ;;  %5684 = vst [vmem:[#allocation46_spill] sm:$0xff] %v4243_v33  ;;  %5686 = vst [vmem:[#allocation48_spill] sm:$0xff] %v4253_v35  ;;  %v4273_v39 = vld [vmem:[%s5542_s7 + $0x44] sm:$0xf] }
  0x2d   :  { %3218 = vmatpush3.bf16.msra.mxu0 %v3636_v34  ;;  %v4248_v34 = vld [vmem:[%s5542_s7 + $0x24] sm:$0xff]  ;;  %5688 = vst [vmem:[#allocation50_spill] sm:$0xff] %v4263_v37  ;;  %5690 = vst [vmem:[#allocation52_spill] sm:$0xff] %v4273_v39 }
  0x2e   :  { %3219 = vmatprep.subr.bf16.mxu0 %v3645_v40  ;;  %5685 = vst [vmem:[#allocation47_spill] sm:$0xff] %v4248_v34  ;;  %5706 = vst [vmem:[#allocation68_spill] sm:$0xff] %v4356_v57  ;;  %v4388_v57 = vld [vmem:[%s5543_s8] ss:$0 sm:$0xff] }
  0x2f   :  { %726 = vmatpush1.bf16.msra.mxu1 %v3628_v41  ;;  %5710 = vst [vmem:[#allocation72_spill] sm:$0xff] %v4378_v58  ;;  %5712 = vst [vmem:[#allocation74_spill] sm:$0xff] %v4388_v57  ;;  %v4403_v58 = vld [vmem:[%s5544_s9 + $0x8] sm:$0xf]  ;;  %v4413_v57 = vld [vmem:[%s5544_s9 + $0x10] sm:$0xf] }
  0x30   :  { %727 = vmatprep.subr.bf16.mxu1 %v3635_v42  ;;  %v4285_v42 = vld [vmem:[%s5542_s7 + $0x50] sm:$0xf]  ;;  %5715 = vst [vmem:[#allocation77_spill] sm:$0xff] %v4403_v58  ;;  %5717 = vst [vmem:[#allocation79_spill] sm:$0xff] %v4413_v57  ;;  %v4428_v58 = vld [vmem:[%s5544_s9 + $0x1c] sm:$0xf] }
  0x31   :  { %3220 = vmatpush3.bf16.msra.mxu0 %v3645_v40  ;;  %v4278_v40 = vld [vmem:[%s5542_s7 + $0x48] sm:$0xff]  ;;  %5692 = vst [vmem:[#allocation54_spill] sm:$0xff] %v4285_v42  ;;  %5720 = vst [vmem:[#allocation82_spill] sm:$0xff] %v4428_v58  ;;  %v91_v57 = vld [vmem:[%s5537_s2] sm:$0x7] }
  0x32   :  { %337 = vmatmul.mubr.bf16.gmra.mrb[8].mxu0 %v3937_v31  ;;  %3221 = vmatprep.subr.bf16.mxu0 %v3649_v43  ;;  %5691 = vst [vmem:[#allocation53_spill] sm:$0xff] %v4278_v40  ;;  %v4451_v58 = vld [vmem:[%s5544_s9 + $0x2c] sm:$0xf] }
  0x33   :  { %3206 = vmatmul.mubr.bf16.gmra.mrb[8].mxu1 %v3632_v44  ;;  %346 = vmatprep.mubr.bf16.mxu0 %v3765_v1  ;;  %5724 = vst [vmem:[#allocation86_spill] sm:$0xff] %v4451_v58  ;;  %v4476_v58 = vld [vmem:[%s5545_s10] sm:$0xf] }
  0x34   :  { %728 = vmatpush1.bf16.msra.mxu1 %v3633_v45  ;;  %3209 = vmatprep.mubr.bf16.mxu1 %v3640_v46  ;;  %v4300_v45 = vld [vmem:[%s5542_s7 + $0x60] sm:$0xff]  ;;  %5729 = vst [vmem:[#allocation91_spill] sm:$0xff] %v4476_v58  ;;  %v4501_v58 = vld [vmem:[%s5545_s10 + $0x14] sm:$0xf] }
  0x35   :  { %729 = vmatprep.subr.bf16.mxu1 %v3639_v47  ;;  %3222 = vmatpush3.bf16.msra.mxu0 %v3649_v43  ;;  %v4290_v43 = vld [vmem:[%s5542_s7 + $0x54] sm:$0xff]  ;;  %5695 = vst [vmem:[#allocation57_spill] sm:$0xff] %v4300_v45  ;;  %v4310_v47 = vld [vmem:[%s5542_s7 + $0x6c] sm:$0xff]  ;;  %5734 = vst [vmem:[#allocation96_spill] sm:$0xff] %v4501_v58 }
  0x36   :  { %3223 = vmatprep.subr.bf16.mxu0 %v3650_v48  ;;  %5693 = vst [vmem:[#allocation55_spill] sm:$0xff] %v4290_v43  ;;  %5697 = vst [vmem:[#allocation59_spill] sm:$0xff] %v4310_v47  ;;  %v4525_v58 = vld [vmem:[%s5545_s10 + $0x24] sm:$0xf] }
  0x37   :  { %5739 = vst [vmem:[#allocation100_spill] sm:$0xff] %v4525_v58  ;;  %v4548_v58 = vld [vmem:[%s5545_s10 + $0x30] sm:$0xf] }
  0x38   :  { %730 = vmatpush1.bf16.msra.mxu1 %v3637_v49  ;;  %v4320_v49 = vld [vmem:[%s5542_s7 + $0x78] sm:$0xff]  ;;  %5744 = vst [vmem:[#allocation103_spill] sm:$0xff] %v4548_v58 }
  0x39   :  { %731 = vmatprep.subr.bf16.mxu1 %v3644_v50  ;;  %3224 = vmatpush3.bf16.msra.mxu0 %v3650_v48  ;;  %v4315_v48 = vld [vmem:[%s5542_s7 + $0x74] sm:$0xf]  ;;  %5699 = vst [vmem:[#allocation61_spill] sm:$0xff] %v4320_v49  ;;  %v4325_v50 = vld [vmem:[%s5542_s7 + $0x80] sm:$0xf] }
  0x3a   :  { %347 = vmatmul.mubr.bf16.gmra.mrb[12].mxu0 %v3958_v36  ;;  %3225 = vmatprep.subr.bf16.mxu0 %v3651_v51  ;;  %5698 = vst [vmem:[#allocation60_spill] sm:$0xff] %v4315_v48  ;;  %5700 = vst [vmem:[#allocation62_spill] sm:$0xff] %v4325_v50  ;;  %v4373_v50 = vld [vmem:[%s5542_s7 + $0xb4] sm:$0xff] }
  0x3b   :  { %3210 = vmatmul.mubr.bf16.gmra.mrb[12].mxu1 %v3641_v52  ;;  %356 = vmatprep.mubr.bf16.mxu0 %v3765_v1  ;;  %5709 = vst [vmem:[#allocation71_spill] sm:$0xff] %v4373_v50  ;;  %v4461_v50 = vld [vmem:[%s5544_s9 + $0x34] sm:$0xf] }
  0x3c   :  { %732 = vmatpush1.bf16.msra.mxu1 %v3642_v53  ;;  %751 = vmatprep.mubr.bf16.mxu1 %v3765_v1  ;;  %v4340_v53 = vld [vmem:[%s5542_s7 + $0x90] sm:$0xff]  ;;  %5726 = vst [vmem:[#allocation88_spill] sm:$0xff] %v4461_v50  ;;  %v4486_v50 = vld [vmem:[%s5545_s10 + $0x8] sm:$0xf] }
  0x3d   :  { %733 = vmatprep.subr.bf16.mxu1 %v3648_v54  ;;  %3226 = vmatpush3.bf16.msra.mxu0 %v3651_v51  ;;  %v4330_v51 = vld [vmem:[%s5542_s7 + $0x84] sm:$0xff]  ;;  %5703 = vst [vmem:[#allocation65_spill] sm:$0xff] %v4340_v53  ;;  %5731 = vst [vmem:[#allocation93_spill] sm:$0xff] %v4486_v50  ;;  %v4511_v50 = vld [vmem:[%s5545_s10 + $0x1c] sm:$0xf] }
  0x3e   :  { %3227 = vmatprep.subr.bf16.mxu0 %v3652_v55  ;;  %5701 = vst [vmem:[#allocation63_spill] sm:$0xff] %v4330_v51  ;;  %v4363_v54 = vld [vmem:[%s5542_s7 + $0xa8] sm:$0xff]  ;;  %5736 = vst [vmem:[#allocation98_spill] sm:$0xff] %v4511_v50 }
  0x3f   :  { %5707 = vst [vmem:[#allocation69_spill] sm:$0xff] %v4363_v54  ;;  %v4398_v54 = vld [vmem:[%s5544_s9 + $0x4] sm:$0xf] }
  0x40   :  { %734 = vmatpush1.bf16.msra.mxu1 %v3646_v56  ;;  %v4351_v56 = vld [vmem:[%s5542_s7 + $0x9c] sm:$0xff]  ;;  %5714 = vst [vmem:[#allocation76_spill] sm:$0xff] %v4398_v54  ;;  %v4423_v54 = vld [vmem:[%s5544_s9 + $0x18] sm:$0xf] }
  0x41   :  { %3228 = vmatpush3.bf16.msra.mxu0 %v3652_v55  ;;  %v4346_v55 = vld [vmem:[%s5542_s7 + $0x98] sm:$0xf]  ;;  %5705 = vst [vmem:[#allocation67_spill] sm:$0xff] %v4351_v56  ;;  %5719 = vst [vmem:[#allocation81_spill] sm:$0xff] %v4423_v54  ;;  %v4446_v54 = vld [vmem:[%s5544_s9 + $0x28] sm:$0xf] }
  0x42   :  { %357 = vmatmul.mubr.bf16.gmra.mrb[16].mxu0 %v3966_v38  ;;  %5704 = vst [vmem:[#allocation66_spill] sm:$0xff] %v4346_v55  ;;  %v4368_v55 = vld [vmem:[%s5542_s7 + $0xb0] sm:$0xf]  ;;  %5723 = vst [vmem:[#allocation85_spill] sm:$0xff] %v4446_v54  ;;  %v4471_v54 = vld [vmem:[%s5544_s9 + $0x3c] sm:$0xf] }
  0x43   :  { %752 = vmatmul.mubr.bf16.vlgmr.msra.gmra.mrb[16].mxu1 %v3893_v18  ;;  %366 = vmatprep.mubr.bf16.mxu0 %v3765_v1  ;;  %5708 = vst [vmem:[#allocation70_spill] sm:$0xff] %v4368_v55  ;;  %v4393_v55 = vld [vmem:[%s5544_s9] sm:$0xf]  ;;  %5728 = vst [vmem:[#allocation90_spill] sm:$0xff] %v4471_v54  ;;  %v4496_v54 = vld [vmem:[%s5545_s10 + $0x10] sm:$0xf] }
  0x44   :  { %761 = vmatprep.mubr.bf16.mxu1 %v3765_v1  ;;  %5713 = vst [vmem:[#allocation75_spill] sm:$0xff] %v4393_v55  ;;  %v4418_v55 = vld [vmem:[%s5544_s9 + $0x14] sm:$0xf]  ;;  %5733 = vst [vmem:[#allocation95_spill] sm:$0xff] %v4496_v54  ;;  %v4520_v54 = vld [vmem:[%s5545_s10 + $0x20] sm:$0xf] }
  0x45   :  { %5718 = vst [vmem:[#allocation80_spill] sm:$0xff] %v4418_v55  ;;  %v4441_v55 = vld [vmem:[%s5544_s9 + $0x24] sm:$0xf]  ;;  %5738 = vst [vmem:[#allocation99_spill] sm:$0xff] %v4520_v54  ;;  %v4543_v54 = vld [vmem:[%s5545_s10 + $0x2c] sm:$0xf] }
  0x46   :  { %5722 = vst [vmem:[#allocation84_spill] sm:$0xff] %v4441_v55  ;;  %v4466_v55 = vld [vmem:[%s5544_s9 + $0x38] sm:$0xf]  ;;  %5743 = vst [vmem:[#allocation102_spill] sm:$0xff] %v4543_v54 }
  0x47   :  { %5727 = vst [vmem:[#allocation89_spill] sm:$0xff] %v4466_v55  ;;  %v4491_v55 = vld [vmem:[%s5545_s10 + $0xc] sm:$0xf] }
  0x48   :  { %5732 = vst [vmem:[#allocation94_spill] sm:$0xff] %v4491_v55 }
  0x4a   :  { %367 = vmatmul.mubr.bf16.gmra.mrb[20].mxu0 %v3632_v44 }
  0x4b   :  { %762 = vmatmul.mubr.bf16.gmra.mrb[20].mxu1 %v3926_v28  ;;  %376 = vmatprep.mubr.bf16.mxu0 %v3765_v1 }
  0x4c   :  { %771 = vmatprep.mubr.bf16.mxu1 %v3765_v1 }
  0x52   :  { %377 = vmatmul.mubr.bf16.gmra.mrb[24].mxu0 %v3640_v46 }
  0x53   :  { %772 = vmatmul.mubr.bf16.gmra.mrb[24].mxu1 %v3937_v31  ;;  %386 = vmatprep.mubr.bf16.mxu0 %v3765_v1 }
  0x54   :  { %781 = vmatprep.mubr.bf16.mxu1 %v3765_v1 }
  0x5a   :  { %387 = vmatmul.mubr.bf16.gmra.mrb[28].mxu0 %v3641_v52 }
  0x5b   :  { %782 = vmatmul.mubr.bf16.gmra.mrb[28].mxu1 %v3958_v36  ;;  %3229 = vmatprep.mubr.bf16.mxu0 %v3893_v18  ;;  %v4173_v18 = vld [vmem:[%s5538_s3 + $0x8c] sm:$0xf] }
  0x5c   :  { %791 = vmatprep.mubr.bf16.mxu1 %v3765_v1  ;;  %5670 = vst [vmem:[#allocation32_spill] sm:$0xff] %v4173_v18 }
  0x62   :  { %3230 = vmatmul.mubr.bf16.vlgmr.msra.gmra.mrb[32].mxu0 %v3926_v28  ;;  %v93_v28 = vlaneseq }
  0x63   :  { %792 = vmatmul.mubr.bf16.gmra.mrb[32].mxu1 %v3966_v38  ;;  %3233 = vmatprep.mubr.bf16.mxu0 %v3937_v31  ;;  %v4233_v31 = vld [vmem:[%s5542_s7 + $0x14] sm:$0xf] }
  0x64   :  { %801 = vmatprep.mubr.bf16.mxu1 %v3765_v1  ;;  %5682 = vst [vmem:[#allocation44_spill] sm:$0xff] %v4233_v31  ;;  %v4280_v41 = vshrl.u32 %v93_v28, 7  ;;  %v4383_v28 = vld [vmem:[%s5539_s4] ss:$0 sm:$0xff] }
  0x65   :  { %5711 = vst [vmem:[#allocation73_spill] sm:$0xff] %v4383_v28  ;;  %v4408_v28 = vld [vmem:[%s5544_s9 + $0xc] sm:$0xf] }
  0x66   :  { %5716 = vst [vmem:[#allocation78_spill] sm:$0xff] %v4408_v28  ;;  %v4433_v28 = vld [vmem:[%s5544_s9 + $0x20] sm:$0xf]  ;;  %v5737_v55 = vsub.s32 0, %v4280_v41  ;;  %v5741_v50 = vsub.s32 2, %v4280_v41 }
  0x67   :  { %5721 = vst [vmem:[#allocation83_spill] sm:$0xff] %v4433_v28  ;;  %v4456_v28 = vld [vmem:[%s5544_s9 + $0x30] sm:$0xf] }
  0x68   :  { %5725 = vst [vmem:[#allocation87_spill] sm:$0xff] %v4456_v28  ;;  %v4481_v28 = vld [vmem:[%s5545_s10 + $0x4] sm:$0xf]  ;;  %v4534_v53 = vrot.slane %v91_v57, %v5741_v50  ;;  %v4558_v50 = vld [vmem:[%s5545_s10 + $0x38] sm:$0xf] }
  0x69   :  { %5730 = vst [vmem:[#allocation92_spill] sm:$0xff] %v4481_v28  ;;  %v4506_v28 = vld [vmem:[%s5545_s10 + $0x18] sm:$0xf]  ;;  %5746 = vst [vmem:[#allocation105_spill] sm:$0xff] %v4558_v50 }
  0x6a   :  { %3234 = vmatmul.mubr.bf16.gmra.mrb[36].mxu0 %v3958_v36  ;;  %v4258_v36 = vld [vmem:[%s5542_s7 + $0x30] sm:$0xff]  ;;  %5735 = vst [vmem:[#allocation97_spill] sm:$0xff] %v4506_v28  ;;  %v4530_v28 = vld [vmem:[%s5545_s10 + $0x28] sm:$0xf] }
  0x6b   :  { %802 = vmatmul.mubr.bf16.gmra.mrb[36].mxu1 %v3632_v44  ;;  %3237 = vmatprep.mubr.bf16.mxu0 %v3966_v38  ;;  %5687 = vst [vmem:[#allocation49_spill] sm:$0xff] %v4258_v36  ;;  %v4268_v38 = vld [vmem:[%s5542_s7 + $0x3c] sm:$0xff]  ;;  %5740 = vst [vmem:[#allocation101_spill] sm:$0xff] %v4530_v28  ;;  %v4553_v28 = vld [vmem:[%s5545_s10 + $0x34] sm:$0xf] }
  0x6c   :  { %811 = vmatprep.mubr.bf16.mxu1 %v3765_v1  ;;  %5689 = vst [vmem:[#allocation51_spill] sm:$0xff] %v4268_v38  ;;  %5745 = vst [vmem:[#allocation104_spill] sm:$0xff] %v4553_v28 }
  0x72   :  { %3238 = vmatmul.mubr.bf16.gmra.mrb[40].mxu0 %v3632_v44  ;;  %v4295_v44 = vld [vmem:[%s5542_s7 + $0x5c] sm:$0xf] }
  0x73   :  { %812 = vmatmul.mubr.bf16.gmra.mrb[40].mxu1 %v3640_v46  ;;  %3241 = vmatprep.mubr.bf16.mxu0 %v3640_v46  ;;  %5694 = vst [vmem:[#allocation56_spill] sm:$0xff] %v4295_v44  ;;  %v4305_v46 = vld [vmem:[%s5542_s7 + $0x68] sm:$0xf] }
  0x74   :  { %821 = vmatprep.mubr.bf16.mxu1 %v3765_v1  ;;  %v4088_v1 = vld [vmem:[%s5538_s3 + $0x24] sm:$0xff]  ;;  %5696 = vst [vmem:[#allocation58_spill] sm:$0xff] %v4305_v46 }
  0x75   :  { %5653 = vst [vmem:[#allocation15_spill] sm:$0xff] %v4088_v1 }
  0x7a   :  { %3242 = vmatmul.mubr.bf16.gmra.mrb[44].mxu0 %v3641_v52 }
  0x7b   :  { %822 = vmatmul.mubr.bf16.gmra.mrb[44].mxu1 %v3641_v52  ;;  %v4335_v52 = vld [vmem:[%s5542_s7 + $0x8c] sm:$0xf] }
  0x7c   :  { %5702 = vst [vmem:[#allocation64_spill] sm:$0xff] %v4335_v52  ;;  %v4515_v52 = vrot.slane %v91_v57, %v5737_v55  ;;  %v5742_v55 = vsub.s32 1, %v4280_v41 }
  0x7e   :  { %v4538_v56 = vrot.slane %v91_v57, %v5742_v55  ;;  %v4563_v57 = vld [vmem:[%s5545_s10 + $0x3c] sm:$0xf] }
  0x7f   :  { %5747 = vst [vmem:[#allocation106_spill] sm:$0xff] %v4563_v57 }
  0xf5   :  { %v318_v55 = vpop.f32.mrb[0].mxu0  ;;  %v3199_v46 = vpop.f32.mrb[0].mxu1 }
  0xf6   :  { %v319_v54 = vadd.f32 %v318_v55, %v4515_v52  ;;  %v320_v58 = vpop.f32.mrb[1].mxu0  ;;  %v440_v48 = vadd.f32 %v3199_v46, %v4534_v53  ;;  %v431_v28 = vpop.f32.mrb[1].mxu1 }
  0xf7   :  { %v321_v49 = vadd.f32 %v320_v58, %v4538_v56  ;;  %v322_v51 = vpop.f32.mrb[2].mxu0  ;;  %v432_v42 = vadd.f32 %v431_v28, %v4534_v53  ;;  %v3200_v44 = vpop.f32.mrb[2].mxu1 }
  0xf8   :  { %494 = vst [vmem:[#allocation2] sm:$0xff] %v319_v54  ;;  %v323_v50 = vadd.f32 %v322_v51, %v4515_v52  ;;  %v324_v45 = vpop.f32.mrb[3].mxu0  ;;  %502 = vst [vmem:[#allocation2 + $0x40] sm:$0xff] %v440_v48  ;;  %v443_v57 = vadd.f32 %v3200_v44, %v4534_v53  ;;  %v434_v47 = vpop.f32.mrb[3].mxu1 }
  0xf9   :  { %495 = vst [vmem:[#allocation2 + $0x8] sm:$0xff] %v321_v49  ;;  %v325_v55 = vadd.f32 %v324_v45, %v4538_v56  ;;  %496 = vst [vmem:[#allocation2 + $0x10] sm:$0xff] %v432_v42  ;;  %v435_v46 = vadd.f32 %v434_v47, %v4534_v53 }
  0xfa   :  { %497 = vst [vmem:[#allocation2 + $0x18] sm:$0xff] %v323_v50  ;;  %505 = vst [vmem:[#allocation2 + $0x58] sm:$0xff] %v443_v57 }
  0xfb   :  { %498 = vst [vmem:[#allocation2 + $0x20] sm:$0xff] %v325_v55  ;;  %499 = vst [vmem:[#allocation2 + $0x28] sm:$0xff] %v435_v46 }
  0xfd   :  { %v328_v54 = vpop.f32.mrb[4].mxu0  ;;  %v3203_v51 = vpop.f32.mrb[4].mxu1 }
  0xfe   :  { %v329_v58 = vadd.f32 %v328_v54, %v4515_v52  ;;  %v330_v28 = vpop.f32.mrb[5].mxu0  ;;  %v456_v48 = vadd.f32 %v3203_v51, %v4534_v53  ;;  %v447_v44 = vpop.f32.mrb[5].mxu1 }
  0xff   :  { %v331_v49 = vadd.f32 %v330_v28, %v4538_v56  ;;  %v332_v37 = vpop.f32.mrb[6].mxu0  ;;  %v448_v42 = vadd.f32 %v447_v44, %v4534_v53  ;;  %v3204_v47 = vpop.f32.mrb[6].mxu1 }
 0x100   :  { %500 = vst [vmem:[#allocation2 + $0x30] sm:$0xff] %v329_v58  ;;  %v333_v45 = vadd.f32 %v332_v37, %v4515_v52  ;;  %v334_v50 = vpop.f32.mrb[7].mxu0  ;;  %514 = vst [vmem:[#allocation2 + $0xa0] sm:$0xff] %v456_v48  ;;  %v459_v57 = vadd.f32 %v3204_v47, %v4534_v53  ;;  %v450_v46 = vpop.f32.mrb[7].mxu1 }
 0x101   :  { %501 = vst [vmem:[#allocation2 + $0x38] sm:$0xff] %v331_v49  ;;  %v335_v55 = vadd.f32 %v334_v50, %v4538_v56  ;;  %508 = vst [vmem:[#allocation2 + $0x70] sm:$0xff] %v448_v42  ;;  %v451_v54 = vadd.f32 %v450_v46, %v4534_v53 }
 0x102   :  { %503 = vst [vmem:[#allocation2 + $0x48] sm:$0xff] %v333_v45  ;;  %517 = vst [vmem:[#allocation2 + $0xb8] sm:$0xff] %v459_v57 }
 0x103   :  { %504 = vst [vmem:[#allocation2 + $0x50] sm:$0xff] %v335_v55  ;;  %511 = vst [vmem:[#allocation2 + $0x88] sm:$0xff] %v451_v54 }
 0x105   :  { %v338_v58 = vpop.f32.mrb[8].mxu0 }
 0x106   :  { %v339_v51 = vadd.f32 %v338_v58, %v4515_v52  ;;  %v3207_v37 = vpop.f32.mrb[8].mxu1  ;;  %v340_v28 = vpop.f32.mrb[9].mxu0 }
 0x107   :  { %v472_v48 = vadd.f32 %v3207_v37, %v4534_v53  ;;  %v341_v49 = vadd.f32 %v340_v28, %v4538_v56  ;;  %v463_v44 = vpop.f32.mrb[9].mxu1  ;;  %v342_v47 = vpop.f32.mrb[10].mxu0 }
 0x108   :  { %506 = vst [vmem:[#allocation2 + $0x60] sm:$0xff] %v339_v51  ;;  %v464_v42 = vadd.f32 %v463_v44, %v4534_v53  ;;  %v343_v45 = vadd.f32 %v342_v47, %v4515_v52  ;;  %v3208_v50 = vpop.f32.mrb[10].mxu1  ;;  %v344_v57 = vpop.f32.mrb[11].mxu0 }
 0x109   :  { %526 = vst [vmem:[#allocation2 + $0x100] sm:$0xff] %v472_v48  ;;  %507 = vst [vmem:[#allocation2 + $0x68] sm:$0xff] %v341_v49  ;;  %v475_v55 = vadd.f32 %v3208_v50, %v4534_v53  ;;  %v345_v46 = vadd.f32 %v344_v57, %v4538_v56  ;;  %v466_v54 = vpop.f32.mrb[11].mxu1 }
 0x10a   :  { %520 = vst [vmem:[#allocation2 + $0xd0] sm:$0xff] %v464_v42  ;;  %509 = vst [vmem:[#allocation2 + $0x78] sm:$0xff] %v343_v45  ;;  %v467_v58 = vadd.f32 %v466_v54, %v4534_v53 }
 0x10b   :  { %529 = vst [vmem:[#allocation2 + $0x118] sm:$0xff] %v475_v55  ;;  %510 = vst [vmem:[#allocation2 + $0x80] sm:$0xff] %v345_v46  ;;  %v4597_v46 = vld [vmem:[%s5541_s6] sm:$0x7]  ;;  %s4681_s6 = smov 0  }
 0x10c   :  { %523 = vst [vmem:[#allocation2 + $0xe8] sm:$0xff] %v467_v58 }
 0x10d   :  { %v348_v51 = vpop.f32.mrb[12].mxu0 }
 0x10e   :  { %v349_v37 = vadd.f32 %v348_v51, %v4515_v52  ;;  %v3211_v28 = vpop.f32.mrb[12].mxu1  ;;  %v350_v44 = vpop.f32.mrb[13].mxu0 }
 0x10f   :  { %v488_v48 = vadd.f32 %v3211_v28, %v4534_v53  ;;  %v351_v49 = vadd.f32 %v350_v44, %v4538_v56  ;;  %v479_v47 = vpop.f32.mrb[13].mxu1  ;;  %v352_v50 = vpop.f32.mrb[14].mxu0  ;;  %v5748_v28 = vsub.s32 0, %v4280_v41 }
 0x110   :  { %512 = vst [vmem:[#allocation2 + $0x90] sm:$0xff] %v349_v37  ;;  %v480_v42 = vadd.f32 %v479_v47, %v4534_v53  ;;  %v353_v45 = vadd.f32 %v352_v50, %v4515_v52  ;;  %v3212_v57 = vpop.f32.mrb[14].mxu1  ;;  %v354_v55 = vpop.f32.mrb[15].mxu0 }
 0x111   :  { %538 = vst [vmem:[#allocation2 + $0x160] sm:$0xff] %v488_v48  ;;  %513 = vst [vmem:[#allocation2 + $0x98] sm:$0xff] %v351_v49  ;;  %v491_v54 = vadd.f32 %v3212_v57, %v4534_v53  ;;  %v355_v58 = vadd.f32 %v354_v55, %v4538_v56  ;;  %v482_v51 = vpop.f32.mrb[15].mxu1  ;;  %v4605_v44 = vrot.slane %v4597_v46, %v5748_v28  ;;  %v5749_v48 = vsub.s32 1, %v4280_v41 }
 0x112   :  { %532 = vst [vmem:[#allocation2 + $0x130] sm:$0xff] %v480_v42  ;;  %515 = vst [vmem:[#allocation2 + $0xa8] sm:$0xff] %v353_v45  ;;  %v483_v37 = vadd.f32 %v482_v51, %v4534_v53 }
 0x113   :  { %541 = vst [vmem:[#allocation2 + $0x178] sm:$0xff] %v491_v54  ;;  %516 = vst [vmem:[#allocation2 + $0xb0] sm:$0xff] %v355_v58  ;;  %v4610_v49 = vrot.slane %v4597_v46, %v5749_v48 }
 0x114   :  { %535 = vst [vmem:[#allocation2 + $0x148] sm:$0xff] %v483_v37 }
 0x115   :  { %v358_v47 = vpop.f32.mrb[16].mxu0 }
 0x116   :  { %v359_v50 = vadd.f32 %v358_v47, %v4515_v52  ;;  %v753_v42 = vpop.f32.mrb[16].mxu1  ;;  %v360_v45 = vpop.f32.mrb[17].mxu0 }
 0x117   :  { %v754_v53 = vadd.f32 %v753_v42, %v4605_v44  ;;  %v361_v57 = vadd.f32 %v360_v45, %v4538_v56  ;;  %v755_v55 = vpop.f32.mrb[17].mxu1  ;;  %v362_v54 = vpop.f32.mrb[18].mxu0 }
 0x118   :  { %518 = vst [vmem:[#allocation2 + $0xc0] sm:$0xff] %v359_v50  ;;  %v756_v58 = vadd.f32 %v755_v55, %v4610_v49  ;;  %v363_v51 = vadd.f32 %v362_v54, %v4515_v52  ;;  %v757_v37 = vpop.f32.mrb[18].mxu1  ;;  %v364_v28 = vpop.f32.mrb[19].mxu0 }
 0x119   :  { %929 = vst [vmem:[#allocation3] sm:$0xff] %v754_v53  ;;  %519 = vst [vmem:[#allocation2 + $0xc8] sm:$0xff] %v361_v57  ;;  %v758_v48 = vadd.f32 %v757_v37, %v4605_v44  ;;  %v365_v47 = vadd.f32 %v364_v28, %v4538_v56  ;;  %v759_v39 = vpop.f32.mrb[19].mxu1 }
 0x11a   :  { %930 = vst [vmem:[#allocation3 + $0x8] sm:$0xff] %v756_v58  ;;  %521 = vst [vmem:[#allocation2 + $0xd8] sm:$0xff] %v363_v51  ;;  %v760_v42 = vadd.f32 %v759_v39, %v4610_v49 }
 0x11b   :  { %932 = vst [vmem:[#allocation3 + $0x18] sm:$0xff] %v758_v48  ;;  %522 = vst [vmem:[#allocation2 + $0xe0] sm:$0xff] %v365_v47 }
 0x11c   :  { %933 = vst [vmem:[#allocation3 + $0x20] sm:$0xff] %v760_v42 }
 0x11d   :  { %v368_v50 = vpop.f32.mrb[20].mxu0 }
 0x11e   :  { %v369_v45 = vadd.f32 %v368_v50, %v4515_v52  ;;  %v763_v55 = vpop.f32.mrb[20].mxu1  ;;  %v370_v54 = vpop.f32.mrb[21].mxu0 }
 0x11f   :  { %v764_v53 = vadd.f32 %v763_v55, %v4605_v44  ;;  %v371_v57 = vadd.f32 %v370_v54, %v4538_v56  ;;  %v765_v37 = vpop.f32.mrb[21].mxu1  ;;  %v372_v40 = vpop.f32.mrb[22].mxu0 }
 0x120   :  { %524 = vst [vmem:[#allocation2 + $0xf0] sm:$0xff] %v369_v45  ;;  %v766_v58 = vadd.f32 %v765_v37, %v4610_v49  ;;  %v373_v51 = vadd.f32 %v372_v40, %v4515_v52  ;;  %v767_v39 = vpop.f32.mrb[22].mxu1  ;;  %v374_v28 = vpop.f32.mrb[23].mxu0 }
 0x121   :  { %935 = vst [vmem:[#allocation3 + $0x30] sm:$0xff] %v764_v53  ;;  %525 = vst [vmem:[#allocation2 + $0xf8] sm:$0xff] %v371_v57  ;;  %v768_v48 = vadd.f32 %v767_v39, %v4605_v44  ;;  %v375_v47 = vadd.f32 %v374_v28, %v4538_v56  ;;  %v769_v42 = vpop.f32.mrb[23].mxu1 }
 0x122   :  { %936 = vst [vmem:[#allocation3 + $0x38] sm:$0xff] %v766_v58  ;;  %527 = vst [vmem:[#allocation2 + $0x108] sm:$0xff] %v373_v51  ;;  %v770_v50 = vadd.f32 %v769_v42, %v4610_v49 }
 0x123   :  { %938 = vst [vmem:[#allocation3 + $0x48] sm:$0xff] %v768_v48  ;;  %528 = vst [vmem:[#allocation2 + $0x110] sm:$0xff] %v375_v47 }
 0x124   :  { %939 = vst [vmem:[#allocation3 + $0x50] sm:$0xff] %v770_v50 }
 0x125   :  { %v378_v45 = vpop.f32.mrb[24].mxu0 }
 0x126   :  { %v379_v55 = vadd.f32 %v378_v45, %v4515_v52  ;;  %v773_v40 = vpop.f32.mrb[24].mxu1  ;;  %v380_v54 = vpop.f32.mrb[25].mxu0 }
 0x127   :  { %v774_v53 = vadd.f32 %v773_v40, %v4605_v44  ;;  %v381_v57 = vadd.f32 %v380_v54, %v4538_v56  ;;  %v775_v37 = vpop.f32.mrb[25].mxu1  ;;  %v382_v39 = vpop.f32.mrb[26].mxu0 }
 0x128   :  { %530 = vst [vmem:[#allocation2 + $0x120] sm:$0xff] %v379_v55  ;;  %v776_v58 = vadd.f32 %v775_v37, %v4610_v49  ;;  %v383_v51 = vadd.f32 %v382_v39, %v4515_v52  ;;  %v777_v28 = vpop.f32.mrb[26].mxu1  ;;  %v384_v48 = vpop.f32.mrb[27].mxu0 }
 0x129   :  { %941 = vst [vmem:[#allocation3 + $0x60] sm:$0xff] %v774_v53  ;;  %531 = vst [vmem:[#allocation2 + $0x128] sm:$0xff] %v381_v57  ;;  %v778_v47 = vadd.f32 %v777_v28, %v4605_v44  ;;  %v385_v42 = vadd.f32 %v384_v48, %v4538_v56  ;;  %v779_v50 = vpop.f32.mrb[27].mxu1 }
 0x12a   :  { %942 = vst [vmem:[#allocation3 + $0x68] sm:$0xff] %v776_v58  ;;  %533 = vst [vmem:[#allocation2 + $0x138] sm:$0xff] %v383_v51  ;;  %v780_v45 = vadd.f32 %v779_v50, %v4610_v49 }
 0x12b   :  { %944 = vst [vmem:[#allocation3 + $0x78] sm:$0xff] %v778_v47  ;;  %534 = vst [vmem:[#allocation2 + $0x140] sm:$0xff] %v385_v42 }
 0x12c   :  { %945 = vst [vmem:[#allocation3 + $0x80] sm:$0xff] %v780_v45 }
 0x12d   :  { %v388_v55 = vpop.f32.mrb[28].mxu0 }
 0x12e   :  { %v389_v40 = vadd.f32 %v388_v55, %v4515_v52  ;;  %v783_v54 = vpop.f32.mrb[28].mxu1  ;;  %v390_v37 = vpop.f32.mrb[29].mxu0 }
 0x12f   :  { %v784_v53 = vadd.f32 %v783_v54, %v4605_v44  ;;  %v391_v57 = vadd.f32 %v390_v37, %v4538_v56  ;;  %v785_v39 = vpop.f32.mrb[29].mxu1  ;;  %v392_v28 = vpop.f32.mrb[30].mxu0  ;;  %v5750_v54 = vsub.s32 2, %v4280_v41 }
 0x130   :  { %536 = vst [vmem:[#allocation2 + $0x150] sm:$0xff] %v389_v40  ;;  %v786_v58 = vadd.f32 %v785_v39, %v4610_v49  ;;  %v393_v51 = vadd.f32 %v392_v28, %v4515_v52  ;;  %v787_v48 = vpop.f32.mrb[30].mxu1  ;;  %v394_v47 = vpop.f32.mrb[31].mxu0 }
 0x131   :  { %947 = vst [vmem:[#allocation3 + $0x90] sm:$0xff] %v784_v53  ;;  %537 = vst [vmem:[#allocation2 + $0x158] sm:$0xff] %v391_v57  ;;  %v788_v42 = vadd.f32 %v787_v48, %v4605_v44  ;;  %v395_v50 = vadd.f32 %v394_v47, %v4538_v56  ;;  %v789_v45 = vpop.f32.mrb[31].mxu1  ;;  %v4647_v40 = vrot.slane %v4597_v46, %v5750_v54 }
 0x132   :  { %948 = vst [vmem:[#allocation3 + $0x98] sm:$0xff] %v786_v58  ;;  %539 = vst [vmem:[#allocation2 + $0x168] sm:$0xff] %v393_v51  ;;  %v790_v55 = vadd.f32 %v789_v45, %v4610_v49 }
 0x133   :  { %950 = vst [vmem:[#allocation3 + $0xa8] sm:$0xff] %v788_v42  ;;  %540 = vst [vmem:[#allocation2 + $0x170] sm:$0xff] %v395_v50 }
 0x134   :  { %951 = vst [vmem:[#allocation3 + $0xb0] sm:$0xff] %v790_v55 }
 0x135   :  { %v3231_v52 = vpop.f32.mrb[32].mxu0 }
 0x136   :  { %v793_v37 = vpop.f32.mrb[32].mxu1  ;;  %v875_v53 = vadd.f32 %v3231_v52, %v4647_v40  ;;  %v866_v57 = vpop.f32.mrb[33].mxu0 }
 0x137   :  { %v794_v56 = vadd.f32 %v793_v37, %v4605_v44  ;;  %v795_v39 = vpop.f32.mrb[33].mxu1  ;;  %v867_v28 = vadd.f32 %v866_v57, %v4647_v40  ;;  %v3232_v58 = vpop.f32.mrb[34].mxu0 }
 0x138   :  { %937 = vst [vmem:[#allocation3 + $0x40] sm:$0xff] %v875_v53  ;;  %v796_v41 = vadd.f32 %v795_v39, %v4610_v49  ;;  %v797_v51 = vpop.f32.mrb[34].mxu1  ;;  %v878_v46 = vadd.f32 %v3232_v58, %v4647_v40  ;;  %v869_v48 = vpop.f32.mrb[35].mxu0 }
 0x139   :  { %953 = vst [vmem:[#allocation3 + $0xc0] sm:$0xff] %v794_v56  ;;  %931 = vst [vmem:[#allocation3 + $0x10] sm:$0xff] %v867_v28  ;;  %v798_v47 = vadd.f32 %v797_v51, %v4605_v44  ;;  %v799_v42 = vpop.f32.mrb[35].mxu1  ;;  %v870_v50 = vadd.f32 %v869_v48, %v4647_v40 }
 0x13a   :  { %954 = vst [vmem:[#allocation3 + $0xc8] sm:$0xff] %v796_v41  ;;  %940 = vst [vmem:[#allocation3 + $0x58] sm:$0xff] %v878_v46  ;;  %v800_v45 = vadd.f32 %v799_v42, %v4610_v49 }
 0x13b   :  { %956 = vst [vmem:[#allocation3 + $0xd8] sm:$0xff] %v798_v47  ;;  %934 = vst [vmem:[#allocation3 + $0x28] sm:$0xff] %v870_v50 }
 0x13c   :  { %957 = vst [vmem:[#allocation3 + $0xe0] sm:$0xff] %v800_v45 }
 0x13d   :  { %v3235_v55 = vpop.f32.mrb[36].mxu0 }
 0x13e   :  { %v803_v54 = vpop.f32.mrb[36].mxu1  ;;  %v891_v52 = vadd.f32 %v3235_v55, %v4647_v40  ;;  %v882_v37 = vpop.f32.mrb[37].mxu0 }
 0x13f   :  { %v804_v53 = vadd.f32 %v803_v54, %v4605_v44  ;;  %v805_v57 = vpop.f32.mrb[37].mxu1  ;;  %v883_v56 = vadd.f32 %v882_v37, %v4647_v40  ;;  %v3236_v39 = vpop.f32.mrb[38].mxu0 }
 0x140   :  { %949 = vst [vmem:[#allocation3 + $0xa0] sm:$0xff] %v891_v52  ;;  %v806_v28 = vadd.f32 %v805_v57, %v4610_v49  ;;  %v807_v58 = vpop.f32.mrb[38].mxu1  ;;  %v894_v41 = vadd.f32 %v3236_v39, %v4647_v40  ;;  %v885_v51 = vpop.f32.mrb[39].mxu0 }
 0x141   :  { %959 = vst [vmem:[#allocation3 + $0xf0] sm:$0xff] %v804_v53  ;;  %943 = vst [vmem:[#allocation3 + $0x70] sm:$0xff] %v883_v56  ;;  %v808_v46 = vadd.f32 %v807_v58, %v4605_v44  ;;  %v809_v48 = vpop.f32.mrb[39].mxu1  ;;  %v886_v47 = vadd.f32 %v885_v51, %v4647_v40 }
 0x142   :  { %960 = vst [vmem:[#allocation3 + $0xf8] sm:$0xff] %v806_v28  ;;  %952 = vst [vmem:[#allocation3 + $0xb8] sm:$0xff] %v894_v41  ;;  %v810_v42 = vadd.f32 %v809_v48, %v4610_v49 }
 0x143   :  { %962 = vst [vmem:[#allocation3 + $0x108] sm:$0xff] %v808_v46  ;;  %946 = vst [vmem:[#allocation3 + $0x88] sm:$0xff] %v886_v47 }
 0x144   :  { %963 = vst [vmem:[#allocation3 + $0x110] sm:$0xff] %v810_v42 }
 0x145   :  { %v3239_v50 = vpop.f32.mrb[40].mxu0 }
 0x146   :  { %v813_v45 = vpop.f32.mrb[40].mxu1  ;;  %v907_v55 = vadd.f32 %v3239_v50, %v4647_v40  ;;  %v898_v54 = vpop.f32.mrb[41].mxu0 }
 0x147   :  { %v814_v52 = vadd.f32 %v813_v45, %v4605_v44  ;;  %v815_v37 = vpop.f32.mrb[41].mxu1  ;;  %v899_v53 = vadd.f32 %v898_v54, %v4647_v40  ;;  %v3240_v57 = vpop.f32.mrb[42].mxu0 }
 0x148   :  { %961 = vst [vmem:[#allocation3 + $0x100] sm:$0xff] %v907_v55  ;;  %v816_v56 = vadd.f32 %v815_v37, %v4610_v49  ;;  %v817_v39 = vpop.f32.mrb[42].mxu1  ;;  %v910_v28 = vadd.f32 %v3240_v57, %v4647_v40  ;;  %v901_v58 = vpop.f32.mrb[43].mxu0 }
 0x149   :  { %965 = vst [vmem:[#allocation3 + $0x120] sm:$0xff] %v814_v52  ;;  %955 = vst [vmem:[#allocation3 + $0xd0] sm:$0xff] %v899_v53  ;;  %v818_v41 = vadd.f32 %v817_v39, %v4605_v44  ;;  %v819_v51 = vpop.f32.mrb[43].mxu1  ;;  %v902_v46 = vadd.f32 %v901_v58, %v4647_v40 }
 0x14a   :  { %966 = vst [vmem:[#allocation3 + $0x128] sm:$0xff] %v816_v56  ;;  %964 = vst [vmem:[#allocation3 + $0x118] sm:$0xff] %v910_v28  ;;  %v820_v48 = vadd.f32 %v819_v51, %v4610_v49 }
 0x14b   :  { %968 = vst [vmem:[#allocation3 + $0x138] sm:$0xff] %v818_v41  ;;  %958 = vst [vmem:[#allocation3 + $0xe8] sm:$0xff] %v902_v46 }
 0x14c   :  { %969 = vst [vmem:[#allocation3 + $0x140] sm:$0xff] %v820_v48 }
 0x14d   :  { %v3243_v47 = vpop.f32.mrb[44].mxu0 }
 0x14e   :  { %v823_v42 = vpop.f32.mrb[44].mxu1  ;;  %v923_v50 = vadd.f32 %v3243_v47, %v4647_v40  ;;  %v914_v45 = vpop.f32.mrb[45].mxu0 }
 0x14f   :  { %v824_v55 = vadd.f32 %v823_v42, %v4605_v44  ;;  %v825_v54 = vpop.f32.mrb[45].mxu1  ;;  %v915_v52 = vadd.f32 %v914_v45, %v4647_v40  ;;  %v3244_v37 = vpop.f32.mrb[46].mxu0 }
 0x150   :  { %973 = vst [vmem:[#allocation3 + $0x160] sm:$0xff] %v923_v50  ;;  %v826_v53 = vadd.f32 %v825_v54, %v4610_v49  ;;  %v827_v57 = vpop.f32.mrb[46].mxu1  ;;  %v926_v56 = vadd.f32 %v3244_v37, %v4647_v40  ;;  %v917_v39 = vpop.f32.mrb[47].mxu0 }
 0x151   :  { %971 = vst [vmem:[#allocation3 + $0x150] sm:$0xff] %v824_v55  ;;  %967 = vst [vmem:[#allocation3 + $0x130] sm:$0xff] %v915_v52  ;;  %v828_v28 = vadd.f32 %v827_v57, %v4605_v44  ;;  %v829_v58 = vpop.f32.mrb[47].mxu1  ;;  %v918_v41 = vadd.f32 %v917_v39, %v4647_v40 }
 0x152   :  { %972 = vst [vmem:[#allocation3 + $0x158] sm:$0xff] %v826_v53  ;;  %976 = vst [vmem:[#allocation3 + $0x178] sm:$0xff] %v926_v56  ;;  %v830_v51 = vadd.f32 %v829_v58, %v4610_v49 }
 0x153   :  { %974 = vst [vmem:[#allocation3 + $0x168] sm:$0xff] %v828_v28  ;;  %970 = vst [vmem:[#allocation3 + $0x148] sm:$0xff] %v918_v41 }
 0x154   :  { %975 = vst [vmem:[#allocation3 + $0x170] sm:$0xff] %v830_v51 }
 0x155 LB: > { %v5751_v63 = vld [vmem:[#allocation13_spill] sm:$0xff]  ;;  %v5752_v61 = vld [vmem:[#allocation11_spill] sm:$0xff]  ;;  %v5775_v62 = vld [vmem:[#allocation12_spill] sm:$0xff]  ;;  %v5564_v42 = vmov 0.0   ;;  %v5559_v45 = vmov 0   ;;  %vm3769_vm0 = vmmov 0   ;;  %s3763_s6 = sphi %s4681_s6, %s1105_s6  }
 0x156   : > { %v5753_v59 = vld [vmem:[#allocation9_spill] sm:$0xff]  ;;  %v5754_v43 = vld [vmem:[#allocation55_spill] sm:$0xff]  ;;  %v5776_v60 = vld [vmem:[#allocation10_spill] sm:$0xff]  ;;  %3245 = vmatprep.subr.bf16.mxu1 %v5564_v42  ;;  %1280 = vmatprep.mubr.bf16.mxu0 %v5559_v45  ;;  %s5059_s3 = sshll.u32 %s3763_s6, 5  ;;  %s5063_s28 = sshll.u32 %s3763_s6, 2 }
 0x157   : > { %v5755_v38 = vld [vmem:[#allocation51_spill] sm:$0xff]  ;;  %v5756_v36 = vld [vmem:[#allocation49_spill] sm:$0xff]  ;;  %v4688_v44 = vcombine.high %v5753_v59, %v5752_v61  ;;  %v4692_v40 = vcombine.low %v5753_v59, %v5752_v61  ;;  %v4706_v48 = vcombine.low %v5776_v60, %v5775_v62  ;;  %v5777_v2 = vld [vmem:[#allocation16_spill] sm:$0xff]  ;;  %3261 = vmatprep.mubr.msk.bf16.mxu1 %vm3769_vm0, %v5564_v42  ;;  %s1110_s26 = sshra.s32 %s5059_s3, 3  ;;  %s1108_s29 = ssub.s32 15, %s5063_s28 }
 0x158   : > { %v5757_v34 = vld [vmem:[#allocation47_spill] sm:$0xff]  ;;  %v5758_v32 = vld [vmem:[#allocation45_spill] sm:$0xff]  ;;  %v5778_v0 = vld [vmem:[#allocation14_spill] sm:$0xff]  ;;  %s2985_s27 = smul.u32 24, %s1110_s26  ;;  %s5066_s30 = sshll.u32 %s1108_s29, 3 }
 0x159   : > { %v5759_v30 = vld [vmem:[#allocation43_spill] sm:$0xff]  ;;  %v5760_v27 = vld [vmem:[#allocation41_spill] sm:$0xff]  ;;  %5774 = vst [vmem:[#allocation107_spill] sm:$0xff] %v4688_v44  ;;  %1248 = vmatprep.subr.bf16.mxu0 %v4688_v44  ;;  %3246 = vmatpush3.bf16.msra.mxu1 %v4706_v48  ;;  %v4717_v50 = vcombine.low %v5778_v0, %v5777_v2  ;;  %v5779_v6 = vld [vmem:[#allocation20_spill] sm:$0xff]  ;;  %s1357_s13 = sshra.s32 %s5066_s30, 3  ;;  %s5203_s16 = scalar_lea.vmem [#allocation6], %s5059_s3 }
 0x15a   : > { %v5761_v25 = vld [vmem:[#allocation39_spill] sm:$0xff]  ;;  %v5762_v23 = vld [vmem:[#allocation37_spill] sm:$0xff]  ;;  %1249 = vmatpush1.bf16.msra.mxu0 %v4692_v40  ;;  %3247 = vmatprep.subr.bf16.mxu1 %v5564_v42  ;;  %v5780_v4 = vld [vmem:[#allocation18_spill] sm:$0xff]  ;;  %s1114_s9 = scalar_lea.vmem [#allocation2], %s2985_s27  ;;  %s2986_s14 = smul.u32 24, %s1357_s13 }
 0x15b   : > { %v5763_v21 = vld [vmem:[#allocation35_spill] sm:$0xff]  ;;  %v5764_v19 = vld [vmem:[#allocation33_spill] sm:$0xff]  ;;  %v4734_v52 = vcombine.low %v5780_v4, %v5779_v6  ;;  %v5781_v10 = vld [vmem:[#allocation24_spill] sm:$0xff]  ;;  %v4795_v0 = vcombine.high %v5762_v23, %v5761_v25  ;;  %v4806_v2 = vcombine.low %v5762_v23, %v5761_v25  ;;  %v4813_v4 = vcombine.high %v5760_v27, %v5759_v30  ;;  %s2988_s17 = sadd.s32 8, %s5059_s3  ;;  %s1699_s20 = scalar_lea.vmem [#allocation6], %s5066_s30 }
 0x15c   : > { %v5765_v17 = vld [vmem:[#allocation31_spill] sm:$0xff]  ;;  %v5766_v15 = vld [vmem:[#allocation29_spill] sm:$0xff]  ;;  %v5782_v8 = vld [vmem:[#allocation22_spill] sm:$0xff]  ;;  %v4779_v41 = vcombine.high %v5764_v19, %v5763_v21  ;;  %v4790_v45 = vcombine.low %v5764_v19, %v5763_v21  ;;  %v5791_v6 = vmov 0.0   ;;  %s5070_s15 = scalar_lea.vmem [#allocation3], %s2986_s14  ;;  %s1796_s18 = sshra.s32 %s2988_s17, 3 }
 0x15d   : > { %v5767_v13 = vld [vmem:[#allocation27_spill] sm:$0xff]  ;;  %v5768_v11 = vld [vmem:[#allocation25_spill] sm:$0xff]  ;;  %3248 = vmatpush3.bf16.msra.mxu1 %v4717_v50  ;;  %v4752_v57 = vcombine.low %v5782_v8, %v5781_v10  ;;  %v4763_v39 = vcombine.high %v5766_v15, %v5765_v17  ;;  %v5783_v14 = vld [vmem:[#allocation28_spill] sm:$0xff]  ;;  %v4774_v58 = vcombine.low %v5766_v15, %v5765_v17  ;;  %v4831_v8 = vcombine.high %v5758_v32, %v5757_v34  ;;  %s2989_s19 = smul.u32 24, %s1796_s18  ;;  %s1794_s5 = ssub.s32 14, %s5063_s28 }
 0x15e   : > { %v5769_v9 = vld [vmem:[#allocation23_spill] sm:$0xff]  ;;  %v5770_v7 = vld [vmem:[#allocation21_spill] sm:$0xff]  ;;  %3249 = vmatprep.subr.bf16.mxu1 %v5564_v42  ;;  %v4747_v53 = vcombine.high %v5768_v11, %v5767_v13  ;;  %v4758_v56 = vcombine.low %v5768_v11, %v5767_v13  ;;  %v5784_v12 = vld [vmem:[#allocation26_spill] sm:$0xff]  ;;  %v4842_v10 = vcombine.low %v5758_v32, %v5757_v34  ;;  %v5795_v11 = vmov 0   ;;  %s5214_s2 = sshll.u32 %s1794_s5, 3  ;;  %s2993_s22 = sadd.s32 16, %s5059_s3 }
 0x15f   : > { %v5771_v5 = vld [vmem:[#allocation19_spill] sm:$0xff]  ;;  %v5772_v3 = vld [vmem:[#allocation17_spill] sm:$0xff]  ;;  %v4729_v54 = vcombine.high %v5770_v7, %v5769_v9  ;;  %v4742_v37 = vcombine.low %v5770_v7, %v5769_v9  ;;  %v4768_v28 = vcombine.low %v5784_v12, %v5783_v14  ;;  %v5785_v18 = vld [vmem:[#allocation32_spill] sm:$0xff]  ;;  %v4826_v7 = vcombine.low %v5760_v27, %v5759_v30  ;;  %s5208_s0 = scalar_lea.vmem [#allocation2], %s2989_s19  ;;  %s1909_s21 = sshra.s32 %s5214_s2, 3 }
 0x160   : > { %v5773_v1 = vld [vmem:[#allocation15_spill] sm:$0xff]  ;;  %v4711_v47 = vcombine.high %v5772_v3, %v5771_v5  ;;  %v4724_v55 = vcombine.low %v5772_v3, %v5771_v5  ;;  %v5786_v16 = vld [vmem:[#allocation30_spill] sm:$0xff]  ;;  %v5787_v22 = vld [vmem:[#allocation36_spill] sm:$0xff]  ;;  %v4848_v12 = vcombine.high %v5756_v36, %v5755_v38  ;;  %v4861_v14 = vcombine.low %v5756_v36, %v5755_v38  ;;  %s2990_s11 = smul.u32 24, %s1909_s21  ;;  %s2118_s4 = sshra.s32 %s2993_s22, 3 }
 0x161   : > { %v4696_v49 = vcombine.high %v5751_v63, %v5773_v1  ;;  %v4702_v46 = vcombine.low %v5751_v63, %v5773_v1  ;;  %3250 = vmatpush3.bf16.msra.mxu1 %v4734_v52  ;;  %v4784_v51 = vcombine.low %v5786_v16, %v5785_v18  ;;  %v5788_v20 = vld [vmem:[#allocation34_spill] sm:$0xff]  ;;  %v4808_v3 = vld [vmem:[#allocation4] sm:$0xff]  ;;  %v5789_v26 = vld [vmem:[#allocation40_spill] sm:$0xff]  ;;  %s2994_s23 = smul.u32 24, %s2118_s4  ;;  %s2069_s1 = scalar_lea.vmem [#allocation6], %s5214_s2 }
 0x162   : > { %3251 = vmatprep.subr.bf16.mxu1 %v5564_v42  ;;  %v4800_v1 = vcombine.low %v5788_v20, %v5787_v22  ;;  %v5790_v24 = vld [vmem:[#allocation38_spill] sm:$0xff]  ;;  %v5792_v31 = vld [vmem:[#allocation44_spill] sm:$0xff]  ;;  %v5803_v20 = vld [vmem:[#allocation59_spill] sm:$0xff]  ;;  %s5217_s7 = scalar_lea.vmem [#allocation3], %s2990_s11  ;;  %s2116_s24 = ssub.s32 13, %s5063_s28 }
 0x163   : > { %1250 = vmatprep.subr.bf16.mxu0 %v4696_v49  ;;  %v4818_v5 = vcombine.low %v5790_v24, %v5789_v26  ;;  %v5793_v29 = vld [vmem:[#allocation42_spill] sm:$0xff]  ;;  %v5796_v35 = vld [vmem:[#allocation48_spill] sm:$0xff]  ;;  %v5804_v21 = vld [vmem:[#allocation57_spill] sm:$0xff]  ;;  %s5354_s8 = scalar_lea.vmem [#allocation2], %s2994_s23  ;;  %s5360_s10 = sshll.u32 %s2116_s24, 3 }
 0x164   : > { %1251 = vmatpush1.bf16.msra.mxu0 %v4702_v46  ;;  %v4836_v9 = vcombine.low %v5793_v29, %v5792_v31  ;;  %v5797_v33 = vld [vmem:[#allocation46_spill] sm:$0xff]  ;;  %v5800_v16 = vld [vmem:[#allocation52_spill] sm:$0xff]  ;;  %v4882_v22 = vcombine.high %v5804_v21, %v5803_v20  ;;  %v5808_v25 = vld [vmem:[#allocation63_spill] sm:$0xff]  ;;  %s2231_s25 = sshra.s32 %s5360_s10, 3  ;;  %s2391_s14 = scalar_lea.vmem [#allocation6], %s5360_s10 }
 0x165   : > { %1252 = vmatprep.subr.bf16.mxu0 %v4711_v47  ;;  %3252 = vmatpush3.bf16.msra.mxu1 %v4752_v57  ;;  %v4853_v13 = vcombine.low %v5797_v33, %v5796_v35  ;;  %v5801_v17 = vld [vmem:[#allocation50_spill] sm:$0xff]  ;;  %v5805_v23 = vld [vmem:[#allocation56_spill] sm:$0xff]  ;;  %v5809_v26 = vld [vmem:[#allocation61_spill] sm:$0xff]  ;;  %s2995_s26 = smul.u32 24, %s2231_s25  ;;  %s1105_s6 = sadd.s32 1, %s3763_s6  }
 0x166   : > { %3253 = vmatprep.subr.bf16.mxu1 %v5564_v42  ;;  %5794 = vst [vmem:[#allocation108_spill] sm:$0xff] %v4836_v9  ;;  %v4871_v18 = vcombine.low %v5801_v17, %v5800_v16  ;;  %v5806_v24 = vld [vmem:[#allocation54_spill] sm:$0xff]  ;;  %v4893_v17 = vcombine.low %v5804_v21, %v5803_v20  ;;  %v4898_v27 = vcombine.high %v5809_v26, %v5808_v25  ;;  %v5810_v29 = vld [vmem:[#allocation60_spill] sm:$0xff]  ;;  %v5813_v20 = vld [vmem:[#allocation67_spill] sm:$0xff]  ;;  %p1102_p0 = scmp.ge.s32.totalorder %s1105_s6, 4  }
 0x167   : > { %5798 = vst [vmem:[#allocation109_spill] sm:$0xff] %v4853_v13  ;;  %v4887_v16 = vcombine.low %v5806_v24, %v5805_v23  ;;  %v5811_v30 = vld [vmem:[#allocation58_spill] sm:$0xff]  ;;  %v4909_v24 = vcombine.low %v5809_v26, %v5808_v25  ;;  %v5814_v21 = vld [vmem:[#allocation65_spill] sm:$0xff]  ;;  %v5815_v32 = vld [vmem:[#allocation64_spill] sm:$0xff]  ;;  %s5363_s27 = scalar_lea.vmem [#allocation3], %s2995_s26 }
 0x168   : > { %1253 = vmatpush1.bf16.msra.mxu0 %v4724_v55  ;;  %5802 = vst [vmem:[#allocation110_spill] sm:$0xff] %v4871_v18  ;;  %v4903_v23 = vcombine.low %v5811_v30, %v5810_v29  ;;  %v4914_v31 = vcombine.high %v5814_v21, %v5813_v20  ;;  %v5816_v33 = vld [vmem:[#allocation62_spill] sm:$0xff]  ;;  %v4925_v30 = vcombine.low %v5814_v21, %v5813_v20  ;;  %v5818_v25 = vld [vmem:[#allocation71_spill] sm:$0xff]  ;;  %v5819_v26 = vld [vmem:[#allocation69_spill] sm:$0xff] }
 0x169   : > { %1254 = vmatprep.subr.bf16.mxu0 %v4729_v54  ;;  %3254 = vmatpush3.bf16.msra.mxu1 %v4768_v28  ;;  %5807 = vst [vmem:[#allocation111_spill] sm:$0xff] %v4887_v16  ;;  %v4919_v29 = vcombine.low %v5816_v33, %v5815_v32  ;;  %v4930_v34 = vcombine.high %v5819_v26, %v5818_v25  ;;  %v5820_v35 = vld [vmem:[#allocation68_spill] sm:$0xff]  ;;  %v5821_v36 = vld [vmem:[#allocation66_spill] sm:$0xff]  ;;  %v5834_v59 = vld [vmem:[#allocation79_spill] sm:$0xff] }
 0x16a   : > { %3255 = vmatprep.subr.bf16.mxu1 %v5564_v42  ;;  %5812 = vst [vmem:[#allocation112_spill] sm:$0xff] %v4903_v23  ;;  %v4935_v32 = vcombine.low %v5821_v36, %v5820_v35  ;;  %v4941_v33 = vcombine.low %v5819_v26, %v5818_v25  ;;  %v4943_v20 = vld [vmem:[#allocation5] sm:$0xff]  ;;  %v5825_v38 = vld [vmem:[#allocation70_spill] sm:$0xff]  ;;  %v5828_v36 = vld [vmem:[#allocation75_spill] sm:$0xff] }
 0x16b   : > { %5817 = vst [vmem:[#allocation113_spill] sm:$0xff] %v4919_v29  ;;  %v5824_v21 = vld [vmem:[#allocation72_spill] sm:$0xff]  ;;  %v1366_v35 = vpack.c.bf16 %v4943_v20, %v4943_v20  ;;  %v5830_v25 = vld [vmem:[#allocation78_spill] sm:$0xff]  ;;  %v5831_v26 = vld [vmem:[#allocation77_spill] sm:$0xff] }
 0x16c   : > { %1255 = vmatpush1.bf16.msra.mxu0 %v4742_v37  ;;  %5822 = vst [vmem:[#allocation114_spill] sm:$0xff] %v4935_v32  ;;  %5823 = vst [vmem:[#allocation115_spill] sm:$0xff] %v4941_v33 }
 0x16d   : > { %1256 = vmatprep.subr.bf16.mxu0 %v4747_v53  ;;  %3256 = vmatpush3.bf16.msra.mxu1 %v4784_v51 }
 0x16e   : > { %3257 = vmatprep.subr.bf16.mxu1 %v5564_v42  ;;  %v1119_v42 = vpack.c.bf16 %v4808_v3, %v4808_v3 }
 0x170   : > { %1257 = vmatpush1.bf16.msra.mxu0 %v4758_v56 }
 0x171   : > { %1258 = vmatprep.subr.bf16.mxu0 %v4763_v39  ;;  %3258 = vmatpush3.bf16.msra.mxu1 %v4800_v1 }
 0x172   : > { %3259 = vmatprep.subr.bf16.mxu1 %v5791_v6 }
 0x174   : > { %1259 = vmatpush1.bf16.msra.mxu0 %v4774_v58 }
 0x175   : > { %1260 = vmatprep.subr.bf16.mxu0 %v4779_v41  ;;  %3260 = vmatpush3.bf16.msra.mxu1 %v4818_v5 }
 0x176   : > { %3265 = vmatprep.subr.bf16.mxu1 %v5791_v6 }
 0x178   : > { %1261 = vmatpush1.bf16.msra.mxu0 %v4790_v45  ;;  %3262 = vmatmul.mubr.bf16.vlgmr.msra.gmra.mrb[0].mxu1 %v1119_v42 }
 0x179   : > { %1262 = vmatprep.subr.bf16.mxu0 %v4795_v0  ;;  %3266 = vmatpush3.bf16.msra.mxu1 %v4836_v9 }
 0x17a   : > { %3281 = vmatprep.mubr.msk.bf16.mxu1 %vm3769_vm0, %v5791_v6  ;;  %3267 = vmatprep.subr.bf16.mxu1 %v5791_v6 }
 0x17c   : > { %1263 = vmatpush1.bf16.msra.mxu0 %v4806_v2 }
 0x17d   : > { %1495 = vmatprep.subr.bf16.mxu0 %v4813_v4  ;;  %3268 = vmatpush3.bf16.msra.mxu1 %v4853_v13 }
 0x17e   : > { %3269 = vmatprep.subr.bf16.mxu1 %v5791_v6 }
 0x17f   : > { %1281 = vmatmul.mubr.bf16.vlgmr.msra.gmra.mrb[0].mxu0 %v1119_v42  ;;  %v5799_v42 = vld [vmem:[#allocation53_spill] sm:$0xff] }
 0x180   : > { %1496 = vmatpush1.bf16.msra.mxu0 %v4826_v7  ;;  %1527 = vmatprep.mubr.bf16.mxu0 %v5795_v11  ;;  %v4866_v15 = vcombine.high %v5799_v42, %v5754_v43  ;;  %v4877_v19 = vcombine.low %v5799_v42, %v5754_v43  ;;  %v4949_v42 = vcombine.low %v5825_v38, %v5824_v21  ;;  %v5827_v21 = vld [vmem:[#allocation76_spill] sm:$0xff] }
 0x181   : > { %1497 = vmatprep.subr.bf16.mxu0 %v4831_v8  ;;  %3270 = vmatpush3.bf16.msra.mxu1 %v4871_v18  ;;  %v4964_v38 = vcombine.low %v5828_v36, %v5827_v21  ;;  %v4970_v43 = vcombine.low %v5831_v26, %v5830_v25  ;;  %v5836_v21 = vld [vmem:[#allocation82_spill] sm:$0xff]  ;;  %v5837_v36 = vld [vmem:[#allocation81_spill] sm:$0xff]  ;;  %v5839_v25 = vld [vmem:[#allocation84_spill] sm:$0xff] }
 0x182   : > { %3271 = vmatprep.subr.bf16.mxu1 %v5791_v6  ;;  %5826 = vst [vmem:[#allocation116_spill] sm:$0xff] %v4949_v42  ;;  %v4982_v61 = vcombine.low %v5837_v36, %v5836_v21  ;;  %v5840_v26 = vld [vmem:[#allocation83_spill] sm:$0xff]  ;;  %v5845_v21 = vld [vmem:[#allocation88_spill] sm:$0xff] }
 0x183   : > { %5829 = vst [vmem:[#allocation117_spill] sm:$0xff] %v4964_v38  ;;  %5832 = vst [vmem:[#allocation118_spill] sm:$0xff] %v4970_v43  ;;  %v4988_v62 = vcombine.low %v5840_v26, %v5839_v25  ;;  %v5846_v36 = vld [vmem:[#allocation87_spill] sm:$0xff]  ;;  %v5848_v25 = vld [vmem:[#allocation90_spill] sm:$0xff] }
 0x184   : > { %1498 = vmatpush1.bf16.msra.mxu0 %v4842_v10  ;;  %5838 = vst [vmem:[#allocation120_spill] sm:$0xff] %v4982_v61  ;;  %v5849_v26 = vld [vmem:[#allocation89_spill] sm:$0xff] }
 0x185   : > { %1499 = vmatprep.subr.bf16.mxu0 %v4848_v12  ;;  %3272 = vmatpush3.bf16.msra.mxu1 %v4887_v16  ;;  %5841 = vst [vmem:[#allocation121_spill] sm:$0xff] %v4988_v62 }
 0x186   : > { %3273 = vmatprep.subr.bf16.mxu1 %v5791_v6 }
 0x188   : > { %1500 = vmatpush1.bf16.msra.mxu0 %v4861_v14 }
 0x189   : > { %1501 = vmatprep.subr.bf16.mxu0 %v4866_v15  ;;  %3274 = vmatpush3.bf16.msra.mxu1 %v4903_v23 }
 0x18a   : > { %3275 = vmatprep.subr.bf16.mxu1 %v5791_v6 }
 0x18c   : > { %1502 = vmatpush1.bf16.msra.mxu0 %v4877_v19 }
 0x18d   : > { %1503 = vmatprep.subr.bf16.mxu0 %v4882_v22  ;;  %3276 = vmatpush3.bf16.msra.mxu1 %v4919_v29 }
 0x18e   : > { %3277 = vmatprep.subr.bf16.mxu1 %v5791_v6 }
 0x190   : > { %1504 = vmatpush1.bf16.msra.mxu0 %v4893_v17 }
 0x191   : > { %1505 = vmatprep.subr.bf16.mxu0 %v4898_v27  ;;  %3278 = vmatpush3.bf16.msra.mxu1 %v4935_v32  ;;  %v5006_v32 = vcombine.low %v5849_v26, %v5848_v25  ;;  %v5857_v25 = vld [vmem:[#allocation96_spill] sm:$0xff]  ;;  %v5858_v26 = vld [vmem:[#allocation95_spill] sm:$0xff] }
 0x192   : > { %3279 = vmatprep.subr.bf16.mxu1 %v5791_v6 }
 0x193   : > { %5850 = vst [vmem:[#allocation124_spill] sm:$0xff] %v5006_v32 }
 0x194   : > { %1506 = vmatpush1.bf16.msra.mxu0 %v4909_v24 }
 0x195   : > { %1507 = vmatprep.subr.bf16.mxu0 %v4914_v31  ;;  %3280 = vmatpush3.bf16.msra.mxu1 %v4949_v42  ;;  %v5000_v42 = vcombine.low %v5846_v36, %v5845_v21  ;;  %v5854_v21 = vld [vmem:[#allocation94_spill] sm:$0xff]  ;;  %v5855_v36 = vld [vmem:[#allocation93_spill] sm:$0xff] }
 0x196   : > { %3305 = vmatprep.subr.bf16.mxu1 %v5791_v6 }
 0x197   : > { %5847 = vst [vmem:[#allocation123_spill] sm:$0xff] %v5000_v42 }
 0x198   : > { %1508 = vmatpush1.bf16.msra.mxu0 %v4925_v30  ;;  %3282 = vmatmul.mubr.bf16.vlgmr.msra.gmra.mrb[4].mxu1 %v1366_v35 }
 0x199   : > { %1509 = vmatprep.subr.bf16.mxu0 %v4930_v34  ;;  %3321 = vmatprep.mubr.msk.bf16.mxu1 %vm3769_vm0, %v5791_v6 }
 0x19c   : > { %1510 = vmatpush1.bf16.msra.mxu0 %v4941_v33 }
 0x19d   : > { %3285 = vmatprep.subr.bf16.mxu0 %v5791_v6 }
 0x19f   : > { %1528 = vmatmul.mubr.bf16.vlgmr.msra.gmra.mrb[4].mxu0 %v1366_v35  ;;  %v5833_v35 = vld [vmem:[#allocation80_spill] sm:$0xff] }
 0x1a0   : > { %3301 = vmatprep.mubr.msk.bf16.mxu0 %vm3769_vm0, %v5791_v6  ;;  %3286 = vmatpush3.bf16.msra.mxu0 %v4964_v38  ;;  %v4976_v60 = vcombine.low %v5834_v59, %v5833_v35  ;;  %v5842_v59 = vld [vmem:[#allocation86_spill] sm:$0xff]  ;;  %v5843_v35 = vld [vmem:[#allocation85_spill] sm:$0xff] }
 0x1a1   : > { %3287 = vmatprep.subr.bf16.mxu0 %v5791_v6  ;;  %v4994_v63 = vcombine.low %v5843_v35, %v5842_v59  ;;  %v5851_v59 = vld [vmem:[#allocation92_spill] sm:$0xff]  ;;  %v5852_v35 = vld [vmem:[#allocation91_spill] sm:$0xff] }
 0x1a2   : > { %5835 = vst [vmem:[#allocation119_spill] sm:$0xff] %v4976_v60 }
 0x1a3   : > { %5844 = vst [vmem:[#allocation122_spill] sm:$0xff] %v4994_v63 }
 0x1a4   : > { %3288 = vmatpush3.bf16.msra.mxu0 %v4970_v43 }
 0x1a5   : > { %3289 = vmatprep.subr.bf16.mxu0 %v5791_v6 }
 0x1a8   : > { %3290 = vmatpush3.bf16.msra.mxu0 %v4976_v60 }
 0x1a9   : > { %3291 = vmatprep.subr.bf16.mxu0 %v5791_v6 }
 0x1ac   : > { %3292 = vmatpush3.bf16.msra.mxu0 %v4982_v61 }
 0x1ad   : > { %3293 = vmatprep.subr.bf16.mxu0 %v5791_v6 }
 0x1b0   : > { %3294 = vmatpush3.bf16.msra.mxu0 %v4988_v62 }
 0x1b1   : > { %3295 = vmatprep.subr.bf16.mxu0 %v5791_v6 }
 0x1b4   : > { %3296 = vmatpush3.bf16.msra.mxu0 %v4994_v63  ;;  %v5012_v63 = vcombine.low %v5852_v35, %v5851_v59  ;;  %v5860_v59 = vld [vmem:[#allocation98_spill] sm:$0xff]  ;;  %v5861_v35 = vld [vmem:[#allocation97_spill] sm:$0xff] }
 0x1b5   : > { %3297 = vmatprep.subr.bf16.mxu0 %v5791_v6 }
 0x1b6   : > { %5853 = vst [vmem:[#allocation125_spill] sm:$0xff] %v5012_v63  ;;  %3306 = vmatpush3.bf16.msra.mxu1 %v5012_v63  ;;  %v5030_v63 = vcombine.low %v5861_v35, %v5860_v59  ;;  %v5869_v59 = vld [vmem:[#allocation104_spill] sm:$0xff]  ;;  %v5870_v35 = vld [vmem:[#allocation103_spill] sm:$0xff] }
 0x1b7   : > { %3307 = vmatprep.subr.bf16.mxu1 %v5791_v6 }
 0x1b8   : > { %3298 = vmatpush3.bf16.msra.mxu0 %v5000_v42  ;;  %v5018_v42 = vcombine.low %v5855_v36, %v5854_v21  ;;  %5862 = vst [vmem:[#allocation128_spill] sm:$0xff] %v5030_v63  ;;  %v5863_v21 = vld [vmem:[#allocation100_spill] sm:$0xff]  ;;  %v5864_v36 = vld [vmem:[#allocation99_spill] sm:$0xff] }
 0x1b9   : > { %3299 = vmatprep.subr.bf16.mxu0 %v5791_v6 }
 0x1ba   : > { %5856 = vst [vmem:[#allocation126_spill] sm:$0xff] %v5018_v42  ;;  %3308 = vmatpush3.bf16.msra.mxu1 %v5018_v42  ;;  %v5036_v42 = vcombine.low %v5864_v36, %v5863_v21  ;;  %v5872_v21 = vld [vmem:[#allocation106_spill] sm:$0xff]  ;;  %v5873_v36 = vld [vmem:[#allocation105_spill] sm:$0xff] }
 0x1bb   : > { %3309 = vmatprep.subr.bf16.mxu1 %v5791_v6 }
 0x1bc   : > { %3300 = vmatpush3.bf16.msra.mxu0 %v5006_v32  ;;  %v5024_v32 = vcombine.low %v5858_v26, %v5857_v25  ;;  %5865 = vst [vmem:[#allocation129_spill] sm:$0xff] %v5036_v42  ;;  %v5866_v25 = vld [vmem:[#allocation102_spill] sm:$0xff]  ;;  %v5867_v26 = vld [vmem:[#allocation101_spill] sm:$0xff] }
 0x1bd   : > { %1806 = vmatprep.subr.bf16.mxu0 %v4688_v44 }
 0x1be   : > { %5859 = vst [vmem:[#allocation127_spill] sm:$0xff] %v5024_v32  ;;  %3310 = vmatpush3.bf16.msra.mxu1 %v5024_v32  ;;  %v5042_v32 = vcombine.low %v5867_v26, %v5866_v25  ;;  %v1115_v25 = vld [vmem:[%s1114_s9] sm:$0xff] }
 0x1bf   : > { %3311 = vmatprep.subr.bf16.mxu1 %v5791_v6 }
 0x1c0   : > { %5868 = vst [vmem:[#allocation130_spill] sm:$0xff] %v5042_v32 }
 0x1c2   : > { %3312 = vmatpush3.bf16.msra.mxu1 %v5030_v63  ;;  %v5048_v63 = vcombine.low %v5870_v35, %v5869_v59  ;;  %v1116_v35 = vld [vmem:[%s1114_s9 + $0x8] sm:$0xff] }
 0x1c3   : > { %3313 = vmatprep.subr.bf16.mxu1 %v5791_v6 }
 0x1c4   : > { %5871 = vst [vmem:[#allocation131_spill] sm:$0xff] %v5048_v63 }
 0x1c6   : > { %3314 = vmatpush3.bf16.msra.mxu1 %v5036_v42  ;;  %v5054_v42 = vcombine.low %v5873_v36, %v5872_v21 }
 0x1c7   : > { %3315 = vmatprep.subr.bf16.mxu1 %v5791_v6 }
 0x1c8   : > { %5874 = vst [vmem:[#allocation132_spill] sm:$0xff] %v5054_v42 }
 0x1ca   : > { %3316 = vmatpush3.bf16.msra.mxu1 %v5042_v32 }
 0x1cb   : > { %3317 = vmatprep.subr.bf16.mxu1 %v5791_v6 }
 0x1ce   : > { %3318 = vmatpush3.bf16.msra.mxu1 %v5048_v63 }
 0x1cf   : > { %3319 = vmatprep.subr.bf16.mxu1 %v5791_v6 }
 0x1d2   : > { %3320 = vmatpush3.bf16.msra.mxu1 %v5054_v42 }
 0x1d3   : > { %3325 = vmatprep.subr.bf16.mxu1 %v5791_v6 }
 0x24b   : > { %v1323_v44 = vpop.f32.mrb[0].mxu1 }
 0x24c   : > { %v3263_v29 = vpop.f32.mrb[1].mxu1 }
 0x24d   : > { %v1326_v62 = vpop.f32.mrb[2].mxu1 }
 0x24e   : > { %v3264_v23 = vpop.f32.mrb[3].mxu1 }
 0x24f   : > { %v1117_v23 = vld [vmem:[%s1114_s9 + $0x10] sm:$0xff]  ;;  %s2998_s9 = sadd.s32 24, %s5059_s3  ;;  %s2438_s3 = ssub.s32 12, %s5063_s28 }
 0x250   : > { %s2440_s29 = sshra.s32 %s2998_s9, 3 }
 0x251   : > { %s2999_s30 = smul.u32 24, %s2440_s29 }
 0x252   : > { %v1282_v26 = vpop.f32.mrb[0].mxu0 }
 0x253   : > { %v1329_v59 = vadd.f32 %v1282_v26, %v1115_v25  ;;  %v1284_v63 = vpop.f32.mrb[1].mxu0  ;;  %s5498_s13 = scalar_lea.vmem [#allocation2], %s2999_s30 }
 0x254   : > { %v1286_v32 = vpop.f32.mrb[2].mxu0  ;;  %v1336_v42 = vadd.f32 %v1284_v63, %v1116_v35  ;;  %v5875_v63 = vld [vmem:[#allocation73_spill] sm:$0xff] }
 0x255   : > { %v2902_v21 = vmul.f32 -1.442695, %v1329_v59  ;;  %v1287_v36 = vpop.f32.mrb[3].mxu0  ;;  %v1349_v62 = vadd.f32 %v5875_v63, %v1323_v44 }
 0x256   : > { %v2903_v61 = vmul.f32 -1.442695, %v1336_v42 }
 0x257   : > { %3653 = vpow2.f32 %v2902_v21 }
 0x258   : > { %3655 = vpow2.f32 %v2903_v61  ;;  %v1362_v61 = vld [vmem:[%s5070_s15] sm:$0xff] }
 0x261   : > { %v3654_v16 = vpop.eup %3653 }
 0x262   : > { %v1333_v60 = vadd.f32 1.0, %v3654_v16  ;;  %v3656_v32 = vpop.eup %3655 }
 0x263   : > { %v1340_v29 = vadd.f32 1.0, %v3656_v32 }
 0x264   : > { %3657 = vrcp.f32 %v1333_v60  ;;  %v1363_v60 = vld [vmem:[%s5070_s15 + $0x8] sm:$0xff] }
 0x265   : > { %3659 = vrcp.f32 %v1340_v29 }
 0x26b   : > { %v1570_v36 = vpop.f32.mrb[4].mxu1 }
 0x26c   : > { %v3283_v44 = vpop.f32.mrb[5].mxu1 }
 0x26d   : > { %v1573_v43 = vpop.f32.mrb[6].mxu1 }
 0x26e   : > { %v3658_v25 = vpop.eup %3657  ;;  %v3284_v29 = vpop.f32.mrb[7].mxu1  ;;  %v5876_v43 = vld [vmem:[#allocation74_spill] sm:$0xff] }
 0x26f   : > { %v1350_v42 = vmul.f32 %v3658_v25, %v1349_v62  ;;  %v3660_v62 = vpop.eup %3659 }
 0x270   : > { %v1353_v13 = vsub.f32 1.0, %v3660_v62 }
 0x271   : > { %v1351_v16 = vadd.f32 %v1350_v42, %v1117_v23  ;;  %v1355_v42 = vmul.f32 %v3660_v62, %v4808_v3 }
 0x272   : > { %v1529_v26 = vpop.f32.mrb[4].mxu0 }
 0x273   : > { %3661 = vtanh.f32 %v1351_v16  ;;  %v1576_v59 = vadd.f32 %v1529_v26, %v1362_v61  ;;  %v1531_v35 = vpop.f32.mrb[5].mxu0 }
 0x274   : > { %v1533_v21 = vpop.f32.mrb[6].mxu0  ;;  %v1583_v63 = vadd.f32 %v1531_v35, %v1363_v60 }
 0x275   : > { %v2930_v32 = vmul.f32 -1.442695, %v1576_v59  ;;  %v1534_v18 = vpop.f32.mrb[7].mxu0  ;;  %v1364_v59 = vld [vmem:[%s5070_s15 + $0x10] sm:$0xff]  ;;  %s5504_s15 = sshll.u32 %s2438_s3, 3 }
 0x276   : > { %v2931_v25 = vmul.f32 -1.442695, %v1583_v63  ;;  %s2553_s17 = sshra.s32 %s5504_s15, 3  ;;  %s2713_s28 = scalar_lea.vmem [#allocation6], %s5504_s15 }
 0x277   : > { %3663 = vpow2.f32 %v2930_v32  ;;  %s3000_s18 = smul.u32 24, %s2553_s17 }
 0x278   : > { %3665 = vpow2.f32 %v2931_v25 }
 0x279   : > { %s5507_s19 = scalar_lea.vmem [#allocation3], %s3000_s18 }
 0x27d   : > { %v3662_v38 = vpop.eup %3661 }
 0x27e   : > { %v1354_v23 = vmul.f32 %v3662_v38, %v1353_v13  ;;  %v1596_v38 = vadd.f32 %v5876_v43, %v1570_v36 }
 0x280   : > { %v5075_v61 = vadd.f32 %v1355_v42, %v1354_v23  ;;  %v5878_v23 = vld [vmem:[#allocation109_spill] sm:$0xff]  ;;  %v5879_v42 = vld [vmem:[#allocation118_spill] sm:$0xff] }
 0x281   : > { %v3664_v16 = vpop.eup %3663 }
 0x282   : > { %v1580_v26 = vadd.f32 1.0, %v3664_v16  ;;  %v5079_v18 = vpack.c.bf16 %v5075_v61, %v5075_v61  ;;  %v3666_v13 = vpop.eup %3665  ;;  %v5880_v16 = vld [vmem:[#allocation110_spill] sm:$0xff] }
 0x283   : > { %v1587_v3 = vadd.f32 1.0, %v3666_v13  ;;  %v5883_v13 = vld [vmem:[#allocation120_spill] sm:$0xff] }
 0x284   : > { %3667 = vrcp.f32 %v1580_v26  ;;  %3302 = vmatmul.mubr.bf16.vlgmr.msra.gmra.mrb[8].mxu0 %v5079_v18  ;;  %v5881_v26 = vld [vmem:[#allocation119_spill] sm:$0xff] }
 0x285   : > { %1807 = vmatpush1.bf16.msra.mxu0 %v4692_v40  ;;  %1838 = vmatprep.mubr.bf16.mxu0 %v5795_v11  ;;  %3669 = vrcp.f32 %v1587_v3  ;;  %v5884_v3 = vld [vmem:[#allocation112_spill] sm:$0xff] }
 0x286   : > { %1808 = vmatprep.subr.bf16.mxu0 %v4696_v49 }
 0x289   : > { %1809 = vmatpush1.bf16.msra.mxu0 %v4702_v46 }
 0x28a   : > { %1810 = vmatprep.subr.bf16.mxu0 %v4711_v47 }
 0x28d   : > { %1811 = vmatpush1.bf16.msra.mxu0 %v4724_v55 }
 0x28e   : > { %v3668_v63 = vpop.eup %3667  ;;  %1812 = vmatprep.subr.bf16.mxu0 %v4729_v54 }
 0x28f   : > { %v1597_v60 = vmul.f32 %v3668_v63, %v1596_v38  ;;  %v3670_v21 = vpop.eup %3669  ;;  %v5885_v38 = vld [vmem:[#allocation121_spill] sm:$0xff] }
 0x290   : > { %v1600_v36 = vsub.f32 1.0, %v3670_v21  ;;  %v1602_v29 = vmul.f32 %v3670_v21, %v4943_v20  ;;  %v5877_v20 = vld [vmem:[#allocation117_spill] sm:$0xff]  ;;  %v5890_v21 = vld [vmem:[#allocation116_spill] sm:$0xff] }
 0x291   : > { %v1598_v35 = vadd.f32 %v1597_v60, %v1364_v59  ;;  %1813 = vmatpush1.bf16.msra.mxu0 %v4742_v37  ;;  %v5886_v63 = vld [vmem:[#allocation113_spill] sm:$0xff]  ;;  %v5887_v59 = vld [vmem:[#allocation122_spill] sm:$0xff] }
 0x292   : > { %1814 = vmatprep.subr.bf16.mxu0 %v4747_v53  ;;  %v5888_v60 = vld [vmem:[#allocation114_spill] sm:$0xff] }
 0x293   : > { %3671 = vtanh.f32 %v1598_v35  ;;  %v5889_v35 = vld [vmem:[#allocation123_spill] sm:$0xff] }
 0x295   : > { %1815 = vmatpush1.bf16.msra.mxu0 %v4758_v56 }
 0x296   : > { %1816 = vmatprep.subr.bf16.mxu0 %v4763_v39 }
 0x299   : > { %1817 = vmatpush1.bf16.msra.mxu0 %v4774_v58 }
 0x29a   : > { %1818 = vmatprep.subr.bf16.mxu0 %v4779_v41 }
 0x29d   : > { %v3672_v32 = vpop.eup %3671  ;;  %1819 = vmatpush1.bf16.msra.mxu0 %v4790_v45 }
 0x29e   : > { %1820 = vmatprep.subr.bf16.mxu0 %v4795_v0  ;;  %v1601_v44 = vmul.f32 %v3672_v32, %v1600_v36  ;;  %v5891_v36 = vld [vmem:[#allocation124_spill] sm:$0xff]  ;;  %v5892_v32 = vld [vmem:[#allocation107_spill] sm:$0xff] }
 0x2a0   : > { %v5100_v62 = vadd.f32 %v1602_v29, %v1601_v44  ;;  %v5893_v44 = vld [vmem:[#allocation125_spill] sm:$0xff]  ;;  %v5894_v29 = vld [vmem:[#allocation126_spill] sm:$0xff] }
 0x2a1   : > { %1821 = vmatpush1.bf16.msra.mxu0 %v4806_v2 }
 0x2a2   : > { %1919 = vmatprep.subr.bf16.mxu0 %v4813_v4  ;;  %v5106_v25 = vpack.c.bf16 %v5100_v62, %v5100_v62 }
 0x2a4   : > { %1839 = vmatmul.mubr.bf16.vlgmr.msra.gmra.mrb[12].mxu0 %v5079_v18  ;;  %3322 = vmatmul.mubr.bf16.vlgmr.msra.gmra.mrb[8].mxu1 %v5106_v25 }
 0x2a5   : > { %3326 = vmatpush3.bf16.msra.mxu1 %v4706_v48  ;;  %1920 = vmatpush1.bf16.msra.mxu0 %v4826_v7 }
 0x2a6   : > { %3327 = vmatprep.subr.bf16.mxu1 %v5791_v6  ;;  %1921 = vmatprep.subr.bf16.mxu0 %v4831_v8 }
 0x2a7   : > { %3341 = vmatprep.mubr.msk.bf16.mxu1 %vm3769_vm0, %v5791_v6  ;;  %1951 = vmatprep.mubr.bf16.mxu0 %v5795_v11 }
 0x2a9   : > { %3328 = vmatpush3.bf16.msra.mxu1 %v4717_v50  ;;  %1922 = vmatpush1.bf16.msra.mxu0 %v4842_v10 }
 0x2aa   : > { %3329 = vmatprep.subr.bf16.mxu1 %v5791_v6  ;;  %1923 = vmatprep.subr.bf16.mxu0 %v4848_v12 }
 0x2ad   : > { %3330 = vmatpush3.bf16.msra.mxu1 %v4734_v52  ;;  %1924 = vmatpush1.bf16.msra.mxu0 %v4861_v14 }
 0x2ae   : > { %3331 = vmatprep.subr.bf16.mxu1 %v5791_v6  ;;  %1925 = vmatprep.subr.bf16.mxu0 %v4866_v15 }
 0x2b1   : > { %3332 = vmatpush3.bf16.msra.mxu1 %v4752_v57  ;;  %1926 = vmatpush1.bf16.msra.mxu0 %v4877_v19 }
 0x2b2   : > { %3333 = vmatprep.subr.bf16.mxu1 %v5791_v6  ;;  %1927 = vmatprep.subr.bf16.mxu0 %v4882_v22 }
 0x2b5   : > { %3334 = vmatpush3.bf16.msra.mxu1 %v4768_v28  ;;  %1928 = vmatpush1.bf16.msra.mxu0 %v4893_v17 }
 0x2b6   : > { %3335 = vmatprep.subr.bf16.mxu1 %v5791_v6  ;;  %1929 = vmatprep.subr.bf16.mxu0 %v4898_v27 }
 0x2b9   : > { %3336 = vmatpush3.bf16.msra.mxu1 %v4784_v51  ;;  %1930 = vmatpush1.bf16.msra.mxu0 %v4909_v24 }
 0x2ba   : > { %3337 = vmatprep.subr.bf16.mxu1 %v5791_v6  ;;  %1931 = vmatprep.subr.bf16.mxu0 %v4914_v31 }
 0x2bd   : > { %3338 = vmatpush3.bf16.msra.mxu1 %v4800_v1  ;;  %1932 = vmatpush1.bf16.msra.mxu0 %v4925_v30 }
 0x2be   : > { %3339 = vmatprep.subr.bf16.mxu1 %v5791_v6  ;;  %1933 = vmatprep.subr.bf16.mxu0 %v4930_v34 }
 0x2c1   : > { %3340 = vmatpush3.bf16.msra.mxu1 %v4818_v5  ;;  %1934 = vmatpush1.bf16.msra.mxu0 %v4941_v33 }
 0x2c2   : > { %3345 = vmatprep.subr.bf16.mxu1 %v5791_v6  ;;  %3365 = vmatprep.subr.bf16.mxu0 %v5791_v6 }
 0x2c4   : > { %3342 = vmatmul.mubr.bf16.vlgmr.msra.gmra.mrb[12].mxu1 %v5079_v18  ;;  %1952 = vmatmul.mubr.bf16.vlgmr.msra.gmra.mrb[16].mxu0 %v5106_v25  ;;  %v5882_v18 = vld [vmem:[#allocation111_spill] sm:$0xff] }
 0x2c5   : > { %3346 = vmatpush3.bf16.msra.mxu1 %v4836_v9  ;;  %3361 = vmatprep.mubr.msk.bf16.mxu1 %vm3769_vm0, %v5791_v6 }
 0x2c6   : > { %3347 = vmatprep.subr.bf16.mxu1 %v5791_v6  ;;  %3366 = vmatpush3.bf16.msra.mxu0 %v5877_v20 }
 0x2c7   : > { %3367 = vmatprep.subr.bf16.mxu0 %v5791_v6  ;;  %3381 = vmatprep.mubr.msk.bf16.mxu0 %vm3769_vm0, %v5791_v6 }
 0x2c9   : > { %3348 = vmatpush3.bf16.msra.mxu1 %v5878_v23 }
 0x2ca   : > { %3349 = vmatprep.subr.bf16.mxu1 %v5791_v6  ;;  %3368 = vmatpush3.bf16.msra.mxu0 %v5879_v42 }
 0x2cb   : > { %3369 = vmatprep.subr.bf16.mxu0 %v5791_v6 }
 0x2cd   : > { %3350 = vmatpush3.bf16.msra.mxu1 %v5880_v16 }
 0x2ce   : > { %3351 = vmatprep.subr.bf16.mxu1 %v5791_v6  ;;  %3370 = vmatpush3.bf16.msra.mxu0 %v5881_v26 }
 0x2cf   : > { %3371 = vmatprep.subr.bf16.mxu0 %v5791_v6 }
 0x2d1   : > { %3352 = vmatpush3.bf16.msra.mxu1 %v5882_v18  ;;  %v1802_v18 = vld [vmem:[%s5208_s0 + $0x8] sm:$0xff] }
 0x2d2   : > { %3353 = vmatprep.subr.bf16.mxu1 %v5791_v6  ;;  %3372 = vmatpush3.bf16.msra.mxu0 %v5883_v13 }
 0x2d3   : > { %3373 = vmatprep.subr.bf16.mxu0 %v5791_v6 }
 0x2d5   : > { %3354 = vmatpush3.bf16.msra.mxu1 %v5884_v3 }
 0x2d6   : > { %3355 = vmatprep.subr.bf16.mxu1 %v5791_v6  ;;  %3374 = vmatpush3.bf16.msra.mxu0 %v5885_v38 }
 0x2d7   : > { %3375 = vmatprep.subr.bf16.mxu0 %v5791_v6 }
 0x2d9   : > { %3356 = vmatpush3.bf16.msra.mxu1 %v5886_v63 }
 0x2da   : > { %3357 = vmatprep.subr.bf16.mxu1 %v5791_v6  ;;  %3376 = vmatpush3.bf16.msra.mxu0 %v5887_v59 }
 0x2db   : > { %3377 = vmatprep.subr.bf16.mxu0 %v5791_v6 }
 0x2dd   : > { %3358 = vmatpush3.bf16.msra.mxu1 %v5888_v60 }
 0x2de   : > { %3359 = vmatprep.subr.bf16.mxu1 %v5791_v6  ;;  %3378 = vmatpush3.bf16.msra.mxu0 %v5889_v35 }
 0x2df   : > { %3379 = vmatprep.subr.bf16.mxu0 %v5791_v6 }
 0x2e1   : > { %3360 = vmatpush3.bf16.msra.mxu1 %v5890_v21  ;;  %v5895_v21 = vld [vmem:[#allocation127_spill] sm:$0xff] }
 0x2e2   : > { %3380 = vmatpush3.bf16.msra.mxu0 %v5891_v36  ;;  %3385 = vmatprep.subr.bf16.mxu1 %v5791_v6  ;;  %v5896_v36 = vld [vmem:[#allocation128_spill] sm:$0xff] }
 0x2e3   : > { %2128 = vmatprep.subr.bf16.mxu0 %v5892_v32 }
 0x2e4   : > { %3362 = vmatmul.mubr.bf16.vlgmr.msra.gmra.mrb[16].mxu1 %v5106_v25  ;;  %v5897_v25 = vld [vmem:[#allocation129_spill] sm:$0xff] }
 0x2e5   : > { %3386 = vmatpush3.bf16.msra.mxu1 %v5893_v44  ;;  %3401 = vmatprep.mubr.msk.bf16.mxu1 %vm3769_vm0, %v5791_v6  ;;  %v5898_v44 = vld [vmem:[#allocation130_spill] sm:$0xff] }
 0x2e6   : > { %3387 = vmatprep.subr.bf16.mxu1 %v5791_v6 }
 0x2e9   : > { %3388 = vmatpush3.bf16.msra.mxu1 %v5894_v29  ;;  %v5899_v29 = vld [vmem:[#allocation131_spill] sm:$0xff] }
 0x2ea   : > { %3389 = vmatprep.subr.bf16.mxu1 %v5791_v6 }
 0x2ed   : > { %3390 = vmatpush3.bf16.msra.mxu1 %v5895_v21  ;;  %v5900_v21 = vld [vmem:[#allocation132_spill] sm:$0xff] }
 0x2ee   : > { %3391 = vmatprep.subr.bf16.mxu1 %v5791_v6 }
 0x2f1   : > { %3392 = vmatpush3.bf16.msra.mxu1 %v5896_v36 }
 0x2f2   : > { %3393 = vmatprep.subr.bf16.mxu1 %v5791_v6 }
 0x2f5   : > { %3394 = vmatpush3.bf16.msra.mxu1 %v5897_v25  ;;  %v1607_v25 = vld [vmem:[%s5203_s16] sm:$0xff] }
 0x2f6   : > { %3395 = vmatprep.subr.bf16.mxu1 %v5791_v6 }
 0x2f9   : > { %3396 = vmatpush3.bf16.msra.mxu1 %v5898_v44 }
 0x2fa   : > { %3397 = vmatprep.subr.bf16.mxu1 %v5791_v6 }
 0x2fd   : > { %3398 = vmatpush3.bf16.msra.mxu1 %v5899_v29 }
 0x2fe   : > { %3399 = vmatprep.subr.bf16.mxu1 %v5791_v6 }
 0x301   : > { %3400 = vmatpush3.bf16.msra.mxu1 %v5900_v21  ;;  %v1801_v21 = vld [vmem:[%s5208_s0] sm:$0xff] }
 0x302   : > { %3405 = vmatprep.subr.bf16.mxu1 %v5791_v6 }
 0x357   : > { %v1691_v36 = vpop.f32.mrb[8].mxu0 }
 0x358   : > { %v1697_v32 = vadd.f32 %v1691_v36, %v1607_v25  ;;  %v3303_v35 = vpop.f32.mrb[9].mxu0 }
 0x359   : > { %v1694_v44 = vpop.f32.mrb[10].mxu0 }
 0x35a   : > { %1698 = vst [vmem:[%s5203_s16] sm:$0xff] %v1697_v32  ;;  %v3304_v60 = vpop.f32.mrb[11].mxu0 }
 0x361   : > { %v1700_v59 = vld [vmem:[%s1699_s20] sm:$0xff] }
 0x377   : > { %v1840_v29 = vpop.f32.mrb[12].mxu0  ;;  %v1784_v63 = vpop.f32.mrb[8].mxu1 }
 0x378   : > { %v1887_v38 = vadd.f32 %v1840_v29, %v1801_v21  ;;  %v1790_v3 = vadd.f32 %v1784_v63, %v1700_v59  ;;  %v1842_v36 = vpop.f32.mrb[13].mxu0  ;;  %v3323_v35 = vpop.f32.mrb[9].mxu1 }
 0x379   : > { %v1844_v44 = vpop.f32.mrb[14].mxu0  ;;  %v1787_v32 = vpop.f32.mrb[10].mxu1  ;;  %v1894_v26 = vadd.f32 %v1842_v36, %v1802_v18 }
 0x37a   : > { %v2952_v60 = vmul.f32 -1.442695, %v1887_v38  ;;  %1791 = vst [vmem:[%s1699_s20] sm:$0xff] %v1790_v3  ;;  %v1845_v25 = vpop.f32.mrb[15].mxu0  ;;  %v3324_v13 = vpop.f32.mrb[11].mxu1  ;;  %v1803_v44 = vld [vmem:[%s5208_s0 + $0x10] sm:$0xff]  ;;  %s3770_s0 = smov (%p1102_p0), [#allocation6]  }
 0x37b   : > { %v2953_v16 = vmul.f32 -1.442695, %v1894_v26  ;;  %v1914_v13 = vld [vmem:[%s5217_s7] sm:$0xff]  ;;  %v5901_v26 = vld [vmem:[#allocation73_spill] sm:$0xff]  ;;  %s2763_s20 = sshll.u32 (%p1102_p0), %s3770_s0, 4  ;;  %s2764_s20 = int_to_ptr.vmem [resolvable:$true] %s2763_s20 }
 0x37c   : > { %3673 = vpow2.f32 %v2952_v60  ;;  %s3733_s5 = scalar_lea.vmem (%p1102_p0), %s2764_s20, 2048  ;;  %p3738_p2 = scmp.lt.s32.totalorder (%p1102_p0), %s2764_s20, %s2764_s20 }
 0x37d   : > { %3675 = vpow2.f32 %v2953_v16  ;;  %p3734_p1 = scmp.ne.s32.totalorder (%p1102_p0), %s2764_s20, %s3733_s5  ;;  %p3739_p3 = scmp.lt.s32.totalorder (%p1102_p0), %s3733_s5, %s3733_s5 }
 0x37f   :  { %p3740_p4 = por (%p1102_p0), %p3739_p3, %p3738_p2 }
 0x381   :  { %p3741_p5 = pnand (%p1102_p0), %p3740_p4, %p3734_p1 }
 0x386   : > { %v3674_v42 = vpop.eup %3673 }
 0x387   : > { %v1891_v63 = vadd.f32 1.0, %v3674_v42  ;;  %v3676_v59 = vpop.eup %3675 }
 0x388   : > { %v1898_v3 = vadd.f32 1.0, %v3676_v59  ;;  %v1915_v59 = vld [vmem:[%s5217_s7 + $0x8] sm:$0xff] }
 0x389   : > { %3677 = vrcp.f32 %v1891_v63 }
 0x38a   : > { %3679 = vrcp.f32 %v1898_v3 }
 0x393   : > { %v3678_v16 = vpop.eup %3677 }
 0x394   : > { %v3680_v33 = vpop.eup %3679 }
 0x397   : > { %v1881_v38 = vpop.f32.mrb[12].mxu1  ;;  %v1953_v18 = vpop.f32.mrb[16].mxu0 }
 0x398   : > { %v1901_v21 = vadd.f32 %v5901_v26, %v1881_v38  ;;  %v2000_v29 = vadd.f32 %v1953_v18, %v1914_v13  ;;  %v3343_v36 = vpop.f32.mrb[13].mxu1  ;;  %v1955_v35 = vpop.f32.mrb[17].mxu0  ;;  %v1905_v13 = vsub.f32 1.0, %v3680_v33 }
 0x399   : > { %v1884_v42 = vpop.f32.mrb[14].mxu1  ;;  %v1957_v32 = vpop.f32.mrb[18].mxu0  ;;  %v2007_v9 = vadd.f32 %v1955_v35, %v1915_v59 }
 0x39a   : > { %v1902_v60 = vmul.f32 %v3678_v16, %v1901_v21  ;;  %v2955_v25 = vmul.f32 -1.442695, %v2000_v29  ;;  %v3344_v63 = vpop.f32.mrb[15].mxu1  ;;  %v1958_v23 = vpop.f32.mrb[19].mxu0  ;;  %v1907_v42 = vmul.f32 %v3680_v33, %v5075_v61  ;;  %v1916_v29 = vld [vmem:[%s5217_s7 + $0x10] sm:$0xff] }
 0x39b   : > { %v2956_v38 = vmul.f32 -1.442695, %v2007_v9 }
 0x39c   : > { %v1903_v20 = vadd.f32 %v1902_v60, %v1803_v44  ;;  %3681 = vpow2.f32 %v2955_v25 }
 0x39e   : > { %3683 = vtanh.f32 %v1903_v20 }
 0x39f   : > { %3685 = vpow2.f32 %v2956_v38 }
 0x3a6   : > { %v3682_v26 = vpop.eup %3681 }
 0x3a7   : > { %v2004_v32 = vadd.f32 1.0, %v3682_v26 }
 0x3a8   : > { %v3684_v18 = vpop.eup %3683 }
 0x3a9   : > { %v1906_v36 = vmul.f32 %v3684_v18, %v1905_v13  ;;  %3687 = vrcp.f32 %v2004_v32  ;;  %v3686_v9 = vpop.eup %3685  ;;  %v5904_v32 = vld [vmem:[#allocation117_spill] sm:$0xff] }
 0x3aa   : > { %v2011_v33 = vadd.f32 1.0, %v3686_v9  ;;  %v5905_v9 = vld [vmem:[#allocation109_spill] sm:$0xff] }
 0x3ab   : > { %v5224_v3 = vadd.f32 %v1907_v42, %v1906_v36  ;;  %v5903_v42 = vld [vmem:[#allocation108_spill] sm:$0xff] }
 0x3ac   : > { %3689 = vrcp.f32 %v2011_v33  ;;  %v5907_v33 = vld [vmem:[#allocation110_spill] sm:$0xff] }
 0x3ad   : > { %v5228_v23 = vpack.c.bf16 %v5224_v3, %v5224_v3 }
 0x3af   : > { %3382 = vmatmul.mubr.bf16.vlgmr.msra.gmra.mrb[20].mxu0 %v5228_v23 }
 0x3b0   : > { %2129 = vmatpush1.bf16.msra.mxu0 %v4692_v40  ;;  %2160 = vmatprep.mubr.bf16.mxu0 %v5795_v11 }
 0x3b1   : > { %2130 = vmatprep.subr.bf16.mxu0 %v4696_v49 }
 0x3b3   : > { %v3688_v21 = vpop.eup %3687 }
 0x3b4   : > { %2131 = vmatpush1.bf16.msra.mxu0 %v4702_v46 }
 0x3b5   : > { %2132 = vmatprep.subr.bf16.mxu0 %v4711_v47 }
 0x3b6   : > { %v3690_v25 = vpop.eup %3689 }
 0x3b7   : > { %v1994_v61 = vpop.f32.mrb[16].mxu1  ;;  %v2018_v63 = vsub.f32 1.0, %v3690_v25  ;;  %v2020_v13 = vmul.f32 %v3690_v25, %v5100_v62  ;;  %v5902_v62 = vld [vmem:[#allocation115_spill] sm:$0xff]  ;;  %v5917_v25 = vld [vmem:[#allocation116_spill] sm:$0xff] }
 0x3b8   : > { %v2014_v20 = vadd.f32 %v5876_v43, %v1994_v61  ;;  %2133 = vmatpush1.bf16.msra.mxu0 %v4724_v55  ;;  %v3363_v26 = vpop.f32.mrb[17].mxu1  ;;  %v5908_v61 = vld [vmem:[#allocation119_spill] sm:$0xff] }
 0x3b9   : > { %v1997_v35 = vpop.f32.mrb[18].mxu1  ;;  %2134 = vmatprep.subr.bf16.mxu0 %v4729_v54  ;;  %v5910_v26 = vld [vmem:[#allocation120_spill] sm:$0xff] }
 0x3ba   : > { %v2015_v16 = vmul.f32 %v3688_v21, %v2014_v20  ;;  %v3364_v44 = vpop.f32.mrb[19].mxu1  ;;  %v5909_v20 = vld [vmem:[#allocation111_spill] sm:$0xff]  ;;  %v5911_v21 = vld [vmem:[#allocation112_spill] sm:$0xff]  ;;  %v5913_v35 = vld [vmem:[#allocation113_spill] sm:$0xff] }
 0x3bb   : > { %v5915_v44 = vld [vmem:[#allocation114_spill] sm:$0xff] }
 0x3bc   : > { %v2016_v60 = vadd.f32 %v2015_v16, %v1916_v29  ;;  %2135 = vmatpush1.bf16.msra.mxu0 %v4742_v37  ;;  %v5912_v29 = vld [vmem:[#allocation121_spill] sm:$0xff]  ;;  %v5914_v16 = vld [vmem:[#allocation122_spill] sm:$0xff] }
 0x3bd   : > { %2136 = vmatprep.subr.bf16.mxu0 %v4747_v53 }
 0x3be   : > { %3691 = vtanh.f32 %v2016_v60  ;;  %v5916_v60 = vld [vmem:[#allocation123_spill] sm:$0xff] }
 0x3c0   : > { %2137 = vmatpush1.bf16.msra.mxu0 %v4758_v56 }
 0x3c1   : > { %2138 = vmatprep.subr.bf16.mxu0 %v4763_v39 }
 0x3c4   : > { %2139 = vmatpush1.bf16.msra.mxu0 %v4774_v58 }
 0x3c5   : > { %2140 = vmatprep.subr.bf16.mxu0 %v4779_v41 }
 0x3c8   : > { %v3692_v59 = vpop.eup %3691  ;;  %2141 = vmatpush1.bf16.msra.mxu0 %v4790_v45 }
 0x3c9   : > { %2142 = vmatprep.subr.bf16.mxu0 %v4795_v0  ;;  %v2019_v38 = vmul.f32 %v3692_v59, %v2018_v63  ;;  %v5918_v63 = vld [vmem:[#allocation124_spill] sm:$0xff]  ;;  %v5919_v59 = vld [vmem:[#allocation107_spill] sm:$0xff] }
 0x3cb   : > { %v5249_v18 = vadd.f32 %v2020_v13, %v2019_v38  ;;  %v5920_v38 = vld [vmem:[#allocation125_spill] sm:$0xff]  ;;  %v5921_v13 = vld [vmem:[#allocation126_spill] sm:$0xff] }
 0x3cc   : > { %2143 = vmatpush1.bf16.msra.mxu0 %v4806_v2 }
 0x3cd   : > { %2241 = vmatprep.subr.bf16.mxu0 %v4813_v4  ;;  %v5255_v36 = vpack.c.bf16 %v5249_v18, %v5249_v18 }
 0x3cf   : > { %2161 = vmatmul.mubr.bf16.vlgmr.msra.gmra.mrb[24].mxu0 %v5228_v23  ;;  %3402 = vmatmul.mubr.bf16.vlgmr.msra.gmra.mrb[20].mxu1 %v5255_v36 }
 0x3d0   : > { %3406 = vmatpush3.bf16.msra.mxu1 %v4706_v48  ;;  %2242 = vmatpush1.bf16.msra.mxu0 %v4826_v7 }
 0x3d1   : > { %3407 = vmatprep.subr.bf16.mxu1 %v5791_v6  ;;  %2243 = vmatprep.subr.bf16.mxu0 %v4831_v8 }
 0x3d2   : > { %3421 = vmatprep.mubr.msk.bf16.mxu1 %vm3769_vm0, %v5791_v6  ;;  %2273 = vmatprep.mubr.bf16.mxu0 %v5795_v11 }
 0x3d4   : > { %3408 = vmatpush3.bf16.msra.mxu1 %v4717_v50  ;;  %2244 = vmatpush1.bf16.msra.mxu0 %v4842_v10 }
 0x3d5   : > { %3409 = vmatprep.subr.bf16.mxu1 %v5791_v6  ;;  %2245 = vmatprep.subr.bf16.mxu0 %v4848_v12 }
 0x3d8   : > { %3410 = vmatpush3.bf16.msra.mxu1 %v4734_v52  ;;  %2246 = vmatpush1.bf16.msra.mxu0 %v4861_v14 }
 0x3d9   : > { %3411 = vmatprep.subr.bf16.mxu1 %v5791_v6  ;;  %2247 = vmatprep.subr.bf16.mxu0 %v4866_v15 }
 0x3dc   : > { %3412 = vmatpush3.bf16.msra.mxu1 %v4752_v57  ;;  %2248 = vmatpush1.bf16.msra.mxu0 %v4877_v19 }
 0x3dd   : > { %3413 = vmatprep.subr.bf16.mxu1 %v5791_v6  ;;  %2249 = vmatprep.subr.bf16.mxu0 %v4882_v22 }
 0x3e0   : > { %3414 = vmatpush3.bf16.msra.mxu1 %v4768_v28  ;;  %2250 = vmatpush1.bf16.msra.mxu0 %v4893_v17 }
 0x3e1   : > { %3415 = vmatprep.subr.bf16.mxu1 %v5791_v6  ;;  %2251 = vmatprep.subr.bf16.mxu0 %v4898_v27 }
 0x3e4   : > { %3416 = vmatpush3.bf16.msra.mxu1 %v4784_v51  ;;  %2252 = vmatpush1.bf16.msra.mxu0 %v4909_v24 }
 0x3e5   : > { %3417 = vmatprep.subr.bf16.mxu1 %v5791_v6  ;;  %2253 = vmatprep.subr.bf16.mxu0 %v4914_v31 }
 0x3e8   : > { %3418 = vmatpush3.bf16.msra.mxu1 %v4800_v1  ;;  %2254 = vmatpush1.bf16.msra.mxu0 %v4925_v30 }
 0x3e9   : > { %3419 = vmatprep.subr.bf16.mxu1 %v5791_v6  ;;  %2255 = vmatprep.subr.bf16.mxu0 %v4930_v34 }
 0x3ec   : > { %3420 = vmatpush3.bf16.msra.mxu1 %v4818_v5  ;;  %2256 = vmatpush1.bf16.msra.mxu0 %v5902_v62 }
 0x3ed   : > { %3425 = vmatprep.subr.bf16.mxu1 %v5791_v6  ;;  %3445 = vmatprep.subr.bf16.mxu0 %v5791_v6 }
 0x3ef   : > { %3422 = vmatmul.mubr.bf16.vlgmr.msra.gmra.mrb[24].mxu1 %v5228_v23  ;;  %2274 = vmatmul.mubr.bf16.vlgmr.msra.gmra.mrb[28].mxu0 %v5255_v36  ;;  %v5906_v23 = vld [vmem:[#allocation118_spill] sm:$0xff] }
 0x3f0   : > { %3426 = vmatpush3.bf16.msra.mxu1 %v5903_v42  ;;  %3441 = vmatprep.mubr.msk.bf16.mxu1 %vm3769_vm0, %v5791_v6 }
 0x3f1   : > { %3427 = vmatprep.subr.bf16.mxu1 %v5791_v6  ;;  %3446 = vmatpush3.bf16.msra.mxu0 %v5904_v32 }
 0x3f2   : > { %3447 = vmatprep.subr.bf16.mxu0 %v5791_v6  ;;  %3461 = vmatprep.mubr.msk.bf16.mxu0 %vm3769_vm0, %v5791_v6 }
 0x3f4   : > { %3428 = vmatpush3.bf16.msra.mxu1 %v5905_v9 }
 0x3f5   : > { %3429 = vmatprep.subr.bf16.mxu1 %v5791_v6  ;;  %3448 = vmatpush3.bf16.msra.mxu0 %v5906_v23 }
 0x3f6   : > { %3449 = vmatprep.subr.bf16.mxu0 %v5791_v6 }
 0x3f8   : > { %3430 = vmatpush3.bf16.msra.mxu1 %v5907_v33 }
 0x3f9   : > { %3431 = vmatprep.subr.bf16.mxu1 %v5791_v6  ;;  %3450 = vmatpush3.bf16.msra.mxu0 %v5908_v61 }
 0x3fa   : > { %3451 = vmatprep.subr.bf16.mxu0 %v5791_v6 }
 0x3fc   : > { %3432 = vmatpush3.bf16.msra.mxu1 %v5909_v20  ;;  %v2124_v20 = vld [vmem:[%s5354_s8 + $0x8] sm:$0xff] }
 0x3fd   : > { %3433 = vmatprep.subr.bf16.mxu1 %v5791_v6  ;;  %3452 = vmatpush3.bf16.msra.mxu0 %v5910_v26 }
 0x3fe   : > { %3453 = vmatprep.subr.bf16.mxu0 %v5791_v6 }
 0x400   : > { %3434 = vmatpush3.bf16.msra.mxu1 %v5911_v21 }
 0x401   : > { %3435 = vmatprep.subr.bf16.mxu1 %v5791_v6  ;;  %3454 = vmatpush3.bf16.msra.mxu0 %v5912_v29 }
 0x402   : > { %3455 = vmatprep.subr.bf16.mxu0 %v5791_v6 }
 0x404   : > { %3436 = vmatpush3.bf16.msra.mxu1 %v5913_v35 }
 0x405   : > { %3437 = vmatprep.subr.bf16.mxu1 %v5791_v6  ;;  %3456 = vmatpush3.bf16.msra.mxu0 %v5914_v16 }
 0x406   : > { %3457 = vmatprep.subr.bf16.mxu0 %v5791_v6 }
 0x408   : > { %3438 = vmatpush3.bf16.msra.mxu1 %v5915_v44 }
 0x409   : > { %3439 = vmatprep.subr.bf16.mxu1 %v5791_v6  ;;  %3458 = vmatpush3.bf16.msra.mxu0 %v5916_v60 }
 0x40a   : > { %3459 = vmatprep.subr.bf16.mxu0 %v5791_v6 }
 0x40c   : > { %3440 = vmatpush3.bf16.msra.mxu1 %v5917_v25  ;;  %v5922_v25 = vld [vmem:[#allocation127_spill] sm:$0xff] }
 0x40d   : > { %3460 = vmatpush3.bf16.msra.mxu0 %v5918_v63  ;;  %3465 = vmatprep.subr.bf16.mxu1 %v5791_v6  ;;  %v5923_v63 = vld [vmem:[#allocation128_spill] sm:$0xff] }
 0x40e   : > { %2450 = vmatprep.subr.bf16.mxu0 %v5919_v59  ;;  %v5925_v59 = vld [vmem:[#allocation130_spill] sm:$0xff] }
 0x40f   : > { %3442 = vmatmul.mubr.bf16.vlgmr.msra.gmra.mrb[28].mxu1 %v5255_v36  ;;  %v5924_v36 = vld [vmem:[#allocation129_spill] sm:$0xff] }
 0x410   : > { %3466 = vmatpush3.bf16.msra.mxu1 %v5920_v38  ;;  %3481 = vmatprep.mubr.msk.bf16.mxu1 %vm3769_vm0, %v5791_v6 }
 0x411   : > { %3467 = vmatprep.subr.bf16.mxu1 %v5791_v6 }
 0x414   : > { %3468 = vmatpush3.bf16.msra.mxu1 %v5921_v13  ;;  %v5926_v13 = vld [vmem:[#allocation131_spill] sm:$0xff] }
 0x415   : > { %3469 = vmatprep.subr.bf16.mxu1 %v5791_v6 }
 0x418   : > { %3470 = vmatpush3.bf16.msra.mxu1 %v5922_v25  ;;  %v5927_v25 = vld [vmem:[#allocation132_spill] sm:$0xff] }
 0x419   : > { %3471 = vmatprep.subr.bf16.mxu1 %v5791_v6 }
 0x41c   : > { %3472 = vmatpush3.bf16.msra.mxu1 %v5923_v63  ;;  %v2959_v63 = vld [vmem:[%s5203_s16 + $0x8] sm:$0xff] }
 0x41d   : > { %3473 = vmatprep.subr.bf16.mxu1 %v5791_v6 }
 0x420   : > { %3474 = vmatpush3.bf16.msra.mxu1 %v5924_v36 }
 0x421   : > { %3475 = vmatprep.subr.bf16.mxu1 %v5791_v6 }
 0x424   : > { %3476 = vmatpush3.bf16.msra.mxu1 %v5925_v59 }
 0x425   : > { %3477 = vmatprep.subr.bf16.mxu1 %v5791_v6 }
 0x428   : > { %3478 = vmatpush3.bf16.msra.mxu1 %v5926_v13  ;;  %v2123_v13 = vld [vmem:[%s5354_s8] sm:$0xff] }
 0x429   : > { %3479 = vmatprep.subr.bf16.mxu1 %v5791_v6 }
 0x42c   : > { %3480 = vmatpush3.bf16.msra.mxu1 %v5927_v25 }
 0x42d   : > { %3485 = vmatprep.subr.bf16.mxu1 %v5791_v6 }
 0x482   : > { %v2061_v38 = vpop.f32.mrb[20].mxu0 }
 0x483   : > { %v2067_v60 = vadd.f32 %v2959_v63, %v2061_v38  ;;  %v3383_v44 = vpop.f32.mrb[21].mxu0 }
 0x484   : > { %v2064_v36 = vpop.f32.mrb[22].mxu0 }
 0x485   : > { %2960 = vst [vmem:[%s5203_s16 + $0x8] sm:$0xff] %v2067_v60  ;;  %v3384_v16 = vpop.f32.mrb[23].mxu0 }
 0x48c   : > { %v2070_v25 = vld [vmem:[%s2069_s1] sm:$0xff] }
 0x4a2   : > { %v2162_v59 = vpop.f32.mrb[24].mxu0  ;;  %v2106_v35 = vpop.f32.mrb[20].mxu1 }
 0x4a3   : > { %v2209_v29 = vadd.f32 %v2162_v59, %v2123_v13  ;;  %v2112_v21 = vadd.f32 %v2106_v35, %v2070_v25  ;;  %v2164_v63 = vpop.f32.mrb[25].mxu0  ;;  %v3403_v44 = vpop.f32.mrb[21].mxu1 }
 0x4a4   : > { %v2166_v38 = vpop.f32.mrb[26].mxu0  ;;  %v2109_v60 = vpop.f32.mrb[22].mxu1  ;;  %v2216_v61 = vadd.f32 %v2164_v63, %v2124_v20 }
 0x4a5   : > { %v2964_v16 = vmul.f32 -1.442695, %v2209_v29  ;;  %2113 = vst [vmem:[%s2069_s1] sm:$0xff] %v2112_v21  ;;  %v2167_v36 = vpop.f32.mrb[27].mxu0  ;;  %v3404_v26 = vpop.f32.mrb[23].mxu1  ;;  %v2125_v38 = vld [vmem:[%s5354_s8 + $0x10] sm:$0xff] }
 0x4a6   : > { %v2965_v33 = vmul.f32 -1.442695, %v2216_v61  ;;  %v2236_v26 = vld [vmem:[%s5363_s27] sm:$0xff]  ;;  %v5928_v61 = vld [vmem:[#allocation73_spill] sm:$0xff] }
 0x4a7   : > { %3693 = vpow2.f32 %v2964_v16 }
 0x4a8   : > { %3695 = vpow2.f32 %v2965_v33 }
 0x4b1   : > { %v3694_v23 = vpop.eup %3693 }
 0x4b2   : > { %v2213_v35 = vadd.f32 1.0, %v3694_v23  ;;  %v3696_v25 = vpop.eup %3695 }
 0x4b3   : > { %v2220_v21 = vadd.f32 1.0, %v3696_v25  ;;  %v2237_v25 = vld [vmem:[%s5363_s27 + $0x8] sm:$0xff] }
 0x4b4   : > { %3697 = vrcp.f32 %v2213_v35 }
 0x4b5   : > { %3699 = vrcp.f32 %v2220_v21 }
 0x4be   : > { %v3698_v33 = vpop.eup %3697 }
 0x4bf   : > { %v3700_v62 = vpop.eup %3699 }
 0x4c2   : > { %v2203_v29 = vpop.f32.mrb[24].mxu1  ;;  %v2275_v20 = vpop.f32.mrb[28].mxu0 }
 0x4c3   : > { %v2223_v13 = vadd.f32 %v5928_v61, %v2203_v29  ;;  %v2322_v59 = vadd.f32 %v2275_v20, %v2236_v26  ;;  %v3423_v63 = vpop.f32.mrb[25].mxu1  ;;  %v2277_v44 = vpop.f32.mrb[29].mxu0  ;;  %v2227_v26 = vsub.f32 1.0, %v3700_v62 }
 0x4c4   : > { %v2206_v23 = vpop.f32.mrb[26].mxu1  ;;  %v2279_v60 = vpop.f32.mrb[30].mxu0  ;;  %v2329_v42 = vadd.f32 %v2277_v44, %v2237_v25 }
 0x4c5   : > { %v2224_v16 = vmul.f32 %v3698_v33, %v2223_v13  ;;  %v2967_v36 = vmul.f32 -1.442695, %v2322_v59  ;;  %v3424_v35 = vpop.f32.mrb[27].mxu1  ;;  %v2280_v9 = vpop.f32.mrb[31].mxu0  ;;  %v2229_v23 = vmul.f32 %v3700_v62, %v5224_v3  ;;  %v2238_v59 = vld [vmem:[%s5363_s27 + $0x10] sm:$0xff] }
 0x4c6   : > { %v2968_v29 = vmul.f32 -1.442695, %v2329_v42 }
 0x4c7   : > { %v2225_v32 = vadd.f32 %v2224_v16, %v2125_v38  ;;  %3701 = vpow2.f32 %v2967_v36  ;;  %v2445_v38 = vld [vmem:[%s5498_s13] sm:$0xff] }
 0x4c9   : > { %3703 = vtanh.f32 %v2225_v32 }
 0x4ca   : > { %3705 = vpow2.f32 %v2968_v29 }
 0x4d1   : > { %v3702_v61 = vpop.eup %3701 }
 0x4d2   : > { %v2326_v60 = vadd.f32 1.0, %v3702_v61 }
 0x4d3   : > { %v3704_v20 = vpop.eup %3703 }
 0x4d4   : > { %v2228_v63 = vmul.f32 %v3704_v20, %v2227_v26  ;;  %3707 = vrcp.f32 %v2326_v60  ;;  %v3706_v42 = vpop.eup %3705 }
 0x4d5   : > { %v2333_v3 = vadd.f32 1.0, %v3706_v42  ;;  %v2446_v42 = vld [vmem:[%s5498_s13 + $0x8] sm:$0xff] }
 0x4d6   : > { %v5370_v21 = vadd.f32 %v2229_v23, %v2228_v63 }
 0x4d7   : > { %3709 = vrcp.f32 %v2333_v3 }
 0x4d8   : > { %v5374_v9 = vpack.c.bf16 %v5370_v21, %v5370_v21 }
 0x4da   : > { %3462 = vmatmul.mubr.bf16.vlgmr.msra.gmra.mrb[32].mxu0 %v5374_v9 }
 0x4db   : > { %2451 = vmatpush1.bf16.msra.mxu0 %v4692_v40  ;;  %2482 = vmatprep.mubr.bf16.mxu0 %v5795_v11 }
 0x4dc   : > { %2452 = vmatprep.subr.bf16.mxu0 %v4696_v49 }
 0x4de   : > { %v3708_v13 = vpop.eup %3707 }
 0x4df   : > { %2453 = vmatpush1.bf16.msra.mxu0 %v4702_v46 }
 0x4e0   : > { %2454 = vmatprep.subr.bf16.mxu0 %v4711_v47 }
 0x4e1   : > { %v3710_v46 = vpop.eup %3709 }
 0x4e2   : > { %v2316_v62 = vpop.f32.mrb[28].mxu1  ;;  %v2340_v47 = vsub.f32 1.0, %v3710_v46 }
 0x4e3   : > { %v2336_v32 = vadd.f32 %v5876_v43, %v2316_v62  ;;  %2455 = vmatpush1.bf16.msra.mxu0 %v4724_v55  ;;  %v3443_v61 = vpop.f32.mrb[29].mxu1 }
 0x4e4   : > { %v2319_v44 = vpop.f32.mrb[30].mxu1  ;;  %2456 = vmatprep.subr.bf16.mxu0 %v4729_v54 }
 0x4e5   : > { %v2337_v40 = vmul.f32 %v3708_v13, %v2336_v32  ;;  %v3444_v49 = vpop.f32.mrb[31].mxu1 }
 0x4e7   : > { %v2338_v33 = vadd.f32 %v2337_v40, %v2238_v59  ;;  %2457 = vmatpush1.bf16.msra.mxu0 %v4742_v37  ;;  %v2342_v37 = vmul.f32 %v3710_v46, %v5249_v18  ;;  %v2558_v59 = vld [vmem:[%s5507_s19] sm:$0xff] }
 0x4e8   : > { %2458 = vmatprep.subr.bf16.mxu0 %v4747_v53 }
 0x4e9   : > { %3711 = vtanh.f32 %v2338_v33  ;;  %v5954_v33 = vld [vmem:[#allocation73_spill] sm:$0xff] }
 0x4eb   : > { %2459 = vmatpush1.bf16.msra.mxu0 %v4758_v56 }
 0x4ec   : > { %2460 = vmatprep.subr.bf16.mxu0 %v4763_v39  ;;  %v5951_v39 = vld [vmem:[#allocation130_spill] sm:$0xff] }
 0x4ef   : > { %2461 = vmatpush1.bf16.msra.mxu0 %v4774_v58  ;;  %v5953_v58 = vld [vmem:[#allocation132_spill] sm:$0xff] }
 0x4f0   : > { %2462 = vmatprep.subr.bf16.mxu0 %v4779_v41  ;;  %v2971_v41 = vld [vmem:[%s5203_s16 + $0x10] sm:$0xff] }
 0x4f3   : > { %v3712_v55 = vpop.eup %3711  ;;  %2463 = vmatpush1.bf16.msra.mxu0 %v4790_v45  ;;  %v5948_v45 = vld [vmem:[#allocation127_spill] sm:$0xff] }
 0x4f4   : > { %2464 = vmatprep.subr.bf16.mxu0 %v4795_v0  ;;  %v2341_v54 = vmul.f32 %v3712_v55, %v2340_v47  ;;  %v5929_v0 = vld [vmem:[#allocation115_spill] sm:$0xff] }
 0x4f6   : > { %v5395_v53 = vadd.f32 %v2342_v37, %v2341_v54 }
 0x4f7   : > { %2465 = vmatpush1.bf16.msra.mxu0 %v4806_v2  ;;  %v5930_v2 = vld [vmem:[#allocation108_spill] sm:$0xff] }
 0x4f8   : > { %2563 = vmatprep.subr.bf16.mxu0 %v4813_v4  ;;  %v5401_v56 = vpack.c.bf16 %v5395_v53, %v5395_v53  ;;  %v5932_v4 = vld [vmem:[#allocation109_spill] sm:$0xff] }
 0x4fa   : > { %2483 = vmatmul.mubr.bf16.vlgmr.msra.gmra.mrb[36].mxu0 %v5374_v9  ;;  %3482 = vmatmul.mubr.bf16.vlgmr.msra.gmra.mrb[32].mxu1 %v5401_v56 }
 0x4fb   : > { %3486 = vmatpush3.bf16.msra.mxu1 %v4706_v48  ;;  %2564 = vmatpush1.bf16.msra.mxu0 %v4826_v7  ;;  %v5934_v7 = vld [vmem:[#allocation110_spill] sm:$0xff]  ;;  %v5946_v48 = vld [vmem:[#allocation125_spill] sm:$0xff] }
 0x4fc   : > { %3487 = vmatprep.subr.bf16.mxu1 %v5791_v6  ;;  %2565 = vmatprep.subr.bf16.mxu0 %v4831_v8  ;;  %v5935_v8 = vld [vmem:[#allocation119_spill] sm:$0xff] }
 0x4fd   : > { %3501 = vmatprep.mubr.msk.bf16.mxu1 %vm3769_vm0, %v5791_v6  ;;  %2595 = vmatprep.mubr.bf16.mxu0 %v5795_v11  ;;  %v5937_v11 = vld [vmem:[#allocation120_spill] sm:$0xff] }
 0x4ff   : > { %3488 = vmatpush3.bf16.msra.mxu1 %v4717_v50  ;;  %2566 = vmatpush1.bf16.msra.mxu0 %v4842_v10  ;;  %v5936_v10 = vld [vmem:[#allocation111_spill] sm:$0xff]  ;;  %v5947_v50 = vld [vmem:[#allocation126_spill] sm:$0xff] }
 0x500   : > { %3489 = vmatprep.subr.bf16.mxu1 %v5791_v6  ;;  %2567 = vmatprep.subr.bf16.mxu0 %v4848_v12  ;;  %v5938_v12 = vld [vmem:[#allocation112_spill] sm:$0xff] }
 0x503   : > { %3490 = vmatpush3.bf16.msra.mxu1 %v4734_v52  ;;  %2568 = vmatpush1.bf16.msra.mxu0 %v4861_v14  ;;  %v5939_v14 = vld [vmem:[#allocation121_spill] sm:$0xff]  ;;  %v5949_v52 = vld [vmem:[#allocation128_spill] sm:$0xff] }
 0x504   : > { %3491 = vmatprep.subr.bf16.mxu1 %v5791_v6  ;;  %2569 = vmatprep.subr.bf16.mxu0 %v4866_v15  ;;  %v5940_v15 = vld [vmem:[#allocation113_spill] sm:$0xff] }
 0x507   : > { %3492 = vmatpush3.bf16.msra.mxu1 %v4752_v57  ;;  %2570 = vmatpush1.bf16.msra.mxu0 %v4877_v19  ;;  %v5941_v19 = vld [vmem:[#allocation122_spill] sm:$0xff]  ;;  %v5950_v57 = vld [vmem:[#allocation129_spill] sm:$0xff] }
 0x508   : > { %3493 = vmatprep.subr.bf16.mxu1 %v5791_v6  ;;  %2571 = vmatprep.subr.bf16.mxu0 %v4882_v22  ;;  %v5942_v22 = vld [vmem:[#allocation114_spill] sm:$0xff] }
 0x50b   : > { %3494 = vmatpush3.bf16.msra.mxu1 %v4768_v28  ;;  %2572 = vmatpush1.bf16.msra.mxu0 %v4893_v17  ;;  %v5952_v28 = vld [vmem:[#allocation131_spill] sm:$0xff] }
 0x50c   : > { %3495 = vmatprep.subr.bf16.mxu1 %v5791_v6  ;;  %2573 = vmatprep.subr.bf16.mxu0 %v4898_v27  ;;  %v5943_v27 = vld [vmem:[#allocation123_spill] sm:$0xff] }
 0x50f   : > { %3496 = vmatpush3.bf16.msra.mxu1 %v4784_v51  ;;  %2574 = vmatpush1.bf16.msra.mxu0 %v4909_v24 }
 0x510   : > { %3497 = vmatprep.subr.bf16.mxu1 %v5791_v6  ;;  %2575 = vmatprep.subr.bf16.mxu0 %v4914_v31  ;;  %v5944_v31 = vld [vmem:[#allocation116_spill] sm:$0xff] }
 0x513   : > { %3498 = vmatpush3.bf16.msra.mxu1 %v4800_v1  ;;  %2576 = vmatpush1.bf16.msra.mxu0 %v4925_v30  ;;  %v5931_v1 = vld [vmem:[#allocation117_spill] sm:$0xff] }
 0x514   : > { %3499 = vmatprep.subr.bf16.mxu1 %v5791_v6  ;;  %2577 = vmatprep.subr.bf16.mxu0 %v4930_v34  ;;  %v5945_v34 = vld [vmem:[#allocation124_spill] sm:$0xff] }
 0x517   : > { %3500 = vmatpush3.bf16.msra.mxu1 %v4818_v5  ;;  %2578 = vmatpush1.bf16.msra.mxu0 %v5929_v0  ;;  %v5933_v5 = vld [vmem:[#allocation118_spill] sm:$0xff] }
 0x518   : > { %3505 = vmatprep.subr.bf16.mxu1 %v5791_v6  ;;  %3525 = vmatprep.subr.bf16.mxu0 %v5791_v6 }
 0x51a   : > { %3502 = vmatmul.mubr.bf16.vlgmr.msra.gmra.mrb[36].mxu1 %v5374_v9  ;;  %2596 = vmatmul.mubr.bf16.vlgmr.msra.gmra.mrb[40].mxu0 %v5401_v56 }
 0x51b   : > { %3506 = vmatpush3.bf16.msra.mxu1 %v5930_v2  ;;  %3521 = vmatprep.mubr.msk.bf16.mxu1 %vm3769_vm0, %v5791_v6 }
 0x51c   : > { %3507 = vmatprep.subr.bf16.mxu1 %v5791_v6  ;;  %3526 = vmatpush3.bf16.msra.mxu0 %v5931_v1 }
 0x51d   : > { %3527 = vmatprep.subr.bf16.mxu0 %v5791_v6  ;;  %3541 = vmatprep.mubr.msk.bf16.mxu0 %vm3769_vm0, %v5791_v6 }
 0x51f   : > { %3508 = vmatpush3.bf16.msra.mxu1 %v5932_v4 }
 0x520   : > { %3509 = vmatprep.subr.bf16.mxu1 %v5791_v6  ;;  %3528 = vmatpush3.bf16.msra.mxu0 %v5933_v5 }
 0x521   : > { %3529 = vmatprep.subr.bf16.mxu0 %v5791_v6 }
 0x523   : > { %3510 = vmatpush3.bf16.msra.mxu1 %v5934_v7 }
 0x524   : > { %3511 = vmatprep.subr.bf16.mxu1 %v5791_v6  ;;  %3530 = vmatpush3.bf16.msra.mxu0 %v5935_v8 }
 0x525   : > { %3531 = vmatprep.subr.bf16.mxu0 %v5791_v6 }
 0x527   : > { %3512 = vmatpush3.bf16.msra.mxu1 %v5936_v10  ;;  %v2559_v10 = vld [vmem:[%s5507_s19 + $0x8] sm:$0xff] }
 0x528   : > { %3513 = vmatprep.subr.bf16.mxu1 %v5791_v6  ;;  %3532 = vmatpush3.bf16.msra.mxu0 %v5937_v11 }
 0x529   : > { %3533 = vmatprep.subr.bf16.mxu0 %v5791_v6 }
 0x52b   : > { %3514 = vmatpush3.bf16.msra.mxu1 %v5938_v12 }
 0x52c   : > { %3515 = vmatprep.subr.bf16.mxu1 %v5791_v6  ;;  %3534 = vmatpush3.bf16.msra.mxu0 %v5939_v14 }
 0x52d   : > { %3535 = vmatprep.subr.bf16.mxu0 %v5791_v6 }
 0x52f   : > { %3516 = vmatpush3.bf16.msra.mxu1 %v5940_v15 }
 0x530   : > { %3517 = vmatprep.subr.bf16.mxu1 %v5791_v6  ;;  %3536 = vmatpush3.bf16.msra.mxu0 %v5941_v19 }
 0x531   : > { %3537 = vmatprep.subr.bf16.mxu0 %v5791_v6 }
 0x533   : > { %3518 = vmatpush3.bf16.msra.mxu1 %v5942_v22 }
 0x534   : > { %3519 = vmatprep.subr.bf16.mxu1 %v5791_v6  ;;  %3538 = vmatpush3.bf16.msra.mxu0 %v5943_v27 }
 0x535   : > { %3539 = vmatprep.subr.bf16.mxu0 %v5791_v6 }
 0x537   : > { %3520 = vmatpush3.bf16.msra.mxu1 %v5944_v31 }
 0x538   : > { %3540 = vmatpush3.bf16.msra.mxu0 %v5945_v34  ;;  %3545 = vmatprep.subr.bf16.mxu1 %v5791_v6 }
 0x53a   : > { %3522 = vmatmul.mubr.bf16.vlgmr.msra.gmra.mrb[40].mxu1 %v5401_v56  ;;  %v2447_v56 = vld [vmem:[%s5498_s13 + $0x10] sm:$0xff] }
 0x53b   : > { %3546 = vmatpush3.bf16.msra.mxu1 %v5946_v48  ;;  %3561 = vmatprep.mubr.msk.bf16.mxu1 %vm3769_vm0, %v5791_v6 }
 0x53c   : > { %3547 = vmatprep.subr.bf16.mxu1 %v5791_v6 }
 0x53f   : > { %3548 = vmatpush3.bf16.msra.mxu1 %v5947_v50 }
 0x540   : > { %3549 = vmatprep.subr.bf16.mxu1 %v5791_v6 }
 0x543   : > { %3550 = vmatpush3.bf16.msra.mxu1 %v5948_v45 }
 0x544   : > { %3551 = vmatprep.subr.bf16.mxu1 %v5791_v6 }
 0x547   : > { %3552 = vmatpush3.bf16.msra.mxu1 %v5949_v52 }
 0x548   : > { %3553 = vmatprep.subr.bf16.mxu1 %v5791_v6 }
 0x54b   : > { %3554 = vmatpush3.bf16.msra.mxu1 %v5950_v57 }
 0x54c   : > { %3555 = vmatprep.subr.bf16.mxu1 %v5791_v6 }
 0x54f   : > { %3556 = vmatpush3.bf16.msra.mxu1 %v5951_v39 }
 0x550   : > { %3557 = vmatprep.subr.bf16.mxu1 %v5791_v6 }
 0x553   : > { %3558 = vmatpush3.bf16.msra.mxu1 %v5952_v28 }
 0x554   : > { %3559 = vmatprep.subr.bf16.mxu1 %v5791_v6 }
 0x557   : > { %3560 = vmatpush3.bf16.msra.mxu1 %v5953_v58 }
 0x5ad   : > { %v2383_v51 = vpop.f32.mrb[32].mxu0 }
 0x5ae   : > { %v2389_v17 = vadd.f32 %v2971_v41, %v2383_v51  ;;  %v3463_v24 = vpop.f32.mrb[33].mxu0  ;;  %v2560_v41 = vld [vmem:[%s5507_s19 + $0x10] sm:$0xff] }
 0x5af   : > { %v2386_v30 = vpop.f32.mrb[34].mxu0 }
 0x5b0   : > { %2972 = vst [vmem:[%s5203_s16 + $0x10] sm:$0xff] %v2389_v17  ;;  %v3464_v18 = vpop.f32.mrb[35].mxu0 }
 0x5b7   : > { %v2392_v6 = vld [vmem:[%s2391_s14] sm:$0xff] }
 0x5cd   : > { %v2484_v16 = vpop.f32.mrb[36].mxu0  ;;  %v2428_v36 = vpop.f32.mrb[32].mxu1 }
 0x5ce   : > { %v2531_v35 = vadd.f32 %v2484_v16, %v2445_v38  ;;  %v2434_v25 = vadd.f32 %v2428_v36, %v2392_v6  ;;  %v2486_v29 = vpop.f32.mrb[37].mxu0  ;;  %v3483_v26 = vpop.f32.mrb[33].mxu1 }
 0x5cf   : > { %v2488_v20 = vpop.f32.mrb[38].mxu0  ;;  %v2431_v63 = vpop.f32.mrb[34].mxu1  ;;  %v2538_v3 = vadd.f32 %v2486_v29, %v2446_v42 }
 0x5d0   : > { %v2976_v23 = vmul.f32 -1.442695, %v2531_v35  ;;  %2435 = vst [vmem:[%s2391_s14] sm:$0xff] %v2434_v25  ;;  %v2489_v60 = vpop.f32.mrb[39].mxu0  ;;  %v3484_v9 = vpop.f32.mrb[35].mxu1 }
 0x5d1   : > { %v2977_v62 = vmul.f32 -1.442695, %v2538_v3 }
 0x5d2   : > { %3713 = vpow2.f32 %v2976_v23 }
 0x5d3   : > { %3715 = vpow2.f32 %v2977_v62 }
 0x5d7   : > { %v2983_v25 = vld [vmem:[%s5203_s16 + $0x18] sm:$0xff] }
 0x5dc   : > { %v3714_v32 = vpop.eup %3713 }
 0x5dd   : > { %v2535_v61 = vadd.f32 1.0, %v3714_v32  ;;  %v3716_v13 = vpop.eup %3715 }
 0x5de   : > { %v2542_v44 = vadd.f32 1.0, %v3716_v13 }
 0x5df   : > { %3717 = vrcp.f32 %v2535_v61 }
 0x5e0   : > { %3719 = vrcp.f32 %v2542_v44 }
 0x5e9   : > { %v3718_v37 = vpop.eup %3717 }
 0x5ea   : > { %v3720_v12 = vpop.eup %3719 }
 0x5eb   : > { %v2549_v19 = vsub.f32 1.0, %v3720_v12  ;;  %v2551_v31 = vmul.f32 %v3720_v12, %v5370_v21 }
 0x5ed   : > { %v2525_v40 = vpop.f32.mrb[36].mxu1  ;;  %v2597_v49 = vpop.f32.mrb[40].mxu0 }
 0x5ee   : > { %v2545_v46 = vadd.f32 %v5954_v33, %v2525_v40  ;;  %v2644_v47 = vadd.f32 %v2597_v49, %v2558_v59  ;;  %v3503_v55 = vpop.f32.mrb[37].mxu1  ;;  %v2599_v54 = vpop.f32.mrb[41].mxu0 }
 0x5ef   : > { %v2528_v0 = vpop.f32.mrb[38].mxu1  ;;  %v2601_v2 = vpop.f32.mrb[42].mxu0  ;;  %v2651_v11 = vadd.f32 %v2599_v54, %v2559_v10 }
 0x5f0   : > { %v2546_v1 = vmul.f32 %v3718_v37, %v2545_v46  ;;  %v2979_v4 = vmul.f32 -1.442695, %v2644_v47  ;;  %v3504_v5 = vpop.f32.mrb[39].mxu1  ;;  %v2602_v7 = vpop.f32.mrb[43].mxu0 }
 0x5f1   : > { %v2980_v14 = vmul.f32 -1.442695, %v2651_v11 }
 0x5f2   : > { %v2547_v8 = vadd.f32 %v2546_v1, %v2447_v56  ;;  %3721 = vpow2.f32 %v2979_v4 }
 0x5f4   : > { %3723 = vtanh.f32 %v2547_v8 }
 0x5f5   : > { %3725 = vpow2.f32 %v2980_v14 }
 0x5fc   : > { %v3722_v15 = vpop.eup %3721 }
 0x5fd   : > { %v2648_v34 = vadd.f32 1.0, %v3722_v15 }
 0x5fe   : > { %v3724_v22 = vpop.eup %3723 }
 0x5ff   : > { %v2550_v27 = vmul.f32 %v3724_v22, %v2549_v19  ;;  %3727 = vrcp.f32 %v2648_v34  ;;  %v3726_v45 = vpop.eup %3725 }
 0x600   : > { %v2655_v52 = vadd.f32 1.0, %v3726_v45 }
 0x601   : > { %v2552_v48 = vadd.f32 %v2551_v31, %v2550_v27 }
 0x602   : > { %3729 = vrcp.f32 %v2655_v52 }
 0x603   : > { %2666 = vst [vmem:[#allocation4] sm:$0xff] %v2552_v48  ;;  %v2670_v50 = vpack.c.bf16 %v2552_v48, %v2552_v48 }
 0x605   : > { %3542 = vmatmul.mubr.bf16.vlgmr.msra.gmra.mrb[44].mxu0 %v2670_v50 }
 0x609   : > { %v3728_v58 = vpop.eup %3727 }
 0x60c   : > { %v3730_v30 = vpop.eup %3729 }
 0x60d   : > { %v2638_v57 = vpop.f32.mrb[40].mxu1  ;;  %v2662_v18 = vsub.f32 1.0, %v3730_v30  ;;  %v2664_v6 = vmul.f32 %v3730_v30, %v5395_v53 }
 0x60e   : > { %v2658_v39 = vadd.f32 %v5876_v43, %v2638_v57  ;;  %v3523_v28 = vpop.f32.mrb[41].mxu1 }
 0x60f   : > { %v2641_v51 = vpop.f32.mrb[42].mxu1 }
 0x610   : > { %v2659_v17 = vmul.f32 %v3728_v58, %v2658_v39  ;;  %v3524_v24 = vpop.f32.mrb[43].mxu1 }
 0x612   : > { %v2660_v21 = vadd.f32 %v2659_v17, %v2560_v41 }
 0x614   : > { %3731 = vtanh.f32 %v2660_v21 }
 0x61e   : > { %v3732_v38 = vpop.eup %3731 }
 0x61f   : > { %v2663_v16 = vmul.f32 %v3732_v38, %v2662_v18 }
 0x621   : > { %v2665_v36 = vadd.f32 %v2664_v6, %v2663_v16 }
 0x623   : > { %2667 = vst [vmem:[#allocation5] sm:$0xff] %v2665_v36  ;;  %v2715_v35 = vpack.c.bf16 %v2665_v36, %v2665_v36 }
 0x625   : > { %3562 = vmatmul.mubr.bf16.vlgmr.msra.gmra.mrb[44].mxu1 %v2715_v35 }
 0x6d8   : > { %v2705_v29 = vpop.f32.mrb[44].mxu0 }
 0x6d9   : > { %v2711_v26 = vadd.f32 %v2983_v25, %v2705_v29  ;;  %v3543_v20 = vpop.f32.mrb[45].mxu0 }
 0x6da   : > { %v2708_v63 = vpop.f32.mrb[46].mxu0 }
 0x6db   : > { %2984 = vst [vmem:[%s5203_s16 + $0x18] sm:$0xff] %v2711_v26  ;;  %v3544_v23 = vpop.f32.mrb[47].mxu0 }
 0x6e2   : > { %v2714_v60 = vld [vmem:[%s2713_s28] sm:$0xff] }
 0x6f5   :  { %1104 = sbr.rel (!%p1102_p0) target bundleno = 341 (0x155), region = 91 }
 0x6f8   : > { %v2750_v9 = vpop.f32.mrb[44].mxu1 }
 0x6f9   : > { %v2756_v42 = vadd.f32 %v2750_v9, %v2714_v60  ;;  %v3563_v3 = vpop.f32.mrb[45].mxu1 }
 0x6fa   : > { %v2753_v62 = vpop.f32.mrb[46].mxu1 }
 0x6fb   : > { %2757 = vst [vmem:[%s2713_s28] sm:$0xff] %v2756_v42  ;;  %v3564_v32 = vpop.f32.mrb[47].mxu1 }
 0x6fc   :  { %3744 = shalt.err (!%p3741_p5)
}
 0x6fd   :  { %s3745_s21 = scalar_lea.hbm %s5547_s12, 2048 }
 0x6fe   :  { %p3746_p6 = scmp.ne.s32.totalorder %s5547_s12, %s3745_s21  ;;  %p3749_p7 = scmp.lt.u32.totalorder %s3745_s21, %s5547_s12 }
 0x700   :  { %p3751_p8 = pnand %p3749_p7, %p3746_p6 }
 0x702   :  { %3754 = shalt.err (!%p3751_p8)
}
 0x703   :  { %s3771_s4 = smov 128   ;;  %s3772_s23 = smov 8  }
 0x704   :  { %2769 = dma.vmem_to_hbm [thread:$0]  %s2764_s20, 2048, %s5547_s12, [#allocation7], %s3771_s4, %s3771_s4, %s3772_s23  }
 0x705   :  { %3759 = dma.done.wait [#allocation7], 2048  }
 0x706   :  { %3760 = vsyncadd [#allocation7], 4294965248 }
 0x707   :  { %2773 = vsyncpa [#allocation7], 1 }

</bundles_post_ra>
